<compile_context>
chip_gen: v7x
topology: tpu7x:2x2x1
jax: 0.10.0
libtpu: 0.0.40
codegen_flags: <defaults>
</compile_context>

<pallas_src>
import math

import jax
import jax.numpy as jnp
from jax import lax
from jax.experimental import pallas as pl
from jax.experimental.pallas import tpu as pltpu


def _conv3x3_im2col_kernel(x_ref, w_ref, b_ref, o_ref, xpad_ref, p_ref):
    """3x3 'same' conv as one im2col matmul.

    x_ref   : (B, Wd, L, Cin)       activation, channels-last (full block in VMEM)
    w_ref   : (Cout, 9*Cin) bf16    matmul-ready weights, cols ordered (kh, kw, cin)
    b_ref   : (Cout, 1)             bias
    o_ref   : (Cout, B*Wd*L)        lane-dense output slab
    xpad_ref: (B, Wd+2, L+2, Cin)   VMEM scratch: zero halo + interior copy
    p_ref   : (B*Wd*L, 9*Cin)       VMEM scratch: im2col patch matrix
    """
    B, Wd, L, Cin = x_ref.shape
    WL = Wd * L

    # Kernel-side zero padding: zero the halo once, then copy the interior.
    # VMEM-only traffic; the padded activation never round-trips HBM.
    xpad_ref[...] = jnp.zeros_like(xpad_ref)
    xpad_ref[:, 1:Wd + 1, 1:L + 1, :] = x_ref[...]

    # im2col: 9 statically shifted slices per batch element packed into a
    # (B*Wd*L, 9*Cin) patch matrix (batch folded into the matmul M dimension).
    for b in range(B):                       # B is small and static
        xb = xpad_ref[b]                     # (Wd+2, L+2, Cin)
        for kh in range(3):
            for kw in range(3):
                t = kh * 3 + kw
                patch = xb[kh:kh + Wd, kw:kw + L, :]          # (Wd, L, Cin)
                p_ref[b * WL:(b + 1) * WL, t * Cin:(t + 1) * Cin] = (
                    patch.reshape(WL, Cin))

    # One MXU matmul: (Cout, 9*Cin) x (B*Wd*L, 9*Cin)^T -> (Cout, B*Wd*L).
    # bf16 operands, f32 accumulation; result + store are lane-dense.
    p = p_ref[...].astype(jnp.bfloat16)
    acc = lax.dot_general(
        w_ref[...], p,
        dimension_numbers=(((1,), (1,)), ((), ())),
        preferred_element_type=jnp.float32)                   # (Cout, B*Wd*L)
    o_ref[...] = (acc + b_ref[...]).astype(o_ref.dtype)


def conv3x3_lane_dense(y_cl, wmat_bf16, bias_col):
    """3x3 conv, stride 1, padding 1 on channels-last (B, Wd, L, Cin).

    Returns the conv output channel-major: (Cout, B, Wd, L).
    """
    B, Wd, L, Cin = y_cl.shape
    Cout = wmat_bf16.shape[0]
    M = B * Wd * L
    out_flat = pl.pallas_call(
        _conv3x3_im2col_kernel,
        out_shape=jax.ShapeDtypeStruct((Cout, M), jnp.float32),
        # Whole arrays as single VMEM blocks (no grid): one invocation removes
        # per-grid-step overhead and gives the MXU the full B*Wd*L M dimension.
        # TODO(synk): for large activations (real EDSR, Cin=64, 512^2) add a
        # spatially tiled grid with a +2 halo ("parallel" semantics for the two
        # v7x TensorCores) and a vmem_limit_bytes sized for 64 MiB VMEM.
        scratch_shapes=[
            pltpu.VMEM((B, Wd + 2, L + 2, Cin), y_cl.dtype),   # padded activation
            pltpu.VMEM((M, 9 * Cin), y_cl.dtype),              # im2col patches
        ],
    )(y_cl, wmat_bf16, bias_col)
    return out_flat.reshape(Cout, B, Wd, L)


def upsampler1d_forward(x_nchw, w_oihw, bias, scale):
    """Exact semantics of Upsampler1D.forward (NCHW in, NCHW out).

    x_nchw: (B, n_feat, H, W); w_oihw: (2*n_feat, n_feat, 3, 3) torch-layout
    conv weight (padding=1 conv); bias: (2*n_feat,).  Returns (B, n_feat, H*scale, W).
    """
    scale = int(scale)
    if scale <= 0 or scale & (scale - 1) != 0:
        raise NotImplementedError("scale must be a power of 2")
    B, C, H, W = x_nchw.shape
    Cout = w_oihw.shape[0]                      # 2*C

    # Matmul-ready weights/bias, built once and shared by all stages:
    # wmat[cout, (kh*3 + kw)*Cin + cin] = w_oihw[cout, cin, kh, kw]
    wmat = (jnp.transpose(w_oihw, (0, 2, 3, 1))
            .reshape(Cout, 9 * C).astype(jnp.bfloat16))
    bcol = bias.reshape(Cout, 1).astype(jnp.float32)

    # torch: x.permute(0,1,3,2) -> (B, C, W, H); working layout is channels-last
    # (B, W, L, C) where L (starts at H) is the axis being upsampled.
    y = jnp.transpose(x_nchw, (0, 3, 2, 1))
    for _ in range(int(math.log2(scale))):
        Bq, Wd, L, _ = y.shape
        out_cm = conv3x3_lane_dense(y, wmat, bcol)          # (2C, B, Wd, L)
        # PixelShuffle1D(2): next[b, wd, 2l+u, c] = conv[b, u*C + c, wd, l]
        # TODO(synk): could be fused into the kernel's output write to save one
        # activation read+write per stage; kept as XLA glue here.
        out5 = out_cm.reshape(2, C, Bq, Wd, L)
        y = jnp.transpose(out5, (2, 3, 4, 0, 1)).reshape(Bq, Wd, 2 * L, C)
    # (B, W, H*scale, C) -> torch's final permute(0,1,3,2) => (B, C, H*scale, W)
    return jnp.transpose(y, (0, 3, 2, 1))


# ------------------------- pure-JAX reference (mirrors torch literally) ------
def _pixel_shuffle_1d_ref(x):
    # Literal transcription of PixelShuffle1D.forward with upscale_factor=2:
    # out[b, c, h, 2*w + u] = x[b, u*C + c, h, w]
    B, C2, Hh, Ws = x.shape
    C = C2 // 2
    x = x.reshape(B, 2, C, Hh, Ws)
    x = jnp.transpose(x, (0, 2, 3, 4, 1))
    return x.reshape(B, C, Hh, 2 * Ws)


def _ref_forward(x_nchw, w_oihw, bias, scale):
    scale = int(scale)
    x = jnp.transpose(x_nchw, (0, 1, 3, 2))
    for _ in range(int(math.log2(scale))):
        x = lax.conv_general_dilated(
            x, w_oihw, window_strides=(1, 1), padding=((1, 1), (1, 1)),
            dimension_numbers=("NCHW", "OIHW", "NCHW"))
        x = x + bias.reshape(1, -1, 1, 1)
        x = _pixel_shuffle_1d_ref(x)
    return jnp.transpose(x, (0, 1, 3, 2))


if __name__ == "__main__":
    # Small shapes consistent with the module: batch=2, n_feat=4, H=W=16.
    B, n_feat, H, W = 2, 4, 16, 16

    key = jax.random.PRNGKey(0)
    kx, kw, kb = jax.random.split(key, 3)
    x = jax.random.normal(kx, (B, n_feat, H, W), dtype=jnp.float32)
    # conv(n_feat, 2*n_feat, 3, bias=True), torch default init, padding=1.
    fan_in = n_feat * 3 * 3
    bound = 1.0 / math.sqrt(fan_in)
    w_oihw = jax.random.uniform(kw, (2 * n_feat, n_feat, 3, 3),
                                minval=-bound, maxval=bound, dtype=jnp.float32)
    bias = jax.random.uniform(kb, (2 * n_feat,),
                              minval=-bound, maxval=bound, dtype=jnp.float32)

    fwd = jax.jit(upsampler1d_forward, static_argnames=("scale",))

    for scale in (2, 4):
        out = jax.block_until_ready(fwd(x, w_oihw, bias, scale=scale))
        ref = jax.block_until_ready(_ref_forward(x, w_oihw, bias, scale))
        assert out.shape == (B, n_feat, H * scale, W), (scale, out.shape)
        err = float(jnp.max(jnp.abs(out - ref)))
        # bf16 MXU operands (f32 accumulation) vs f32 reference conv.
        assert err < 3e-2, (scale, err)

    print("KERNEL_OK")
</pallas_src>

<mosaic_0001>
module attributes {stable_mosaic.version = 11 : i64} {
  func.func @_conv3x3_im2col_kernel(%arg0: memref<2x16x16x4xf32, #tpu.memory_space<vmem>>, %arg1: memref<8x36xbf16, #tpu.memory_space<vmem>>, %arg2: memref<8x1xf32, #tpu.memory_space<vmem>>, %arg3: memref<8x512xf32, #tpu.memory_space<vmem>>, %arg4: memref<2x18x18x4xf32, #tpu.memory_space<vmem>>, %arg5: memref<512x36xf32, #tpu.memory_space<vmem>>) attributes {dimension_semantics = [], scalar_prefetch = 0 : i64, scratch_operands = 2 : i64, tpu.core_type = #tpu.core_type<tc>} {
    %cst = arith.constant 0.000000e+00 : f32
    %0 = vector.broadcast %cst : f32 to vector<2x18x18x4xf32>
    %c0 = arith.constant 0 : index
    %c0_0 = arith.constant 0 : index
    %c0_1 = arith.constant 0 : index
    %c0_2 = arith.constant 0 : index
    %1 = vector.load %arg4[%c0, %c0_0, %c0_1, %c0_2] : memref<2x18x18x4xf32, #tpu.memory_space<vmem>>, vector<2x18x18x4xf32>
    tpu.vector_store %arg4[%c0, %c0_0, %c0_1, %c0_2], %0 {strides = array<i32>} : memref<2x18x18x4xf32, #tpu.memory_space<vmem>>, vector<2x18x18x4xf32>,
    %c0_3 = arith.constant 0 : index
    %c0_4 = arith.constant 0 : index
    %c0_5 = arith.constant 0 : index
    %c0_6 = arith.constant 0 : index
    %2 = vector.load %arg0[%c0_3, %c0_4, %c0_5, %c0_6] : memref<2x16x16x4xf32, #tpu.memory_space<vmem>>, vector<2x16x16x4xf32>
    %c0_7 = arith.constant 0 : index
    %c1 = arith.constant 1 : index
    %c1_8 = arith.constant 1 : index
    %c0_9 = arith.constant 0 : index
    %3 = vector.load %arg4[%c0_7, %c1, %c1_8, %c0_9] : memref<2x18x18x4xf32, #tpu.memory_space<vmem>>, vector<2x16x16x4xf32>
    tpu.vector_store %arg4[%c0_7, %c1, %c1_8, %c0_9], %2 {strides = array<i32>} : memref<2x18x18x4xf32, #tpu.memory_space<vmem>>, vector<2x16x16x4xf32>,
    %c0_10 = arith.constant 0 : index
    %c0_11 = arith.constant 0 : index
    %c0_12 = arith.constant 0 : index
    %c0_13 = arith.constant 0 : index
    %4 = vector.load %arg4[%c0_10, %c0_11, %c0_12, %c0_13] : memref<2x18x18x4xf32, #tpu.memory_space<vmem>>, vector<1x18x18x4xf32>
    %5 = vector.shape_cast %4 : vector<1x18x18x4xf32> to vector<18x18x4xf32>
    %6 = vector.extract_strided_slice %5 {offsets = [0, 0, 0], sizes = [16, 16, 4], strides = [1, 1, 1]} : vector<18x18x4xf32> to vector<16x16x4xf32>
    %7 = vector.shape_cast %6 : vector<16x16x4xf32> to vector<256x4xf32>
    %c0_14 = arith.constant 0 : index
    %c0_15 = arith.constant 0 : index
    %8 = vector.load %arg5[%c0_14, %c0_15] : memref<512x36xf32, #tpu.memory_space<vmem>>, vector<256x4xf32>
    tpu.vector_store %arg5[%c0_14, %c0_15], %7 {strides = array<i32>} : memref<512x36xf32, #tpu.memory_space<vmem>>, vector<256x4xf32>,
    %9 = vector.extract_strided_slice %5 {offsets = [0, 1, 0], sizes = [16, 16, 4], strides = [1, 1, 1]} : vector<18x18x4xf32> to vector<16x16x4xf32>
    %10 = vector.shape_cast %9 : vector<16x16x4xf32> to vector<256x4xf32>
    %c0_16 = arith.constant 0 : index
    %c4 = arith.constant 4 : index
    %11 = vector.load %arg5[%c0_16, %c4] : memref<512x36xf32, #tpu.memory_space<vmem>>, vector<256x4xf32>
    tpu.vector_store %arg5[%c0_16, %c4], %10 {strides = array<i32>} : memref<512x36xf32, #tpu.memory_space<vmem>>, vector<256x4xf32>,
    %12 = vector.extract_strided_slice %5 {offsets = [0, 2, 0], sizes = [16, 16, 4], strides = [1, 1, 1]} : vector<18x18x4xf32> to vector<16x16x4xf32>
    %13 = vector.shape_cast %12 : vector<16x16x4xf32> to vector<256x4xf32>
    %c0_17 = arith.constant 0 : index
    %c8 = arith.constant 8 : index
    %14 = vector.load %arg5[%c0_17, %c8] : memref<512x36xf32, #tpu.memory_space<vmem>>, vector<256x4xf32>
    tpu.vector_store %arg5[%c0_17, %c8], %13 {strides = array<i32>} : memref<512x36xf32, #tpu.memory_space<vmem>>, vector<256x4xf32>,
    %15 = vector.extract_strided_slice %5 {offsets = [1, 0, 0], sizes = [16, 16, 4], strides = [1, 1, 1]} : vector<18x18x4xf32> to vector<16x16x4xf32>
    %16 = vector.shape_cast %15 : vector<16x16x4xf32> to vector<256x4xf32>
    %c0_18 = arith.constant 0 : index
    %c12 = arith.constant 12 : index
    %17 = vector.load %arg5[%c0_18, %c12] : memref<512x36xf32, #tpu.memory_space<vmem>>, vector<256x4xf32>
    tpu.vector_store %arg5[%c0_18, %c12], %16 {strides = array<i32>} : memref<512x36xf32, #tpu.memory_space<vmem>>, vector<256x4xf32>,
    %18 = vector.extract_strided_slice %5 {offsets = [1, 1, 0], sizes = [16, 16, 4], strides = [1, 1, 1]} : vector<18x18x4xf32> to vector<16x16x4xf32>
    %19 = vector.shape_cast %18 : vector<16x16x4xf32> to vector<256x4xf32>
    %c0_19 = arith.constant 0 : index
    %c16 = arith.constant 16 : index
    %20 = vector.load %arg5[%c0_19, %c16] : memref<512x36xf32, #tpu.memory_space<vmem>>, vector<256x4xf32>
    tpu.vector_store %arg5[%c0_19, %c16], %19 {strides = array<i32>} : memref<512x36xf32, #tpu.memory_space<vmem>>, vector<256x4xf32>,
    %21 = vector.extract_strided_slice %5 {offsets = [1, 2, 0], sizes = [16, 16, 4], strides = [1, 1, 1]} : vector<18x18x4xf32> to vector<16x16x4xf32>
    %22 = vector.shape_cast %21 : vector<16x16x4xf32> to vector<256x4xf32>
    %c0_20 = arith.constant 0 : index
    %c20 = arith.constant 20 : index
    %23 = vector.load %arg5[%c0_20, %c20] : memref<512x36xf32, #tpu.memory_space<vmem>>, vector<256x4xf32>
    tpu.vector_store %arg5[%c0_20, %c20], %22 {strides = array<i32>} : memref<512x36xf32, #tpu.memory_space<vmem>>, vector<256x4xf32>,
    %24 = vector.extract_strided_slice %5 {offsets = [2, 0, 0], sizes = [16, 16, 4], strides = [1, 1, 1]} : vector<18x18x4xf32> to vector<16x16x4xf32>
    %25 = vector.shape_cast %24 : vector<16x16x4xf32> to vector<256x4xf32>
    %c0_21 = arith.constant 0 : index
    %c24 = arith.constant 24 : index
    %26 = vector.load %arg5[%c0_21, %c24] : memref<512x36xf32, #tpu.memory_space<vmem>>, vector<256x4xf32>
    tpu.vector_store %arg5[%c0_21, %c24], %25 {strides = array<i32>} : memref<512x36xf32, #tpu.memory_space<vmem>>, vector<256x4xf32>,
    %27 = vector.extract_strided_slice %5 {offsets = [2, 1, 0], sizes = [16, 16, 4], strides = [1, 1, 1]} : vector<18x18x4xf32> to vector<16x16x4xf32>
    %28 = vector.shape_cast %27 : vector<16x16x4xf32> to vector<256x4xf32>
    %c0_22 = arith.constant 0 : index
    %c28 = arith.constant 28 : index
    %29 = vector.load %arg5[%c0_22, %c28] : memref<512x36xf32, #tpu.memory_space<vmem>>, vector<256x4xf32>
    tpu.vector_store %arg5[%c0_22, %c28], %28 {strides = array<i32>} : memref<512x36xf32, #tpu.memory_space<vmem>>, vector<256x4xf32>,
    %30 = vector.extract_strided_slice %5 {offsets = [2, 2, 0], sizes = [16, 16, 4], strides = [1, 1, 1]} : vector<18x18x4xf32> to vector<16x16x4xf32>
    %31 = vector.shape_cast %30 : vector<16x16x4xf32> to vector<256x4xf32>
    %c0_23 = arith.constant 0 : index
    %c32 = arith.constant 32 : index
    %32 = vector.load %arg5[%c0_23, %c32] : memref<512x36xf32, #tpu.memory_space<vmem>>, vector<256x4xf32>
    tpu.vector_store %arg5[%c0_23, %c32], %31 {strides = array<i32>} : memref<512x36xf32, #tpu.memory_space<vmem>>, vector<256x4xf32>,
    %c1_24 = arith.constant 1 : index
    %c0_25 = arith.constant 0 : index
    %c0_26 = arith.constant 0 : index
    %c0_27 = arith.constant 0 : index
    %33 = vector.load %arg4[%c1_24, %c0_25, %c0_26, %c0_27] : memref<2x18x18x4xf32, #tpu.memory_space<vmem>>, vector<1x18x18x4xf32>
    %34 = vector.shape_cast %33 : vector<1x18x18x4xf32> to vector<18x18x4xf32>
    %35 = vector.extract_strided_slice %34 {offsets = [0, 0, 0], sizes = [16, 16, 4], strides = [1, 1, 1]} : vector<18x18x4xf32> to vector<16x16x4xf32>
    %36 = vector.shape_cast %35 : vector<16x16x4xf32> to vector<256x4xf32>
    %c256 = arith.constant 256 : index
    %c0_28 = arith.constant 0 : index
    %37 = vector.load %arg5[%c256, %c0_28] : memref<512x36xf32, #tpu.memory_space<vmem>>, vector<256x4xf32>
    tpu.vector_store %arg5[%c256, %c0_28], %36 {strides = array<i32>} : memref<512x36xf32, #tpu.memory_space<vmem>>, vector<256x4xf32>,
    %38 = vector.extract_strided_slice %34 {offsets = [0, 1, 0], sizes = [16, 16, 4], strides = [1, 1, 1]} : vector<18x18x4xf32> to vector<16x16x4xf32>
    %39 = vector.shape_cast %38 : vector<16x16x4xf32> to vector<256x4xf32>
    %c256_29 = arith.constant 256 : index
    %c4_30 = arith.constant 4 : index
    %40 = vector.load %arg5[%c256_29, %c4_30] : memref<512x36xf32, #tpu.memory_space<vmem>>, vector<256x4xf32>
    tpu.vector_store %arg5[%c256_29, %c4_30], %39 {strides = array<i32>} : memref<512x36xf32, #tpu.memory_space<vmem>>, vector<256x4xf32>,
    %41 = vector.extract_strided_slice %34 {offsets = [0, 2, 0], sizes = [16, 16, 4], strides = [1, 1, 1]} : vector<18x18x4xf32> to vector<16x16x4xf32>
    %42 = vector.shape_cast %41 : vector<16x16x4xf32> to vector<256x4xf32>
    %c256_31 = arith.constant 256 : index
    %c8_32 = arith.constant 8 : index
    %43 = vector.load %arg5[%c256_31, %c8_32] : memref<512x36xf32, #tpu.memory_space<vmem>>, vector<256x4xf32>
    tpu.vector_store %arg5[%c256_31, %c8_32], %42 {strides = array<i32>} : memref<512x36xf32, #tpu.memory_space<vmem>>, vector<256x4xf32>,
    %44 = vector.extract_strided_slice %34 {offsets = [1, 0, 0], sizes = [16, 16, 4], strides = [1, 1, 1]} : vector<18x18x4xf32> to vector<16x16x4xf32>
    %45 = vector.shape_cast %44 : vector<16x16x4xf32> to vector<256x4xf32>
    %c256_33 = arith.constant 256 : index
    %c12_34 = arith.constant 12 : index
    %46 = vector.load %arg5[%c256_33, %c12_34] : memref<512x36xf32, #tpu.memory_space<vmem>>, vector<256x4xf32>
    tpu.vector_store %arg5[%c256_33, %c12_34], %45 {strides = array<i32>} : memref<512x36xf32, #tpu.memory_space<vmem>>, vector<256x4xf32>,
    %47 = vector.extract_strided_slice %34 {offsets = [1, 1, 0], sizes = [16, 16, 4], strides = [1, 1, 1]} : vector<18x18x4xf32> to vector<16x16x4xf32>
    %48 = vector.shape_cast %47 : vector<16x16x4xf32> to vector<256x4xf32>
    %c256_35 = arith.constant 256 : index
    %c16_36 = arith.constant 16 : index
    %49 = vector.load %arg5[%c256_35, %c16_36] : memref<512x36xf32, #tpu.memory_space<vmem>>, vector<256x4xf32>
    tpu.vector_store %arg5[%c256_35, %c16_36], %48 {strides = array<i32>} : memref<512x36xf32, #tpu.memory_space<vmem>>, vector<256x4xf32>,
    %50 = vector.extract_strided_slice %34 {offsets = [1, 2, 0], sizes = [16, 16, 4], strides = [1, 1, 1]} : vector<18x18x4xf32> to vector<16x16x4xf32>
    %51 = vector.shape_cast %50 : vector<16x16x4xf32> to vector<256x4xf32>
    %c256_37 = arith.constant 256 : index
    %c20_38 = arith.constant 20 : index
    %52 = vector.load %arg5[%c256_37, %c20_38] : memref<512x36xf32, #tpu.memory_space<vmem>>, vector<256x4xf32>
    tpu.vector_store %arg5[%c256_37, %c20_38], %51 {strides = array<i32>} : memref<512x36xf32, #tpu.memory_space<vmem>>, vector<256x4xf32>,
    %53 = vector.extract_strided_slice %34 {offsets = [2, 0, 0], sizes = [16, 16, 4], strides = [1, 1, 1]} : vector<18x18x4xf32> to vector<16x16x4xf32>
    %54 = vector.shape_cast %53 : vector<16x16x4xf32> to vector<256x4xf32>
    %c256_39 = arith.constant 256 : index
    %c24_40 = arith.constant 24 : index
    %55 = vector.load %arg5[%c256_39, %c24_40] : memref<512x36xf32, #tpu.memory_space<vmem>>, vector<256x4xf32>
    tpu.vector_store %arg5[%c256_39, %c24_40], %54 {strides = array<i32>} : memref<512x36xf32, #tpu.memory_space<vmem>>, vector<256x4xf32>,
    %56 = vector.extract_strided_slice %34 {offsets = [2, 1, 0], sizes = [16, 16, 4], strides = [1, 1, 1]} : vector<18x18x4xf32> to vector<16x16x4xf32>
    %57 = vector.shape_cast %56 : vector<16x16x4xf32> to vector<256x4xf32>
    %c256_41 = arith.constant 256 : index
    %c28_42 = arith.constant 28 : index
    %58 = vector.load %arg5[%c256_41, %c28_42] : memref<512x36xf32, #tpu.memory_space<vmem>>, vector<256x4xf32>
    tpu.vector_store %arg5[%c256_41, %c28_42], %57 {strides = array<i32>} : memref<512x36xf32, #tpu.memory_space<vmem>>, vector<256x4xf32>,
    %59 = vector.extract_strided_slice %34 {offsets = [2, 2, 0], sizes = [16, 16, 4], strides = [1, 1, 1]} : vector<18x18x4xf32> to vector<16x16x4xf32>
    %60 = vector.shape_cast %59 : vector<16x16x4xf32> to vector<256x4xf32>
    %c256_43 = arith.constant 256 : index
    %c32_44 = arith.constant 32 : index
    %61 = vector.load %arg5[%c256_43, %c32_44] : memref<512x36xf32, #tpu.memory_space<vmem>>, vector<256x4xf32>
    tpu.vector_store %arg5[%c256_43, %c32_44], %60 {strides = array<i32>} : memref<512x36xf32, #tpu.memory_space<vmem>>, vector<256x4xf32>,
    %c0_45 = arith.constant 0 : index
    %c0_46 = arith.constant 0 : index
    %62 = vector.load %arg5[%c0_45, %c0_46] : memref<512x36xf32, #tpu.memory_space<vmem>>, vector<512x36xf32>
    %63 = arith.truncf %62 : vector<512x36xf32> to vector<512x36xbf16>
    %c0_47 = arith.constant 0 : index
    %c0_48 = arith.constant 0 : index
    %64 = vector.load %arg1[%c0_47, %c0_48] : memref<8x36xbf16, #tpu.memory_space<vmem>>, vector<8x36xbf16>
    %cst_49 = arith.constant dense<0.000000e+00> : vector<8x512xf32>
    %65 = tpu.matmul %64, %63, %cst_49 {dimension_numbers = #tpu.dot_dimension_numbers<[1], [1], [0], [0], [0, 0, 1, 0], [], []>} : vector<8x36xbf16>, vector<512x36xbf16>, vector<8x512xf32> -> vector<8x512xf32>
    %c0_50 = arith.constant 0 : index
    %c0_51 = arith.constant 0 : index
    %66 = vector.load %arg2[%c0_50, %c0_51] : memref<8x1xf32, #tpu.memory_space<vmem>>, vector<8x1xf32>
    %67 = vector.broadcast %66 : vector<8x1xf32> to vector<8x512xf32>
    %68 = arith.addf %65, %67 : vector<8x512xf32>
    %c0_52 = arith.constant 0 : index
    %c0_53 = arith.constant 0 : index
    %69 = vector.load %arg3[%c0_52, %c0_53] : memref<8x512xf32, #tpu.memory_space<vmem>>, vector<8x512xf32>
    tpu.vector_store %arg3[%c0_52, %c0_53], %68 {strides = array<i32>} : memref<8x512xf32, #tpu.memory_space<vmem>>, vector<8x512xf32>,
    return
  }
}

</mosaic_0001>

<bundles_post_ra>
// kernel: upsampler1d_forward.1
= control target key start
LH: loop header
LB: loop body
LE: loop exit
PB: predicated region body
PF: predicated region fallthrough
CT: control target
= control target key end

     0   :  { %vm15_vm0 = vcmask 31744   ;;  %vm18_vm1 = vcmask 25600   ;;  %v3311_v0 = vmov 0.0   ;;  %vm388_vm2 = vcmask 1046528   ;;  %s3312_s27 = smov 4   ;;  %s3313_s23 = smov 8   ;;  %s6327_s0 = inlined_call_operand.vmem [shape: f32[2,16,16,4], index: 0, kind: input, shape index: {}]   ;;  %s6328_s1 = inlined_call_operand.vmem [shape: bf16[8,36], index: 1, kind: input, shape index: {}]   ;;  %s6329_s2 = inlined_call_operand.vmem [shape: f32[8,1], index: 2, kind: input, shape index: {}]   ;;  %s6330_s3 = inlined_call_operand.vmem [shape: f32[8,512], index: 3, kind: output, shape index: {}]  }
   0x1   :  { %16 = vst.msk [vmem:[#allocation2] sm:$0xff] %vm15_vm0, %v3311_v0  ;;  %17 = vst.msk [vmem:[#allocation2 + $0x8] sm:$0xff] %vm15_vm0, %v3311_v0  ;;  %v125_v1 = vld [vmem:[%s6327_s0] sm:$0xff]  ;;  %v126_v2 = vld [vmem:[%s6327_s0 + $0x8] sm:$0xff]  ;;  %vm598_vm3 = vcmask 1045504   ;;  %vm565_vm4 = vcmask 64544  }
   0x2   :  { %20 = vst.msk [vmem:[#allocation2 + $0x18] sm:$0xff] %vm15_vm0, %v3311_v0  ;;  %21 = vst.msk [vmem:[#allocation2 + $0x20] sm:$0xff] %vm15_vm0, %v3311_v0  ;;  %v127_v3 = vld [vmem:[%s6327_s0 + $0x10] sm:$0xff]  ;;  %v128_v4 = vld [vmem:[%s6327_s0 + $0x18] sm:$0xff]  ;;  %s3314_s24 = smov 12   ;;  %vm775_vm5 = vcmask 97344  }
   0x3   :  { %23 = vst.msk [vmem:[#allocation2 + $0x30] sm:$0xff] %vm15_vm0, %v3311_v0  ;;  %24 = vst.msk [vmem:[#allocation2 + $0x38] sm:$0xff] %vm15_vm0, %v3311_v0  ;;  %v129_v5 = vld [vmem:[%s6327_s0 + $0x20] sm:$0xff]  ;;  %v130_v6 = vld [vmem:[%s6327_s0 + $0x28] sm:$0xff]  ;;  %s3315_s25 = smov 16   ;;  %vm906_vm6 = vcmask 130144  }
   0x4   :  { %26 = vst.msk [vmem:[#allocation2 + $0x48] sm:$0xff] %vm15_vm0, %v3311_v0  ;;  %27 = vst.msk [vmem:[#allocation2 + $0x50] sm:$0xff] %vm15_vm0, %v3311_v0  ;;  %v131_v7 = vld [vmem:[%s6327_s0 + $0x30] sm:$0xff]  ;;  %v132_v8 = vld [vmem:[%s6327_s0 + $0x38] sm:$0xff]  ;;  %s3316_s26 = smov 20   ;;  %vm1041_vm7 = vcmask 162944  }
   0x5   :  { %29 = vst.msk [vmem:[#allocation2 + $0x60] sm:$0xff] %vm15_vm0, %v3311_v0  ;;  %30 = vst.msk [vmem:[#allocation2 + $0x68] sm:$0xff] %vm15_vm0, %v3311_v0  ;;  %v133_v9 = vld [vmem:[%s6327_s0 + $0x40] sm:$0xff]  ;;  %v134_v10 = vld [vmem:[%s6327_s0 + $0x48] sm:$0xff]  ;;  %s3317_s28 = smov 24   ;;  %vm1175_vm8 = vcmask 195744  }
   0x6   :  { %32 = vst.msk [vmem:[#allocation2 + $0x78] sm:$0xff] %vm15_vm0, %v3311_v0  ;;  %33 = vst.msk [vmem:[#allocation2 + $0x80] sm:$0xff] %vm15_vm0, %v3311_v0  ;;  %v135_v11 = vld [vmem:[%s6327_s0 + $0x50] sm:$0xff]  ;;  %v136_v12 = vld [vmem:[%s6327_s0 + $0x58] sm:$0xff]  ;;  %s3318_s10 = smov 28   ;;  %vm1306_vm9 = vcmask 228544  }
   0x7   :  { %35 = vst.msk [vmem:[#allocation2 + $0x90] sm:$0xff] %vm15_vm0, %v3311_v0  ;;  %36 = vst.msk [vmem:[#allocation2 + $0x98] sm:$0xff] %vm15_vm0, %v3311_v0  ;;  %v137_v13 = vld [vmem:[%s6327_s0 + $0x60] sm:$0xff]  ;;  %v138_v14 = vld [vmem:[%s6327_s0 + $0x68] sm:$0xff]  ;;  %s3319_s29 = smov 32   ;;  %vm1441_vm10 = vcmask 261344  }
   0x8   :  { %38 = vst.msk [vmem:[#allocation2 + $0xa8] sm:$0xff] %vm15_vm0, %v3311_v0  ;;  %39 = vst.msk [vmem:[#allocation2 + $0xb0] sm:$0xff] %vm15_vm0, %v3311_v0  ;;  %v139_v15 = vld [vmem:[%s6327_s0 + $0x70] sm:$0xff]  ;;  %v140_v16 = vld [vmem:[%s6327_s0 + $0x78] sm:$0xff]  ;;  %vm1575_vm11 = vcmask 294144   ;;  %vm3056_vm12 = vcmask 293888  }
   0x9   :  { %41 = vst.msk [vmem:[#allocation2 + $0xc0] sm:$0xff] %vm15_vm0, %v3311_v0  ;;  %42 = vst.msk [vmem:[#allocation2 + $0xc8] sm:$0xff] %vm15_vm0, %v3311_v0  ;;  %v141_v17 = vld [vmem:[%s6327_s0 + $0x80] sm:$0xff]  ;;  %v142_v18 = vld [vmem:[%s6327_s0 + $0x88] sm:$0xff] }
   0xa   :  { %44 = vst.msk [vmem:[#allocation2 + $0xd8] sm:$0xff] %vm15_vm0, %v3311_v0  ;;  %45 = vst.msk [vmem:[#allocation2 + $0xe0] sm:$0xff] %vm15_vm0, %v3311_v0  ;;  %v143_v19 = vld [vmem:[%s6327_s0 + $0x90] sm:$0xff]  ;;  %v144_v20 = vld [vmem:[%s6327_s0 + $0x98] sm:$0xff] }
   0xb   :  { %47 = vst.msk [vmem:[#allocation2 + $0xf0] sm:$0xff] %vm15_vm0, %v3311_v0  ;;  %48 = vst.msk [vmem:[#allocation2 + $0xf8] sm:$0xff] %vm15_vm0, %v3311_v0  ;;  %v145_v21 = vld [vmem:[%s6327_s0 + $0xa0] sm:$0xff]  ;;  %v3640_v23 = vld [vmem:[#allocation2 + $0x8] sm:$0xff] }
   0xc   :  { %50 = vst.msk [vmem:[#allocation2 + $0x108] sm:$0xff] %vm15_vm0, %v3311_v0  ;;  %51 = vst.msk [vmem:[#allocation2 + $0x110] sm:$0xff] %vm15_vm0, %v3311_v0  ;;  %v3638_v22 = vld [vmem:[#allocation2] sm:$0xff]  ;;  %v390_v26 = vrot.slane %v3640_v23, 1 }
   0xd   :  { %53 = vst.msk [vmem:[#allocation2 + $0x120] sm:$0xff] %vm15_vm0, %v3311_v0  ;;  %54 = vst.msk [vmem:[#allocation2 + $0x128] sm:$0xff] %vm15_vm0, %v3311_v0  ;;  %v389_v25 = vrot.slane %v3638_v22, 1 }
   0xe   :  { %56 = vst.msk [vmem:[#allocation2 + $0x138] sm:$0xff] %vm15_vm0, %v3311_v0  ;;  %57 = vst.msk [vmem:[#allocation2 + $0x140] sm:$0xff] %vm15_vm0, %v3311_v0 }
   0xf   :  { %59 = vst.msk [vmem:[#allocation2 + $0x150] sm:$0xff] %vm15_vm0, %v3311_v0  ;;  %60 = vst.msk [vmem:[#allocation2 + $0x158] sm:$0xff] %vm15_vm0, %v3311_v0  ;;  %v391_v35 = vsel %vm388_vm2, %v389_v25, %v390_v26 }
  0x10   :  { %62 = vst.msk [vmem:[#allocation2 + $0x168] sm:$0xff] %vm15_vm0, %v3311_v0  ;;  %63 = vst.msk [vmem:[#allocation2 + $0x170] sm:$0xff] %vm15_vm0, %v3311_v0  ;;  %469 = vrot.lane.b32.xlu0 %v391_v35, %s3312_s27 }
  0x11   :  { %65 = vst.msk [vmem:[#allocation2 + $0x180] sm:$0xff] %vm15_vm0, %v3311_v0  ;;  %66 = vst.msk [vmem:[#allocation2 + $0x188] sm:$0xff] %vm15_vm0, %v3311_v0 }
  0x12   :  { %68 = vst.msk [vmem:[#allocation2 + $0x198] sm:$0xff] %vm15_vm0, %v3311_v0  ;;  %69 = vst.msk [vmem:[#allocation2 + $0x1a0] sm:$0xff] %vm15_vm0, %v3311_v0 }
  0x13   :  { %71 = vst.msk [vmem:[#allocation2 + $0x1b0] sm:$0xff] %vm15_vm0, %v3311_v0  ;;  %72 = vst.msk [vmem:[#allocation2 + $0x1b8] sm:$0xff] %vm15_vm0, %v3311_v0 }
  0x14   :  { %74 = vst.msk [vmem:[#allocation2 + $0x1c8] sm:$0xff] %vm15_vm0, %v3311_v0  ;;  %75 = vst.msk [vmem:[#allocation2 + $0x1d0] sm:$0xff] %vm15_vm0, %v3311_v0 }
  0x15   :  { %77 = vst.msk [vmem:[#allocation2 + $0x1e0] sm:$0xff] %vm15_vm0, %v3311_v0  ;;  %78 = vst.msk [vmem:[#allocation2 + $0x1e8] sm:$0xff] %vm15_vm0, %v3311_v0 }
  0x16   :  { %80 = vst.msk [vmem:[#allocation2 + $0x1f8] sm:$0xff] %vm15_vm0, %v3311_v0  ;;  %81 = vst.msk [vmem:[#allocation2 + $0x200] sm:$0xff] %vm15_vm0, %v3311_v0 }
  0x17   :  { %83 = vst.msk [vmem:[#allocation2 + $0x210] sm:$0xff] %vm15_vm0, %v3311_v0  ;;  %84 = vst.msk [vmem:[#allocation2 + $0x218] sm:$0xff] %vm15_vm0, %v3311_v0 }
  0x18   :  { %86 = vst.msk [vmem:[#allocation2 + $0x228] sm:$0xff] %vm15_vm0, %v3311_v0  ;;  %87 = vst.msk [vmem:[#allocation2 + $0x230] sm:$0xff] %vm15_vm0, %v3311_v0 }
  0x19   :  { %89 = vst.msk [vmem:[#allocation2 + $0x240] sm:$0xff] %vm15_vm0, %v3311_v0  ;;  %90 = vst.msk [vmem:[#allocation2 + $0x248] sm:$0xff] %vm15_vm0, %v3311_v0 }
  0x1a   :  { %92 = vst.msk [vmem:[#allocation2 + $0x258] sm:$0xff] %vm15_vm0, %v3311_v0  ;;  %93 = vst.msk [vmem:[#allocation2 + $0x260] sm:$0xff] %vm15_vm0, %v3311_v0 }
  0x1b   :  { %95 = vst.msk [vmem:[#allocation2 + $0x270] sm:$0xff] %vm15_vm0, %v3311_v0  ;;  %96 = vst.msk [vmem:[#allocation2 + $0x278] sm:$0xff] %vm15_vm0, %v3311_v0 }
  0x1c   :  { %98 = vst.msk [vmem:[#allocation2 + $0x288] sm:$0xff] %vm15_vm0, %v3311_v0  ;;  %99 = vst.msk [vmem:[#allocation2 + $0x290] sm:$0xff] %vm15_vm0, %v3311_v0 }
  0x1d   :  { %101 = vst.msk [vmem:[#allocation2 + $0x2a0] sm:$0xff] %vm15_vm0, %v3311_v0  ;;  %102 = vst.msk [vmem:[#allocation2 + $0x2a8] sm:$0xff] %vm15_vm0, %v3311_v0 }
  0x1e   :  { %104 = vst.msk [vmem:[#allocation2 + $0x2b8] sm:$0xff] %vm15_vm0, %v3311_v0  ;;  %105 = vst.msk [vmem:[#allocation2 + $0x2c0] sm:$0xff] %vm15_vm0, %v3311_v0 }
  0x1f   :  { %107 = vst.msk [vmem:[#allocation2 + $0x2d0] sm:$0xff] %vm15_vm0, %v3311_v0  ;;  %108 = vst.msk [vmem:[#allocation2 + $0x2d8] sm:$0xff] %vm15_vm0, %v3311_v0 }
  0x20   :  { %110 = vst.msk [vmem:[#allocation2 + $0x2e8] sm:$0xff] %vm15_vm0, %v3311_v0  ;;  %111 = vst.msk [vmem:[#allocation2 + $0x2f0] sm:$0xff] %vm15_vm0, %v3311_v0 }
  0x21   :  { %113 = vst.msk [vmem:[#allocation2 + $0x300] sm:$0xff] %vm15_vm0, %v3311_v0  ;;  %114 = vst.msk [vmem:[#allocation2 + $0x308] sm:$0xff] %vm15_vm0, %v3311_v0 }
  0x22   :  { %116 = vst.msk [vmem:[#allocation2 + $0x318] sm:$0xff] %vm15_vm0, %v3311_v0  ;;  %117 = vst.msk [vmem:[#allocation2 + $0x320] sm:$0xff] %vm15_vm0, %v3311_v0 }
  0x23   :  { %119 = vst.msk [vmem:[#allocation2 + $0x330] sm:$0xff] %vm15_vm0, %v3311_v0  ;;  %120 = vst.msk [vmem:[#allocation2 + $0x338] sm:$0xff] %vm15_vm0, %v3311_v0 }
  0x24   :  { %122 = vst.msk [vmem:[#allocation2 + $0x348] sm:$0xff] %vm15_vm0, %v3311_v0  ;;  %123 = vst.msk [vmem:[#allocation2 + $0x350] sm:$0xff] %vm15_vm0, %v3311_v0 }
  0x25   :  { %22 = vst.msk [vmem:[#allocation2 + $0x28] sm:$0x3] %vm18_vm1, %v3311_v0  ;;  %19 = vst.msk [vmem:[#allocation2 + $0x10] sm:$0x3] %vm18_vm1, %v3311_v0 }
  0x26   :  { %25 = vst.msk [vmem:[#allocation2 + $0x40] sm:$0x3] %vm18_vm1, %v3311_v0  ;;  %28 = vst.msk [vmem:[#allocation2 + $0x58] sm:$0x3] %vm18_vm1, %v3311_v0 }
  0x27   :  { %31 = vst.msk [vmem:[#allocation2 + $0x70] sm:$0x3] %vm18_vm1, %v3311_v0  ;;  %34 = vst.msk [vmem:[#allocation2 + $0x88] sm:$0x3] %vm18_vm1, %v3311_v0 }
  0x28   :  { %37 = vst.msk [vmem:[#allocation2 + $0xa0] sm:$0x3] %vm18_vm1, %v3311_v0  ;;  %40 = vst.msk [vmem:[#allocation2 + $0xb8] sm:$0x3] %vm18_vm1, %v3311_v0 }
  0x29   :  { %43 = vst.msk [vmem:[#allocation2 + $0xd0] sm:$0x3] %vm18_vm1, %v3311_v0  ;;  %46 = vst.msk [vmem:[#allocation2 + $0xe8] sm:$0x3] %vm18_vm1, %v3311_v0 }
  0x2a   :  { %49 = vst.msk [vmem:[#allocation2 + $0x100] sm:$0x3] %vm18_vm1, %v3311_v0  ;;  %52 = vst.msk [vmem:[#allocation2 + $0x118] sm:$0x3] %vm18_vm1, %v3311_v0 }
  0x2b   :  { %55 = vst.msk [vmem:[#allocation2 + $0x130] sm:$0x3] %vm18_vm1, %v3311_v0  ;;  %58 = vst.msk [vmem:[#allocation2 + $0x148] sm:$0x3] %vm18_vm1, %v3311_v0 }
  0x2c   :  { %61 = vst.msk [vmem:[#allocation2 + $0x160] sm:$0x3] %vm18_vm1, %v3311_v0  ;;  %64 = vst.msk [vmem:[#allocation2 + $0x178] sm:$0x3] %vm18_vm1, %v3311_v0  ;;  %v3642_v24 = vld [vmem:[#allocation2 + $0x10] sm:$0x3] }
  0x2d   :  { %67 = vst.msk [vmem:[#allocation2 + $0x190] sm:$0x3] %vm18_vm1, %v3311_v0  ;;  %70 = vst.msk [vmem:[#allocation2 + $0x1a8] sm:$0x3] %vm18_vm1, %v3311_v0  ;;  %v392_v29 = vrot.slane %v3642_v24, 1 }
  0x2e   :  { %73 = vst.msk [vmem:[#allocation2 + $0x1c0] sm:$0x3] %vm18_vm1, %v3311_v0  ;;  %76 = vst.msk [vmem:[#allocation2 + $0x1d8] sm:$0x3] %vm18_vm1, %v3311_v0 }
  0x2f   :  { %79 = vst.msk [vmem:[#allocation2 + $0x1f0] sm:$0x3] %vm18_vm1, %v3311_v0  ;;  %82 = vst.msk [vmem:[#allocation2 + $0x208] sm:$0x3] %vm18_vm1, %v3311_v0  ;;  %v393_v42 = vsel %vm388_vm2, %v390_v26, %v392_v29 }
  0x30   :  { %85 = vst.msk [vmem:[#allocation2 + $0x220] sm:$0x3] %vm18_vm1, %v3311_v0  ;;  %88 = vst.msk [vmem:[#allocation2 + $0x238] sm:$0x3] %vm18_vm1, %v3311_v0  ;;  %471 = vrot.lane.b32.xlu0 %v393_v42, %s3312_s27 }
  0x31   :  { %91 = vst.msk [vmem:[#allocation2 + $0x250] sm:$0x3] %vm18_vm1, %v3311_v0  ;;  %94 = vst.msk [vmem:[#allocation2 + $0x268] sm:$0x3] %vm18_vm1, %v3311_v0 }
  0x32   :  { %97 = vst.msk [vmem:[#allocation2 + $0x280] sm:$0x3] %vm18_vm1, %v3311_v0  ;;  %100 = vst.msk [vmem:[#allocation2 + $0x298] sm:$0x3] %vm18_vm1, %v3311_v0 }
  0x33   :  { %103 = vst.msk [vmem:[#allocation2 + $0x2b0] sm:$0x3] %vm18_vm1, %v3311_v0  ;;  %106 = vst.msk [vmem:[#allocation2 + $0x2c8] sm:$0x3] %vm18_vm1, %v3311_v0 }
  0x34   :  { %109 = vst.msk [vmem:[#allocation2 + $0x2e0] sm:$0x3] %vm18_vm1, %v3311_v0  ;;  %112 = vst.msk [vmem:[#allocation2 + $0x2f8] sm:$0x3] %vm18_vm1, %v3311_v0 }
  0x35   :  { %115 = vst.msk [vmem:[#allocation2 + $0x310] sm:$0x3] %vm18_vm1, %v3311_v0  ;;  %118 = vst.msk [vmem:[#allocation2 + $0x328] sm:$0x3] %vm18_vm1, %v3311_v0 }
  0x36   :  { %121 = vst.msk [vmem:[#allocation2 + $0x340] sm:$0x3] %vm18_vm1, %v3311_v0  ;;  %124 = vst.msk [vmem:[#allocation2 + $0x358] sm:$0x3] %vm18_vm1, %v3311_v0 }
  0x37   :  { %190 = vst.msk [vmem:[#allocation2 + $0x19] sm:$0xff] %vm15_vm0, %v125_v1  ;;  %191 = vst.msk [vmem:[#allocation2 + $0x21] sm:$0xff] %vm15_vm0, %v126_v2 }
  0x38   :  { %192 = vst.msk [vmem:[#allocation2 + $0x31] sm:$0xff] %vm15_vm0, %v127_v3  ;;  %193 = vst.msk [vmem:[#allocation2 + $0x39] sm:$0xff] %vm15_vm0, %v128_v4  ;;  %v146_v3 = vld [vmem:[%s6327_s0 + $0xa8] sm:$0xff] }
  0x39   :  { %194 = vst.msk [vmem:[#allocation2 + $0x49] sm:$0xff] %vm15_vm0, %v129_v5  ;;  %195 = vst.msk [vmem:[#allocation2 + $0x51] sm:$0xff] %vm15_vm0, %v130_v6 }
  0x3a   :  { %196 = vst.msk [vmem:[#allocation2 + $0x61] sm:$0xff] %vm15_vm0, %v131_v7  ;;  %197 = vst.msk [vmem:[#allocation2 + $0x69] sm:$0xff] %vm15_vm0, %v132_v8  ;;  %v147_v8 = vld [vmem:[%s6327_s0 + $0xb0] sm:$0xff] }
  0x3b   :  { %198 = vst.msk [vmem:[#allocation2 + $0x79] sm:$0xff] %vm15_vm0, %v133_v9  ;;  %199 = vst.msk [vmem:[#allocation2 + $0x81] sm:$0xff] %vm15_vm0, %v134_v10  ;;  %v148_v9 = vld [vmem:[%s6327_s0 + $0xb8] sm:$0xff]  ;;  %v149_v10 = vld [vmem:[%s6327_s0 + $0xc0] sm:$0xff] }
  0x3c   :  { %200 = vst.msk [vmem:[#allocation2 + $0x91] sm:$0xff] %vm15_vm0, %v135_v11  ;;  %201 = vst.msk [vmem:[#allocation2 + $0x99] sm:$0xff] %vm15_vm0, %v136_v12 }
  0x3d   :  { %202 = vst.msk [vmem:[#allocation2 + $0xa9] sm:$0xff] %vm15_vm0, %v137_v13  ;;  %203 = vst.msk [vmem:[#allocation2 + $0xb1] sm:$0xff] %vm15_vm0, %v138_v14  ;;  %v150_v13 = vld [vmem:[%s6327_s0 + $0xc8] sm:$0xff]  ;;  %v151_v14 = vld [vmem:[%s6327_s0 + $0xd0] sm:$0xff] }
  0x3e   :  { %204 = vst.msk [vmem:[#allocation2 + $0xc1] sm:$0xff] %vm15_vm0, %v139_v15  ;;  %205 = vst.msk [vmem:[#allocation2 + $0xc9] sm:$0xff] %vm15_vm0, %v140_v16  ;;  %v3653_v27 = vld [vmem:[#allocation2 + $0x18] sm:$0xff]  ;;  %v3655_v28 = vld [vmem:[#allocation2 + $0x20] sm:$0xff] }
  0x3f   :  { %206 = vst.msk [vmem:[#allocation2 + $0xd9] sm:$0xff] %vm15_vm0, %v141_v17  ;;  %207 = vst.msk [vmem:[#allocation2 + $0xe1] sm:$0xff] %vm15_vm0, %v142_v18  ;;  %v3658_v30 = vld [vmem:[#allocation2 + $0x30] sm:$0xff]  ;;  %v394_v31 = vrot.slane %v3653_v27, 1  ;;  %v395_v32 = vrot.slane %v3655_v28, 1  ;;  %v3668_v34 = vld [vmem:[#allocation2 + $0x38] sm:$0xff] }
  0x40   :  { %208 = vst.msk [vmem:[#allocation2 + $0xf1] sm:$0xff] %vm15_vm0, %v143_v19  ;;  %209 = vst.msk [vmem:[#allocation2 + $0xf9] sm:$0xff] %vm15_vm0, %v144_v20  ;;  %v3666_v33 = vld [vmem:[#allocation2 + $0x28] sm:$0x3]  ;;  %v3676_v37 = vld [vmem:[#allocation2 + $0x40] sm:$0x3] }
  0x41   :  { %210 = vst.msk [vmem:[#allocation2 + $0x109] sm:$0xff] %vm15_vm0, %v145_v21  ;;  %308 = vst.msk [vmem:[#allocation3] sm:$0xff] %vm15_vm0, %v3638_v22  ;;  %v397_v36 = vrot.slane %v3666_v33, 1  ;;  %v3678_v38 = vld [vmem:[#allocation2 + $0x48] sm:$0xff]  ;;  %v3680_v39 = vld [vmem:[#allocation2 + $0x50] sm:$0xff]  ;;  %v3684_v40 = vsel %vm388_vm2, %v394_v31, %v395_v32  ;;  %v399_v43 = vrot.slane %v3658_v30, 1 }
  0x42   :  { %309 = vst.msk [vmem:[#allocation3 + $0x8] sm:$0xff] %vm15_vm0, %v3640_v23  ;;  %310 = vst.msk [vmem:[#allocation3 + $0x10] sm:$0xff] %vm15_vm0, %v3653_v27  ;;  %v3690_v41 = vld [vmem:[#allocation2 + $0x60] sm:$0xff]  ;;  %473 = vrot.lane.b32.xlu1 %v3684_v40, %s3312_s27  ;;  %v400_v44 = vrot.slane %v3668_v34, 1  ;;  %v3697_v45 = vld [vmem:[#allocation2 + $0x68] sm:$0xff]  ;;  %v402_v48 = vrot.slane %v3676_v37, 1 }
  0x43   :  { %311 = vst.msk [vmem:[#allocation3 + $0x18] sm:$0xff] %vm15_vm0, %v3655_v28  ;;  %312 = vst.msk [vmem:[#allocation3 + $0x20] sm:$0xff] %vm15_vm0, %v3658_v30  ;;  %v3701_v46 = vld [vmem:[#allocation2 + $0x78] sm:$0xff]  ;;  %v3704_v47 = vsel %vm388_vm2, %v395_v32, %v397_v36  ;;  %v3709_v49 = vld [vmem:[#allocation2 + $0x80] sm:$0xff]  ;;  %v404_v56 = vrot.slane %v3678_v38, 1  ;;  %v405_v57 = vrot.slane %v3680_v39, 1 }
  0x44   :  { %313 = vst.msk [vmem:[#allocation3 + $0x28] sm:$0xff] %vm15_vm0, %v3668_v34  ;;  %314 = vst.msk [vmem:[#allocation3 + $0x30] sm:$0xff] %vm15_vm0, %v3678_v38  ;;  %v3713_v50 = vld [vmem:[#allocation2 + $0x90] sm:$0xff]  ;;  %v3715_v51 = vld [vmem:[#allocation2 + $0x58] sm:$0x3]  ;;  %v3733_v55 = vsel %vm388_vm2, %v399_v43, %v400_v44  ;;  %v3746_v60 = vsel %vm388_vm2, %v400_v44, %v402_v48  ;;  %v409_v6 = vrot.slane %v3690_v41, 1 }
  0x45   :  { %315 = vst.msk [vmem:[#allocation3 + $0x38] sm:$0xff] %vm15_vm0, %v3680_v39  ;;  %316 = vst.msk [vmem:[#allocation3 + $0x40] sm:$0xff] %vm15_vm0, %v3690_v41  ;;  %v3719_v52 = vld [vmem:[#allocation2 + $0x98] sm:$0xff]  ;;  %v3726_v53 = vld [vmem:[#allocation2 + $0xa8] sm:$0xff]  ;;  %v407_v61 = vrot.slane %v3715_v51, 1  ;;  %477 = vrot.lane.b32.xlu0 %v3733_v55, %s3312_s27  ;;  %v3781_v5 = vsel %vm388_vm2, %v404_v56, %v405_v57  ;;  %v410_v7 = vrot.slane %v3697_v45, 1 }
  0x46   :  { %317 = vst.msk [vmem:[#allocation3 + $0x48] sm:$0xff] %vm15_vm0, %v3697_v45  ;;  %318 = vst.msk [vmem:[#allocation3 + $0x50] sm:$0xff] %vm15_vm0, %v3701_v46  ;;  %v3728_v54 = vld [vmem:[#allocation2 + $0xb0] sm:$0xff]  ;;  %475 = vrot.lane.b32.xlu1 %v3704_v47, %s3312_s27  ;;  %v3741_v58 = vld [vmem:[#allocation2 + $0xc0] sm:$0xff]  ;;  %v599_v19 = vrot.slane %v3638_v22, 2  ;;  %v6331_v20 = vrot.slane %v3640_v23, 2 }
  0x47   :  { %319 = vst.msk [vmem:[#allocation3 + $0x58] sm:$0xff] %vm15_vm0, %v3709_v49  ;;  %320 = vst.msk [vmem:[#allocation3 + $0x60] sm:$0xff] %vm15_vm0, %v3713_v50  ;;  %v3743_v59 = vld [vmem:[#allocation2 + $0xc8] sm:$0xff]  ;;  %v3753_v62 = vld [vmem:[#allocation2 + $0xd8] sm:$0xff]  ;;  %v3798_v11 = vsel %vm388_vm2, %v405_v57, %v407_v61  ;;  %v3833_v21 = vsel %vm388_vm2, %v409_v6, %v410_v7  ;;  %v414_v25 = vrot.slane %v3701_v46, 1  ;;  %v415_v26 = vrot.slane %v3709_v49, 1 }
  0x48   :  { %321 = vst.msk [vmem:[#allocation3 + $0x68] sm:$0xff] %vm15_vm0, %v3719_v52  ;;  %322 = vst.msk [vmem:[#allocation3 + $0x70] sm:$0xff] %vm15_vm0, %v3726_v53  ;;  %v3755_v63 = vld [vmem:[#allocation2 + $0xe0] sm:$0xff]  ;;  %v3757_v0 = vld [vmem:[#allocation2 + $0xf0] sm:$0xff]  ;;  %v3840_v22 = vsel %vm598_vm3, %v599_v19, %v6331_v20  ;;  %v419_v42 = vrot.slane %v3713_v50, 1  ;;  %v420_v43 = vrot.slane %v3719_v52, 1 }
  0x49   :  { %323 = vst.msk [vmem:[#allocation3 + $0x78] sm:$0xff] %vm15_vm0, %v3728_v54  ;;  %324 = vst.msk [vmem:[#allocation3 + $0x80] sm:$0xff] %vm15_vm0, %v3741_v58  ;;  %v3759_v1 = vld [vmem:[#allocation2 + $0x70] sm:$0x3]  ;;  %v3765_v2 = vld [vmem:[#allocation2 + $0xf8] sm:$0xff]  ;;  %481 = vrot.lane.b32.xlu0 %v3781_v5, %s3312_s27  ;;  %v3855_v36 = vsel %vm388_vm2, %v414_v25, %v415_v26  ;;  %v429_v25 = vrot.slane %v3741_v58, 1 }
  0x4a   :  { %325 = vst.msk [vmem:[#allocation3 + $0x88] sm:$0xff] %vm15_vm0, %v3743_v59  ;;  %326 = vst.msk [vmem:[#allocation3 + $0x90] sm:$0xff] %vm15_vm0, %v3753_v62  ;;  %v3776_v4 = vld [vmem:[#allocation2 + $0x108] sm:$0xff]  ;;  %479 = vrot.lane.b32.xlu1 %v3746_v60, %s3312_s27  ;;  %v412_v12 = vrot.slane %v3759_v1, 1  ;;  %v152_v15 = vld [vmem:[%s6327_s0 + $0xd8] sm:$0xff]  ;;  %v435_v20 = vrot.slane %v3755_v63, 1 }
  0x4b   :  { %327 = vst.msk [vmem:[#allocation3 + $0x98] sm:$0xff] %vm15_vm0, %v3755_v63  ;;  %328 = vst.msk [vmem:[#allocation3 + $0xa0] sm:$0xff] %vm15_vm0, %v3757_v0  ;;  %v3813_v16 = vld [vmem:[#allocation2 + $0x88] sm:$0x3]  ;;  %v153_v17 = vld [vmem:[%s6327_s0 + $0xe0] sm:$0xff] }
  0x4c   :  { %329 = vst.msk [vmem:[#allocation3 + $0xa8] sm:$0xff] %vm15_vm0, %v3765_v2  ;;  %211 = vst.msk [vmem:[#allocation2 + $0x111] sm:$0xff] %vm15_vm0, %v146_v3  ;;  %v154_v18 = vld [vmem:[%s6327_s0 + $0xe8] sm:$0xff]  ;;  %v3843_v29 = vsel %vm388_vm2, %v410_v7, %v412_v12  ;;  %v417_v31 = vrot.slane %v3813_v16, 1  ;;  %v3846_v32 = vld [vmem:[#allocation2 + $0xa0] sm:$0x3]  ;;  %v3902_v12 = vsel %vm388_vm2, %v419_v42, %v420_v43 }
  0x4d   :  { %330 = vst.msk [vmem:[#allocation3 + $0xb0] sm:$0xff] %vm15_vm0, %v3776_v4  ;;  %6486 = vst [vmem:[#allocation4_spill] sm:$0xff] %v3798_v11  ;;  %485 = vrot.lane.b32.xlu0 %v3833_v21, %s3312_s27  ;;  %v422_v57 = vrot.slane %v3846_v32, 1  ;;  %v3879_v7 = vld [vmem:[#allocation2 + $0xb8] sm:$0x3] }
  0x4e   :  { %212 = vst.msk [vmem:[#allocation2 + $0x121] sm:$0xff] %vm15_vm0, %v147_v8  ;;  %213 = vst.msk [vmem:[#allocation2 + $0x129] sm:$0xff] %vm15_vm0, %v148_v9  ;;  %483 = vrot.lane.b32.xlu1 %v3798_v11, %s3312_s27  ;;  %v3866_v56 = vsel %vm388_vm2, %v415_v26, %v417_v31  ;;  %v430_v26 = vrot.slane %v3743_v59, 1  ;;  %v602_v11 = vrot.slane %v3642_v24, 2 }
  0x4f   :  { %214 = vst.msk [vmem:[#allocation2 + $0x139] sm:$0xff] %vm15_vm0, %v149_v10  ;;  %215 = vst.msk [vmem:[#allocation2 + $0x141] sm:$0xff] %vm15_vm0, %v150_v13  ;;  %v424_v13 = vrot.slane %v3726_v53, 1 }
  0x50   :  { %216 = vst.msk [vmem:[#allocation2 + $0x151] sm:$0xff] %vm15_vm0, %v151_v14  ;;  %217 = vst.msk [vmem:[#allocation2 + $0x159] sm:$0xff] %vm15_vm0, %v152_v15  ;;  %v425_v14 = vrot.slane %v3728_v54, 1  ;;  %v3909_v15 = vsel %vm388_vm2, %v420_v43, %v422_v57  ;;  %v3927_v43 = vld [vmem:[#allocation2 + $0xe8] sm:$0x3]  ;;  %v3934_v57 = vsel %vm388_vm2, %v429_v25, %v430_v26 }
  0x51   :  { %218 = vst.msk [vmem:[#allocation2 + $0x169] sm:$0xff] %vm15_vm0, %v153_v17  ;;  %219 = vst.msk [vmem:[#allocation2 + $0x171] sm:$0xff] %vm15_vm0, %v154_v18  ;;  %489 = vrot.lane.b32.xlu0 %v3855_v36, %s3312_s27  ;;  %v427_v17 = vrot.slane %v3879_v7, 1  ;;  %v3912_v18 = vld [vmem:[#allocation2 + $0xd0] sm:$0x3] }
  0x52   :  { %6487 = vst [vmem:[#allocation5_spill] sm:$0xff] %v3833_v21  ;;  %6488 = vst [vmem:[#allocation6_spill] sm:$0xff] %v3843_v29  ;;  %487 = vrot.lane.b32.xlu1 %v3843_v29, %s3312_s27  ;;  %v3919_v19 = vsel %vm388_vm2, %v424_v13, %v425_v14  ;;  %v432_v42 = vrot.slane %v3912_v18, 1  ;;  %v434_v13 = vrot.slane %v3753_v62, 1 }
  0x53   :  { %v3850_v35 = vld [vmem:[#allocation2 + $0x110] sm:$0xff]  ;;  %6489 = vst [vmem:[#allocation7_spill] sm:$0xff] %v3855_v36  ;;  %6490 = vst [vmem:[#allocation8_spill] sm:$0xff] %v3866_v56  ;;  %v3924_v31 = vsel %vm388_vm2, %v425_v14, %v427_v17  ;;  %v437_v17 = vrot.slane %v3927_v43, 1 }
  0x54   :  { %331 = vst.msk [vmem:[#allocation3 + $0xb8] sm:$0xff] %vm15_vm0, %v3850_v35  ;;  %6491 = vst [vmem:[#allocation9_spill] sm:$0xff] %v3902_v12  ;;  %v3939_v14 = vsel %vm388_vm2, %v430_v26, %v432_v42  ;;  %v3949_v25 = vsel %vm388_vm2, %v434_v13, %v435_v20 }
  0x55   :  { %v3861_v44 = vld [vmem:[#allocation2 + $0x120] sm:$0xff]  ;;  %v3863_v48 = vld [vmem:[#allocation2 + $0x128] sm:$0xff]  ;;  %6492 = vst [vmem:[#allocation10_spill] sm:$0xff] %v3909_v15  ;;  %493 = vrot.lane.b32.xlu0 %v3902_v12, %s3312_s27  ;;  %6493 = vst [vmem:[#allocation11_spill] sm:$0xff] %v3919_v19  ;;  %v3954_v26 = vsel %vm388_vm2, %v435_v20, %v437_v17 }
  0x56   :  { %332 = vst.msk [vmem:[#allocation3 + $0xc0] sm:$0xff] %vm15_vm0, %v3861_v44  ;;  %333 = vst.msk [vmem:[#allocation3 + $0xc8] sm:$0xff] %vm15_vm0, %v3863_v48  ;;  %v3873_v61 = vld [vmem:[#allocation2 + $0x138] sm:$0xff]  ;;  %v3875_v3 = vld [vmem:[#allocation2 + $0x140] sm:$0xff]  ;;  %491 = vrot.lane.b32.xlu1 %v3866_v56, %s3312_s27 }
  0x57   :  { %v3877_v6 = vld [vmem:[#allocation2 + $0x150] sm:$0xff]  ;;  %334 = vst.msk [vmem:[#allocation3 + $0xd0] sm:$0xff] %vm15_vm0, %v3873_v61  ;;  %335 = vst.msk [vmem:[#allocation3 + $0xd8] sm:$0xff] %vm15_vm0, %v3875_v3  ;;  %v3885_v8 = vld [vmem:[#allocation2 + $0x158] sm:$0xff] }
  0x58   :  { %336 = vst.msk [vmem:[#allocation3 + $0xe0] sm:$0xff] %vm15_vm0, %v3877_v6  ;;  %v3889_v9 = vld [vmem:[#allocation2 + $0x168] sm:$0xff]  ;;  %337 = vst.msk [vmem:[#allocation3 + $0xe8] sm:$0xff] %vm15_vm0, %v3885_v8  ;;  %v3895_v10 = vld [vmem:[#allocation2 + $0x170] sm:$0xff] }
  0x59   :  { %338 = vst.msk [vmem:[#allocation3 + $0xf0] sm:$0xff] %vm15_vm0, %v3889_v9  ;;  %339 = vst.msk [vmem:[#allocation3 + $0xf8] sm:$0xff] %vm15_vm0, %v3895_v10  ;;  %497 = vrot.lane.b32.xlu0 %v3919_v19, %s3312_s27  ;;  %v440_v19 = vrot.slane %v3765_v2, 1  ;;  %v3957_v12 = vld [vmem:[#allocation2 + $0x118] sm:$0x3] }
  0x5a   :  { %495 = vrot.lane.b32.xlu1 %v3909_v15, %s3312_s27  ;;  %6494 = vst [vmem:[#allocation12_spill] sm:$0xff] %v3924_v31  ;;  %6495 = vst [vmem:[#allocation13_spill] sm:$0xff] %v3934_v57  ;;  %v3942_v15 = vld [vmem:[#allocation2 + $0x100] sm:$0x3]  ;;  %v447_v17 = vrot.slane %v3957_v12, 1 }
  0x5b   :  { %6496 = vst [vmem:[#allocation14_spill] sm:$0xff] %v3939_v14  ;;  %6497 = vst [vmem:[#allocation15_spill] sm:$0xff] %v3949_v25  ;;  %v442_v42 = vrot.slane %v3942_v15, 1  ;;  %v3972_v56 = vld [vmem:[#allocation2 + $0x130] sm:$0x3] }
  0x5c   :  { %6498 = vst [vmem:[#allocation16_spill] sm:$0xff] %v3954_v26  ;;  %v3987_v36 = vld [vmem:[#allocation2 + $0x148] sm:$0x3]  ;;  %v4002_v29 = vld [vmem:[#allocation2 + $0x160] sm:$0x3] }
  0x5d   :  { %501 = vrot.lane.b32.xlu0 %v3934_v57, %s3312_s27  ;;  %v445_v57 = vrot.slane %v3850_v35, 1  ;;  %v3969_v20 = vsel %vm388_vm2, %v440_v19, %v442_v42  ;;  %v452_v42 = vrot.slane %v3972_v56, 1  ;;  %v4017_v21 = vld [vmem:[#allocation2 + $0x178] sm:$0x3] }
  0x5e   :  { %499 = vrot.lane.b32.xlu1 %v3924_v31, %s3312_s27  ;;  %v439_v31 = vrot.slane %v3757_v0, 1  ;;  %6500 = vst [vmem:[#allocation18_spill] sm:$0xff] %v3969_v20 }
  0x60   :  { %v3964_v13 = vsel %vm388_vm2, %v439_v31, %v440_v19  ;;  %v3984_v19 = vsel %vm388_vm2, %v445_v57, %v447_v17  ;;  %v457_v17 = vrot.slane %v3987_v36, 1 }
  0x61   :  { %505 = vrot.lane.b32.xlu0 %v3949_v25, %s3312_s27  ;;  %6499 = vst [vmem:[#allocation17_spill] sm:$0xff] %v3964_v13  ;;  %v450_v25 = vrot.slane %v3863_v48, 1  ;;  %6502 = vst [vmem:[#allocation20_spill] sm:$0xff] %v3984_v19 }
  0x62   :  { %503 = vrot.lane.b32.xlu1 %v3939_v14, %s3312_s27  ;;  %v444_v14 = vrot.slane %v3776_v4, 1 }
  0x64   :  { %v3979_v31 = vsel %vm388_vm2, %v444_v14, %v445_v57  ;;  %v3999_v57 = vsel %vm388_vm2, %v450_v25, %v452_v42  ;;  %v462_v42 = vrot.slane %v4002_v29, 1 }
  0x65   :  { %509 = vrot.lane.b32.xlu0 %v3964_v13, %s3312_s27  ;;  %6501 = vst [vmem:[#allocation19_spill] sm:$0xff] %v3979_v31  ;;  %v455_v13 = vrot.slane %v3875_v3, 1  ;;  %6504 = vst [vmem:[#allocation22_spill] sm:$0xff] %v3999_v57 }
  0x66   :  { %507 = vrot.lane.b32.xlu1 %v3954_v26, %s3312_s27  ;;  %v449_v26 = vrot.slane %v3861_v44, 1 }
  0x68   :  { %v3994_v14 = vsel %vm388_vm2, %v449_v26, %v450_v25  ;;  %v4014_v25 = vsel %vm388_vm2, %v455_v13, %v457_v17  ;;  %v464_v17 = vrot.slane %v3889_v9, 1 }
  0x69   :  { %513 = vrot.lane.b32.xlu0 %v3979_v31, %s3312_s27  ;;  %6503 = vst [vmem:[#allocation21_spill] sm:$0xff] %v3994_v14  ;;  %v460_v31 = vrot.slane %v3885_v8, 1  ;;  %6506 = vst [vmem:[#allocation24_spill] sm:$0xff] %v4014_v25 }
  0x6a   :  { %511 = vrot.lane.b32.xlu1 %v3969_v20, %s3312_s27  ;;  %v454_v20 = vrot.slane %v3873_v61, 1 }
  0x6c   :  { %v4009_v26 = vsel %vm388_vm2, %v454_v20, %v455_v13  ;;  %v156_v20 = vld [vmem:[%s6327_s0 + $0xf8] sm:$0xff] }
  0x6d   :  { %517 = vrot.lane.b32.xlu0 %v3994_v14, %s3312_s27  ;;  %6505 = vst [vmem:[#allocation23_spill] sm:$0xff] %v4009_v26  ;;  %v155_v14 = vld [vmem:[%s6327_s0 + $0xf0] sm:$0xff]  ;;  %221 = vst.msk [vmem:[#allocation2 + $0x189] sm:$0xff] %vm15_vm0, %v156_v20  ;;  %v6510_v20 = vrot.slane %v3640_v23, 2  ;;  %v612_v23 = vrot.slane %v3676_v37, 2 }
  0x6e   :  { %515 = vrot.lane.b32.xlu1 %v3984_v19, %s3312_s27  ;;  %v459_v19 = vrot.slane %v3877_v6, 1  ;;  %220 = vst.msk [vmem:[#allocation2 + $0x181] sm:$0xff] %vm15_vm0, %v155_v14  ;;  %v467_v14 = vrot.slane %v4017_v21, 1 }
  0x70   :  { %v4031_v13 = vsel %vm388_vm2, %v459_v19, %v460_v31 }
  0x71   :  { %521 = vrot.lane.b32.xlu0 %v4009_v26, %s3312_s27  ;;  %6507 = vst [vmem:[#allocation25_spill] sm:$0xff] %v4031_v13  ;;  %v4037_v26 = vsel %vm388_vm2, %v460_v31, %v462_v42  ;;  %v604_v31 = vrot.slane %v3653_v27, 2  ;;  %v605_v42 = vrot.slane %v3655_v28, 2 }
  0x72   :  { %519 = vrot.lane.b32.xlu1 %v3999_v57, %s3312_s27  ;;  %v465_v57 = vrot.slane %v3895_v10, 1  ;;  %6508 = vst [vmem:[#allocation26_spill] sm:$0xff] %v4037_v26 }
  0x73   :  { %v4065_v24 = vsel %vm598_vm3, %v604_v31, %v605_v42 }
  0x74   :  { %v4045_v19 = vsel %vm388_vm2, %v464_v17, %v465_v57  ;;  %v603_v17 = vsel %vm598_vm3, %v6510_v20, %v602_v11  ;;  %v614_v11 = vrot.slane %v3678_v38, 2  ;;  %v620_v20 = vrot.slane %v3697_v45, 2 }
  0x75   :  { %525 = vrot.lane.b32.xlu0 %v4031_v13, %s3312_s27 }
  0x76   :  { %523 = vrot.lane.b32.xlu1 %v4014_v25, %s3312_s27  ;;  %v4048_v25 = vsel %vm388_vm2, %v465_v57, %v467_v14  ;;  %v609_v57 = vrot.slane %v3658_v30, 2  ;;  %v610_v14 = vrot.slane %v3668_v34, 2 }
  0x77   :  { %6509 = vst [vmem:[#allocation27_spill] sm:$0xff] %v4048_v25 }
  0x78   :  { %v4083_v31 = vsel %vm598_vm3, %v610_v14, %v612_v23  ;;  %v625_v23 = vrot.slane %v3709_v49, 2 }
  0x79   :  { %529 = vrot.lane.b32.xlu0 %v4045_v19, %s3312_s27 }
  0x7a   :  { %527 = vrot.lane.b32.xlu1 %v4037_v26, %s3312_s27  ;;  %v607_v26 = vrot.slane %v3666_v33, 2  ;;  %v4078_v33 = vsel %vm598_vm3, %v609_v57, %v610_v14  ;;  %v622_v57 = vrot.slane %v3759_v1, 2  ;;  %v624_v14 = vrot.slane %v3701_v46, 2 }
  0x7c   :  { %v4117_v1 = vsel %vm598_vm3, %v624_v14, %v625_v23  ;;  %v635_v14 = vrot.slane %v3728_v54, 2 }
  0x7d   :  { %679 = vrot.lane.b32.xlu0 %v3840_v22, %s3313_s23  ;;  %v615_v22 = vrot.slane %v3680_v39, 2 }
  0x7e   :  { %531 = vrot.lane.b32.xlu1 %v4048_v25, %s3312_s27  ;;  %v4070_v25 = vsel %vm598_vm3, %v605_v42, %v607_v26  ;;  %v617_v26 = vrot.slane %v3715_v51, 2  ;;  %v619_v42 = vrot.slane %v3690_v41, 2 }
  0x7f   :  { %v4091_v37 = vsel %vm598_vm3, %v614_v11, %v615_v22  ;;  %v4109_v11 = vsel %vm598_vm3, %v620_v20, %v622_v57  ;;  %v634_v57 = vrot.slane %v3726_v53, 2 }
  0x80   :  { %v4104_v51 = vsel %vm598_vm3, %v619_v42, %v620_v20  ;;  %6512 = vst [vmem:[#allocation29_spill] sm:$0xff] %v4109_v11  ;;  %v630_v42 = vrot.slane %v3719_v52, 2  ;;  %v632_v20 = vrot.slane %v3846_v32, 2 }
  0x81   :  { %683 = vrot.lane.b32.xlu0 %v4065_v24, %s3313_s23  ;;  %v4143_v32 = vsel %vm598_vm3, %v634_v57, %v635_v14  ;;  %v645_v57 = vrot.slane %v3755_v63, 2 }
  0x82   :  { %681 = vrot.lane.b32.xlu1 %v603_v17, %s3313_s23  ;;  %v4096_v17 = vsel %vm598_vm3, %v615_v22, %v617_v26  ;;  %v627_v22 = vrot.slane %v3813_v16, 2  ;;  %v629_v26 = vrot.slane %v3713_v50, 2 }
  0x83   :  { %6511 = vst [vmem:[#allocation28_spill] sm:$0xff] %v4096_v17 }
  0x84   :  { %v4130_v16 = vsel %vm598_vm3, %v629_v26, %v630_v42  ;;  %v640_v26 = vrot.slane %v3743_v59, 2 }
  0x85   :  { %687 = vrot.lane.b32.xlu0 %v4078_v33, %s3313_s23 }
  0x86   :  { %685 = vrot.lane.b32.xlu1 %v4070_v25, %s3313_s23 }
  0x89   :  { %691 = vrot.lane.b32.xlu0 %v4091_v37, %s3313_s23 }
  0x8a   :  { %689 = vrot.lane.b32.xlu1 %v4083_v31, %s3313_s23 }
  0x8d   :  { %695 = vrot.lane.b32.xlu0 %v4104_v51, %s3313_s23 }
  0x8e   :  { %693 = vrot.lane.b32.xlu1 %v4096_v17, %s3313_s23  ;;  %v4122_v17 = vsel %vm598_vm3, %v625_v23, %v627_v22  ;;  %v637_v23 = vrot.slane %v3879_v7, 2  ;;  %v639_v22 = vrot.slane %v3741_v58, 2 }
  0x8f   :  { %6513 = vst [vmem:[#allocation30_spill] sm:$0xff] %v4122_v17 }
  0x90   :  { %v4156_v7 = vsel %vm598_vm3, %v639_v22, %v640_v26  ;;  %v650_v22 = vrot.slane %v3765_v2, 2 }
  0x91   :  { %699 = vrot.lane.b32.xlu0 %v4117_v1, %s3313_s23 }
  0x92   :  { %697 = vrot.lane.b32.xlu1 %v4109_v11, %s3313_s23  ;;  %v4135_v11 = vsel %vm598_vm3, %v630_v42, %v632_v20  ;;  %v642_v42 = vrot.slane %v3912_v18, 2  ;;  %v644_v20 = vrot.slane %v3753_v62, 2 }
  0x93   :  { %6514 = vst [vmem:[#allocation31_spill] sm:$0xff] %v4135_v11 }
  0x94   :  { %v4169_v18 = vsel %vm598_vm3, %v644_v20, %v645_v57  ;;  %v655_v20 = vrot.slane %v3850_v35, 2 }
  0x95   :  { %703 = vrot.lane.b32.xlu0 %v4130_v16, %s3313_s23 }
  0x96   :  { %701 = vrot.lane.b32.xlu1 %v4122_v17, %s3313_s23  ;;  %v4148_v17 = vsel %vm598_vm3, %v635_v14, %v637_v23  ;;  %v647_v14 = vrot.slane %v3927_v43, 2  ;;  %v649_v23 = vrot.slane %v3757_v0, 2 }
  0x97   :  { %6515 = vst [vmem:[#allocation32_spill] sm:$0xff] %v4148_v17 }
  0x98   :  { %v4182_v43 = vsel %vm598_vm3, %v649_v23, %v650_v22  ;;  %v660_v23 = vrot.slane %v3863_v48, 2 }
  0x99   :  { %707 = vrot.lane.b32.xlu0 %v4143_v32, %s3313_s23 }
  0x9a   :  { %705 = vrot.lane.b32.xlu1 %v4135_v11, %s3313_s23  ;;  %v4161_v11 = vsel %vm598_vm3, %v640_v26, %v642_v42  ;;  %v652_v26 = vrot.slane %v3942_v15, 2  ;;  %v654_v42 = vrot.slane %v3776_v4, 2 }
  0x9b   :  { %6516 = vst [vmem:[#allocation33_spill] sm:$0xff] %v4161_v11 }
  0x9c   :  { %v4195_v15 = vsel %vm598_vm3, %v654_v42, %v655_v20  ;;  %v665_v42 = vrot.slane %v3875_v3, 2 }
  0x9d   :  { %711 = vrot.lane.b32.xlu0 %v4156_v7, %s3313_s23 }
  0x9e   :  { %709 = vrot.lane.b32.xlu1 %v4148_v17, %s3313_s23  ;;  %v4174_v17 = vsel %vm598_vm3, %v645_v57, %v647_v14  ;;  %v657_v57 = vrot.slane %v3957_v12, 2  ;;  %v659_v14 = vrot.slane %v3861_v44, 2 }
  0x9f   :  { %6517 = vst [vmem:[#allocation34_spill] sm:$0xff] %v4174_v17 }
  0xa0   :  { %v4208_v12 = vsel %vm598_vm3, %v659_v14, %v660_v23  ;;  %v670_v14 = vrot.slane %v3885_v8, 2 }
  0xa1   :  { %715 = vrot.lane.b32.xlu0 %v4169_v18, %s3313_s23  ;;  %6520 = vst [vmem:[#allocation37_spill] sm:$0xff] %v4208_v12 }
  0xa2   :  { %713 = vrot.lane.b32.xlu1 %v4161_v11, %s3313_s23  ;;  %v4187_v11 = vsel %vm598_vm3, %v650_v22, %v652_v26  ;;  %v662_v22 = vrot.slane %v3972_v56, 2  ;;  %v664_v26 = vrot.slane %v3873_v61, 2 }
  0xa3   :  { %6518 = vst [vmem:[#allocation35_spill] sm:$0xff] %v4187_v11 }
  0xa4   :  { %v4221_v56 = vsel %vm598_vm3, %v664_v26, %v665_v42 }
  0xa5   :  { %719 = vrot.lane.b32.xlu0 %v4182_v43, %s3313_s23  ;;  %6522 = vst [vmem:[#allocation39_spill] sm:$0xff] %v4221_v56 }
  0xa6   :  { %717 = vrot.lane.b32.xlu1 %v4174_v17, %s3313_s23  ;;  %v4200_v17 = vsel %vm598_vm3, %v655_v20, %v657_v57  ;;  %v667_v20 = vrot.slane %v3987_v36, 2  ;;  %v669_v57 = vrot.slane %v3877_v6, 2  ;;  %v672_v36 = vrot.slane %v4002_v29, 2 }
  0xa7   :  { %6519 = vst [vmem:[#allocation36_spill] sm:$0xff] %v4200_v17 }
  0xa8   :  { %v4236_v26 = vsel %vm598_vm3, %v669_v57, %v670_v14  ;;  %v4241_v29 = vsel %vm598_vm3, %v670_v14, %v672_v36 }
  0xa9   :  { %723 = vrot.lane.b32.xlu0 %v4195_v15, %s3313_s23  ;;  %6524 = vst [vmem:[#allocation41_spill] sm:$0xff] %v4241_v29 }
  0xaa   :  { %721 = vrot.lane.b32.xlu1 %v4187_v11, %s3313_s23  ;;  %v4213_v11 = vsel %vm598_vm3, %v660_v23, %v662_v22  ;;  %v4226_v23 = vsel %vm598_vm3, %v665_v42, %v667_v20  ;;  %v675_v42 = vrot.slane %v3895_v10, 2 }
  0xab   :  { %6521 = vst [vmem:[#allocation38_spill] sm:$0xff] %v4213_v11  ;;  %6523 = vst [vmem:[#allocation40_spill] sm:$0xff] %v4226_v23 }
  0xad   :  { %727 = vrot.lane.b32.xlu0 %v4208_v12, %s3313_s23 }
  0xae   :  { %725 = vrot.lane.b32.xlu1 %v4200_v17, %s3313_s23  ;;  %v470_v17 = vpop.permute.xlu0 %469 }
  0xaf   :  { %566 = vst.msk [vmem:[#allocation3] sm:$0xff] %vm565_vm4, %v470_v17  ;;  %v677_v17 = vrot.slane %v4017_v21, 2 }
  0xb1   :  { %731 = vrot.lane.b32.xlu0 %v4221_v56, %s3313_s23  ;;  %v4254_v14 = vsel %vm598_vm3, %v675_v42, %v677_v17 }
  0xb2   :  { %729 = vrot.lane.b32.xlu1 %v4213_v11, %s3313_s23  ;;  %v674_v11 = vrot.slane %v3889_v9, 2  ;;  %v472_v20 = vpop.permute.xlu0 %471 }
  0xb3   :  { %567 = vst.msk [vmem:[#allocation3 + $0x8] sm:$0xff] %vm565_vm4, %v472_v20 }
  0xb4   :  { %v474_v22 = vpop.permute.xlu1 %473  ;;  %v4251_v57 = vsel %vm598_vm3, %v674_v11, %v675_v42 }
  0xb5   :  { %568 = vst.msk [vmem:[#allocation3 + $0x10] sm:$0xff] %vm565_vm4, %v474_v22  ;;  %735 = vrot.lane.b32.xlu0 %v4236_v26, %s3313_s23 }
  0xb6   :  { %733 = vrot.lane.b32.xlu1 %v4226_v23, %s3313_s23 }
  0xb7   :  { %v478_v23 = vpop.permute.xlu0 %477 }
  0xb8   :  { %v476_v22 = vpop.permute.xlu1 %475  ;;  %570 = vst.msk [vmem:[#allocation3 + $0x20] sm:$0xff] %vm565_vm4, %v478_v23 }
  0xb9   :  { %569 = vst.msk [vmem:[#allocation3 + $0x18] sm:$0xff] %vm565_vm4, %v476_v22  ;;  %739 = vrot.lane.b32.xlu0 %v4251_v57, %s3313_s23 }
  0xba   :  { %737 = vrot.lane.b32.xlu1 %v4241_v29, %s3313_s23 }
  0xbb   :  { %v482_v36 = vpop.permute.xlu0 %481 }
  0xbc   :  { %v480_v21 = vpop.permute.xlu1 %479  ;;  %572 = vst.msk [vmem:[#allocation3 + $0x30] sm:$0xff] %vm565_vm4, %v482_v36 }
  0xbd   :  { %571 = vst.msk [vmem:[#allocation3 + $0x28] sm:$0xff] %vm565_vm4, %v480_v21  ;;  %810 = vrot.lane.b32.xlu0 %v3653_v27, %s3314_s24 }
  0xbe   :  { %741 = vrot.lane.b32.xlu1 %v4254_v14, %s3313_s23 }
  0xbf   :  { %v486_v23 = vpop.permute.xlu0 %485 }
  0xc0   :  { %v484_v11 = vpop.permute.xlu1 %483  ;;  %574 = vst.msk [vmem:[#allocation3 + $0x40] sm:$0xff] %vm565_vm4, %v486_v23 }
  0xc1   :  { %573 = vst.msk [vmem:[#allocation3 + $0x38] sm:$0xff] %vm565_vm4, %v484_v11  ;;  %814 = vrot.lane.b32.xlu0 %v3658_v30, %s3314_s24 }
  0xc2   :  { %812 = vrot.lane.b32.xlu1 %v3655_v28, %s3314_s24 }
  0xc3   :  { %v490_v20 = vpop.permute.xlu0 %489 }
  0xc4   :  { %v488_v42 = vpop.permute.xlu1 %487  ;;  %576 = vst.msk [vmem:[#allocation3 + $0x50] sm:$0xff] %vm565_vm4, %v490_v20 }
  0xc5   :  { %575 = vst.msk [vmem:[#allocation3 + $0x48] sm:$0xff] %vm565_vm4, %v488_v42  ;;  %818 = vrot.lane.b32.xlu0 %v3678_v38, %s3314_s24 }
  0xc6   :  { %816 = vrot.lane.b32.xlu1 %v3668_v34, %s3314_s24 }
  0xc7   :  { %v494_v27 = vpop.permute.xlu0 %493 }
  0xc8   :  { %v492_v17 = vpop.permute.xlu1 %491  ;;  %578 = vst.msk [vmem:[#allocation3 + $0x60] sm:$0xff] %vm565_vm4, %v494_v27 }
  0xc9   :  { %577 = vst.msk [vmem:[#allocation3 + $0x58] sm:$0xff] %vm565_vm4, %v492_v17  ;;  %822 = vrot.lane.b32.xlu0 %v3690_v41, %s3314_s24 }
  0xca   :  { %820 = vrot.lane.b32.xlu1 %v3680_v39, %s3314_s24 }
  0xcb   :  { %v498_v22 = vpop.permute.xlu0 %497 }
  0xcc   :  { %v496_v28 = vpop.permute.xlu1 %495  ;;  %580 = vst.msk [vmem:[#allocation3 + $0x70] sm:$0xff] %vm565_vm4, %v498_v22 }
  0xcd   :  { %579 = vst.msk [vmem:[#allocation3 + $0x68] sm:$0xff] %vm565_vm4, %v496_v28  ;;  %826 = vrot.lane.b32.xlu0 %v3701_v46, %s3314_s24 }
  0xce   :  { %824 = vrot.lane.b32.xlu1 %v3697_v45, %s3314_s24 }
  0xcf   :  { %v502_v36 = vpop.permute.xlu0 %501 }
  0xd0   :  { %v500_v21 = vpop.permute.xlu1 %499  ;;  %582 = vst.msk [vmem:[#allocation3 + $0x80] sm:$0xff] %vm565_vm4, %v502_v36 }
  0xd1   :  { %581 = vst.msk [vmem:[#allocation3 + $0x78] sm:$0xff] %vm565_vm4, %v500_v21  ;;  %830 = vrot.lane.b32.xlu0 %v3713_v50, %s3314_s24 }
  0xd2   :  { %828 = vrot.lane.b32.xlu1 %v3709_v49, %s3314_s24 }
  0xd3   :  { %v506_v23 = vpop.permute.xlu0 %505 }
  0xd4   :  { %v504_v11 = vpop.permute.xlu1 %503  ;;  %584 = vst.msk [vmem:[#allocation3 + $0x90] sm:$0xff] %vm565_vm4, %v506_v23 }
  0xd5   :  { %583 = vst.msk [vmem:[#allocation3 + $0x88] sm:$0xff] %vm565_vm4, %v504_v11  ;;  %834 = vrot.lane.b32.xlu0 %v3726_v53, %s3314_s24 }
  0xd6   :  { %832 = vrot.lane.b32.xlu1 %v3719_v52, %s3314_s24 }
  0xd7   :  { %v510_v20 = vpop.permute.xlu0 %509 }
  0xd8   :  { %v508_v42 = vpop.permute.xlu1 %507  ;;  %586 = vst.msk [vmem:[#allocation3 + $0xa0] sm:$0xff] %vm565_vm4, %v510_v20 }
  0xd9   :  { %585 = vst.msk [vmem:[#allocation3 + $0x98] sm:$0xff] %vm565_vm4, %v508_v42  ;;  %838 = vrot.lane.b32.xlu0 %v3741_v58, %s3314_s24 }
  0xda   :  { %836 = vrot.lane.b32.xlu1 %v3728_v54, %s3314_s24 }
  0xdb   :  { %v514_v27 = vpop.permute.xlu0 %513 }
  0xdc   :  { %v512_v17 = vpop.permute.xlu1 %511  ;;  %588 = vst.msk [vmem:[#allocation3 + $0xb0] sm:$0xff] %vm565_vm4, %v514_v27 }
  0xdd   :  { %587 = vst.msk [vmem:[#allocation3 + $0xa8] sm:$0xff] %vm565_vm4, %v512_v17  ;;  %842 = vrot.lane.b32.xlu0 %v3753_v62, %s3314_s24 }
  0xde   :  { %840 = vrot.lane.b32.xlu1 %v3743_v59, %s3314_s24 }
  0xdf   :  { %v518_v22 = vpop.permute.xlu0 %517 }
  0xe0   :  { %v516_v28 = vpop.permute.xlu1 %515  ;;  %590 = vst.msk [vmem:[#allocation3 + $0xc0] sm:$0xff] %vm565_vm4, %v518_v22 }
  0xe1   :  { %589 = vst.msk [vmem:[#allocation3 + $0xb8] sm:$0xff] %vm565_vm4, %v516_v28  ;;  %846 = vrot.lane.b32.xlu0 %v3757_v0, %s3314_s24 }
  0xe2   :  { %844 = vrot.lane.b32.xlu1 %v3755_v63, %s3314_s24 }
  0xe3   :  { %v522_v36 = vpop.permute.xlu0 %521 }
  0xe4   :  { %v520_v21 = vpop.permute.xlu1 %519  ;;  %592 = vst.msk [vmem:[#allocation3 + $0xd0] sm:$0xff] %vm565_vm4, %v522_v36  ;;  %v4352_v36 = vld [vmem:[#allocation2 + $0x180] sm:$0xff] }
  0xe5   :  { %591 = vst.msk [vmem:[#allocation3 + $0xc8] sm:$0xff] %vm565_vm4, %v520_v21  ;;  %850 = vrot.lane.b32.xlu0 %v3776_v4, %s3314_s24 }
  0xe6   :  { %848 = vrot.lane.b32.xlu1 %v3765_v2, %s3314_s24 }
  0xe7   :  { %v526_v23 = vpop.permute.xlu0 %525 }
  0xe8   :  { %v524_v11 = vpop.permute.xlu1 %523  ;;  %594 = vst.msk [vmem:[#allocation3 + $0xe0] sm:$0xff] %vm565_vm4, %v526_v23  ;;  %v4354_v23 = vld [vmem:[#allocation2 + $0x188] sm:$0xff] }
  0xe9   :  { %593 = vst.msk [vmem:[#allocation3 + $0xd8] sm:$0xff] %vm565_vm4, %v524_v11  ;;  %854 = vrot.lane.b32.xlu0 %v3861_v44, %s3314_s24 }
  0xea   :  { %852 = vrot.lane.b32.xlu1 %v3850_v35, %s3314_s24 }
  0xeb   :  { %v530_v20 = vpop.permute.xlu0 %529 }
  0xec   :  { %v528_v42 = vpop.permute.xlu1 %527  ;;  %596 = vst.msk [vmem:[#allocation3 + $0xf0] sm:$0xff] %vm565_vm4, %v530_v20 }
  0xed   :  { %595 = vst.msk [vmem:[#allocation3 + $0xe8] sm:$0xff] %vm565_vm4, %v528_v42  ;;  %858 = vrot.lane.b32.xlu0 %v3873_v61, %s3314_s24 }
  0xee   :  { %856 = vrot.lane.b32.xlu1 %v3863_v48, %s3314_s24 }
  0xef   :  { %v680_v27 = vpop.permute.xlu0 %679 }
  0xf0   :  { %v532_v17 = vpop.permute.xlu1 %531  ;;  %776 = vst.msk [vmem:[#allocation3] sm:$0xff] %vm775_vm5, %v680_v27 }
  0xf1   :  { %597 = vst.msk [vmem:[#allocation3 + $0xf8] sm:$0xff] %vm565_vm4, %v532_v17  ;;  %862 = vrot.lane.b32.xlu0 %v3877_v6, %s3314_s24 }
  0xf2   :  { %860 = vrot.lane.b32.xlu1 %v3875_v3, %s3314_s24 }
  0xf3   :  { %v684_v22 = vpop.permute.xlu0 %683 }
  0xf4   :  { %v682_v28 = vpop.permute.xlu1 %681  ;;  %778 = vst.msk [vmem:[#allocation3 + $0x10] sm:$0xff] %vm775_vm5, %v684_v22 }
  0xf5   :  { %777 = vst.msk [vmem:[#allocation3 + $0x8] sm:$0xff] %vm775_vm5, %v682_v28  ;;  %866 = vrot.lane.b32.xlu0 %v3889_v9, %s3314_s24 }
  0xf6   :  { %864 = vrot.lane.b32.xlu1 %v3885_v8, %s3314_s24 }
  0xf7   :  { %v688_v11 = vpop.permute.xlu0 %687 }
  0xf8   :  { %v686_v21 = vpop.permute.xlu1 %685  ;;  %780 = vst.msk [vmem:[#allocation3 + $0x20] sm:$0xff] %vm775_vm5, %v688_v11 }
  0xf9   :  { %779 = vst.msk [vmem:[#allocation3 + $0x18] sm:$0xff] %vm775_vm5, %v686_v21  ;;  %870 = vrot.lane.b32.xlu0 %v4352_v36, %s3314_s24 }
  0xfa   :  { %868 = vrot.lane.b32.xlu1 %v3895_v10, %s3314_s24 }
  0xfb   :  { %v692_v20 = vpop.permute.xlu0 %691 }
  0xfc   :  { %v690_v42 = vpop.permute.xlu1 %689  ;;  %782 = vst.msk [vmem:[#allocation3 + $0x30] sm:$0xff] %vm775_vm5, %v692_v20  ;;  %v6527_v20 = vld [vmem:[#allocation6_spill] sm:$0xff] }
  0xfd   :  { %781 = vst.msk [vmem:[#allocation3 + $0x28] sm:$0xff] %vm775_vm5, %v690_v42  ;;  %945 = vrot.lane.b32.xlu0 %v3684_v40, %s3315_s25  ;;  %v6525_v40 = vld [vmem:[#allocation4_spill] sm:$0xff]  ;;  %v6526_v42 = vld [vmem:[#allocation5_spill] sm:$0xff] }
  0xfe   :  { %872 = vrot.lane.b32.xlu1 %v4354_v23, %s3314_s24 }
  0xff   :  { %v696_v27 = vpop.permute.xlu0 %695 }
 0x100   :  { %v694_v17 = vpop.permute.xlu1 %693  ;;  %784 = vst.msk [vmem:[#allocation3 + $0x40] sm:$0xff] %vm775_vm5, %v696_v27 }
 0x101   :  { %783 = vst.msk [vmem:[#allocation3 + $0x38] sm:$0xff] %vm775_vm5, %v694_v17  ;;  %949 = vrot.lane.b32.xlu0 %v3733_v55, %s3315_s25 }
 0x102   :  { %947 = vrot.lane.b32.xlu1 %v3704_v47, %s3315_s25 }
 0x103   :  { %v700_v22 = vpop.permute.xlu0 %699 }
 0x104   :  { %v698_v28 = vpop.permute.xlu1 %697  ;;  %786 = vst.msk [vmem:[#allocation3 + $0x50] sm:$0xff] %vm775_vm5, %v700_v22  ;;  %v6529_v22 = vld [vmem:[#allocation8_spill] sm:$0xff] }
 0x105   :  { %785 = vst.msk [vmem:[#allocation3 + $0x48] sm:$0xff] %vm775_vm5, %v698_v28  ;;  %953 = vrot.lane.b32.xlu0 %v3781_v5, %s3315_s25  ;;  %v6528_v28 = vld [vmem:[#allocation7_spill] sm:$0xff] }
 0x106   :  { %951 = vrot.lane.b32.xlu1 %v3746_v60, %s3315_s25 }
 0x107   :  { %v704_v47 = vpop.permute.xlu0 %703 }
 0x108   :  { %v702_v21 = vpop.permute.xlu1 %701  ;;  %788 = vst.msk [vmem:[#allocation3 + $0x60] sm:$0xff] %vm775_vm5, %v704_v47 }
 0x109   :  { %787 = vst.msk [vmem:[#allocation3 + $0x58] sm:$0xff] %vm775_vm5, %v702_v21  ;;  %957 = vrot.lane.b32.xlu0 %v6526_v42, %s3315_s25 }
 0x10a   :  { %955 = vrot.lane.b32.xlu1 %v6525_v40, %s3315_s25 }
 0x10b   :  { %v708_v17 = vpop.permute.xlu0 %707 }
 0x10c   :  { %v706_v11 = vpop.permute.xlu1 %705  ;;  %790 = vst.msk [vmem:[#allocation3 + $0x70] sm:$0xff] %vm775_vm5, %v708_v17  ;;  %v6531_v17 = vld [vmem:[#allocation10_spill] sm:$0xff] }
 0x10d   :  { %789 = vst.msk [vmem:[#allocation3 + $0x68] sm:$0xff] %vm775_vm5, %v706_v11  ;;  %961 = vrot.lane.b32.xlu0 %v6528_v28, %s3315_s25  ;;  %v6530_v11 = vld [vmem:[#allocation9_spill] sm:$0xff] }
 0x10e   :  { %959 = vrot.lane.b32.xlu1 %v6527_v20, %s3315_s25 }
 0x10f   :  { %v712_v21 = vpop.permute.xlu0 %711 }
 0x110   :  { %v710_v27 = vpop.permute.xlu1 %709  ;;  %792 = vst.msk [vmem:[#allocation3 + $0x80] sm:$0xff] %vm775_vm5, %v712_v21  ;;  %v6533_v21 = vld [vmem:[#allocation12_spill] sm:$0xff] }
 0x111   :  { %791 = vst.msk [vmem:[#allocation3 + $0x78] sm:$0xff] %vm775_vm5, %v710_v27  ;;  %965 = vrot.lane.b32.xlu0 %v6530_v11, %s3315_s25 }
 0x112   :  { %963 = vrot.lane.b32.xlu1 %v6529_v22, %s3315_s25  ;;  %v6532_v22 = vld [vmem:[#allocation11_spill] sm:$0xff] }
 0x113   :  { %v716_v20 = vpop.permute.xlu0 %715 }
 0x114   :  { %v714_v47 = vpop.permute.xlu1 %713  ;;  %794 = vst.msk [vmem:[#allocation3 + $0x90] sm:$0xff] %vm775_vm5, %v716_v20  ;;  %v6535_v20 = vld [vmem:[#allocation14_spill] sm:$0xff] }
 0x115   :  { %793 = vst.msk [vmem:[#allocation3 + $0x88] sm:$0xff] %vm775_vm5, %v714_v47  ;;  %969 = vrot.lane.b32.xlu0 %v6532_v22, %s3315_s25 }
 0x116   :  { %967 = vrot.lane.b32.xlu1 %v6531_v17, %s3315_s25  ;;  %v6534_v17 = vld [vmem:[#allocation13_spill] sm:$0xff] }
 0x117   :  { %v720_v28 = vpop.permute.xlu0 %719 }
 0x118   :  { %v718_v27 = vpop.permute.xlu1 %717  ;;  %796 = vst.msk [vmem:[#allocation3 + $0xa0] sm:$0xff] %vm775_vm5, %v720_v28  ;;  %v6537_v28 = vld [vmem:[#allocation16_spill] sm:$0xff] }
 0x119   :  { %795 = vst.msk [vmem:[#allocation3 + $0x98] sm:$0xff] %vm775_vm5, %v718_v27  ;;  %973 = vrot.lane.b32.xlu0 %v6534_v17, %s3315_s25 }
 0x11a   :  { %971 = vrot.lane.b32.xlu1 %v6533_v21, %s3315_s25  ;;  %v6536_v21 = vld [vmem:[#allocation15_spill] sm:$0xff] }
 0x11b   :  { %v724_v11 = vpop.permute.xlu0 %723 }
 0x11c   :  { %v722_v47 = vpop.permute.xlu1 %721  ;;  %798 = vst.msk [vmem:[#allocation3 + $0xb0] sm:$0xff] %vm775_vm5, %v724_v11  ;;  %v6539_v11 = vld [vmem:[#allocation18_spill] sm:$0xff] }
 0x11d   :  { %797 = vst.msk [vmem:[#allocation3 + $0xa8] sm:$0xff] %vm775_vm5, %v722_v47  ;;  %977 = vrot.lane.b32.xlu0 %v6536_v21, %s3315_s25 }
 0x11e   :  { %975 = vrot.lane.b32.xlu1 %v6535_v20, %s3315_s25  ;;  %v6538_v20 = vld [vmem:[#allocation17_spill] sm:$0xff] }
 0x11f   :  { %v728_v22 = vpop.permute.xlu0 %727 }
 0x120   :  { %v726_v27 = vpop.permute.xlu1 %725  ;;  %800 = vst.msk [vmem:[#allocation3 + $0xc0] sm:$0xff] %vm775_vm5, %v728_v22  ;;  %v6541_v22 = vld [vmem:[#allocation20_spill] sm:$0xff] }
 0x121   :  { %799 = vst.msk [vmem:[#allocation3 + $0xb8] sm:$0xff] %vm775_vm5, %v726_v27  ;;  %981 = vrot.lane.b32.xlu0 %v6538_v20, %s3315_s25 }
 0x122   :  { %979 = vrot.lane.b32.xlu1 %v6537_v28, %s3315_s25  ;;  %v6540_v28 = vld [vmem:[#allocation19_spill] sm:$0xff] }
 0x123   :  { %v732_v17 = vpop.permute.xlu0 %731 }
 0x124   :  { %v730_v47 = vpop.permute.xlu1 %729  ;;  %802 = vst.msk [vmem:[#allocation3 + $0xd0] sm:$0xff] %vm775_vm5, %v732_v17  ;;  %v6543_v17 = vld [vmem:[#allocation22_spill] sm:$0xff] }
 0x125   :  { %801 = vst.msk [vmem:[#allocation3 + $0xc8] sm:$0xff] %vm775_vm5, %v730_v47  ;;  %985 = vrot.lane.b32.xlu0 %v6540_v28, %s3315_s25  ;;  %v4441_v28 = vld [vmem:[#allocation2 + $0x190] sm:$0x3] }
 0x126   :  { %983 = vrot.lane.b32.xlu1 %v6539_v11, %s3315_s25  ;;  %v6542_v11 = vld [vmem:[#allocation21_spill] sm:$0xff] }
 0x127   :  { %v736_v21 = vpop.permute.xlu0 %735 }
 0x128   :  { %v734_v27 = vpop.permute.xlu1 %733  ;;  %804 = vst.msk [vmem:[#allocation3 + $0xe0] sm:$0xff] %vm775_vm5, %v736_v21  ;;  %v6545_v21 = vld [vmem:[#allocation24_spill] sm:$0xff] }
 0x129   :  { %803 = vst.msk [vmem:[#allocation3 + $0xd8] sm:$0xff] %vm775_vm5, %v734_v27  ;;  %989 = vrot.lane.b32.xlu0 %v6542_v11, %s3315_s25 }
 0x12a   :  { %987 = vrot.lane.b32.xlu1 %v6541_v22, %s3315_s25  ;;  %v6544_v22 = vld [vmem:[#allocation23_spill] sm:$0xff] }
 0x12b   :  { %v740_v20 = vpop.permute.xlu0 %739 }
 0x12c   :  { %v738_v47 = vpop.permute.xlu1 %737  ;;  %806 = vst.msk [vmem:[#allocation3 + $0xf0] sm:$0xff] %vm775_vm5, %v740_v20  ;;  %v940_v20 = vrot.slane %v4352_v36, 1 }
 0x12d   :  { %805 = vst.msk [vmem:[#allocation3 + $0xe8] sm:$0xff] %vm775_vm5, %v738_v47  ;;  %993 = vrot.lane.b32.xlu0 %v6544_v22, %s3315_s25  ;;  %v6546_v22 = vld [vmem:[#allocation26_spill] sm:$0xff] }
 0x12e   :  { %991 = vrot.lane.b32.xlu1 %v6543_v17, %s3315_s25 }
 0x12f   :  { %v811_v47 = vpop.permute.xlu0 %810 }
 0x130   :  { %v742_v27 = vpop.permute.xlu1 %741  ;;  %907 = vst.msk [vmem:[#allocation3] sm:$0xff] %vm906_vm6, %v811_v47 }
 0x131   :  { %807 = vst.msk [vmem:[#allocation3 + $0xf8] sm:$0xff] %vm775_vm5, %v742_v27  ;;  %997 = vrot.lane.b32.xlu0 %v4031_v13, %s3315_s25  ;;  %v941_v27 = vrot.slane %v4354_v23, 1 }
 0x132   :  { %995 = vrot.lane.b32.xlu1 %v6545_v21, %s3315_s25  ;;  %v943_v21 = vrot.slane %v4441_v28, 1 }
 0x133   :  { %v815_v17 = vpop.permute.xlu0 %814  ;;  %v4458_v13 = vsel %vm388_vm2, %v940_v20, %v941_v27 }
 0x134   :  { %v813_v11 = vpop.permute.xlu1 %812  ;;  %909 = vst.msk [vmem:[#allocation3 + $0x10] sm:$0xff] %vm906_vm6, %v815_v17 }
 0x135   :  { %908 = vst.msk [vmem:[#allocation3 + $0x8] sm:$0xff] %vm906_vm6, %v813_v11  ;;  %1001 = vrot.lane.b32.xlu0 %v4045_v19, %s3315_s25  ;;  %v6547_v11 = vld [vmem:[#allocation27_spill] sm:$0xff] }
 0x136   :  { %999 = vrot.lane.b32.xlu1 %v6546_v22, %s3315_s25  ;;  %v4461_v22 = vsel %vm388_vm2, %v941_v27, %v943_v21 }
 0x137   :  { %v819_v42 = vpop.permute.xlu0 %818 }
 0x138   :  { %v817_v47 = vpop.permute.xlu1 %816  ;;  %911 = vst.msk [vmem:[#allocation3 + $0x20] sm:$0xff] %vm906_vm6, %v819_v42 }
 0x139   :  { %910 = vst.msk [vmem:[#allocation3 + $0x18] sm:$0xff] %vm906_vm6, %v817_v47  ;;  %1005 = vrot.lane.b32.xlu0 %v4458_v13, %s3315_s25 }
 0x13a   :  { %1003 = vrot.lane.b32.xlu1 %v6547_v11, %s3315_s25 }
 0x13b   :  { %v823_v17 = vpop.permute.xlu0 %822 }
 0x13c   :  { %v821_v40 = vpop.permute.xlu1 %820  ;;  %913 = vst.msk [vmem:[#allocation3 + $0x30] sm:$0xff] %vm906_vm6, %v823_v17  ;;  %v6549_v17 = vld [vmem:[#allocation29_spill] sm:$0xff] }
 0x13d   :  { %912 = vst.msk [vmem:[#allocation3 + $0x28] sm:$0xff] %vm906_vm6, %v821_v40  ;;  %1079 = vrot.lane.b32.xlu0 %v4065_v24, %s3316_s26 }
 0x13e   :  { %1007 = vrot.lane.b32.xlu1 %v4461_v22, %s3315_s25 }
 0x13f   :  { %v827_v40 = vpop.permute.xlu0 %826 }
 0x140   :  { %v825_v20 = vpop.permute.xlu1 %824  ;;  %915 = vst.msk [vmem:[#allocation3 + $0x40] sm:$0xff] %vm906_vm6, %v827_v40 }
 0x141   :  { %914 = vst.msk [vmem:[#allocation3 + $0x38] sm:$0xff] %vm906_vm6, %v825_v20  ;;  %1083 = vrot.lane.b32.xlu0 %v4078_v33, %s3316_s26 }
 0x142   :  { %1081 = vrot.lane.b32.xlu1 %v4070_v25, %s3316_s26  ;;  %v6548_v25 = vld [vmem:[#allocation28_spill] sm:$0xff] }
 0x143   :  { %v831_v21 = vpop.permute.xlu0 %830 }
 0x144   :  { %v829_v42 = vpop.permute.xlu1 %828  ;;  %917 = vst.msk [vmem:[#allocation3 + $0x50] sm:$0xff] %vm906_vm6, %v831_v21 }
 0x145   :  { %916 = vst.msk [vmem:[#allocation3 + $0x48] sm:$0xff] %vm906_vm6, %v829_v42  ;;  %1087 = vrot.lane.b32.xlu0 %v4091_v37, %s3316_s26  ;;  %v6550_v42 = vld [vmem:[#allocation30_spill] sm:$0xff] }
 0x146   :  { %1085 = vrot.lane.b32.xlu1 %v4083_v31, %s3316_s26 }
 0x147   :  { %v835_v24 = vpop.permute.xlu0 %834 }
 0x148   :  { %v833_v27 = vpop.permute.xlu1 %832  ;;  %919 = vst.msk [vmem:[#allocation3 + $0x60] sm:$0xff] %vm906_vm6, %v835_v24  ;;  %v6551_v24 = vld [vmem:[#allocation31_spill] sm:$0xff] }
 0x149   :  { %918 = vst.msk [vmem:[#allocation3 + $0x58] sm:$0xff] %vm906_vm6, %v833_v27  ;;  %1091 = vrot.lane.b32.xlu0 %v4104_v51, %s3316_s26 }
 0x14a   :  { %1089 = vrot.lane.b32.xlu1 %v6548_v25, %s3316_s26 }
 0x14b   :  { %v839_v20 = vpop.permute.xlu0 %838 }
 0x14c   :  { %v837_v47 = vpop.permute.xlu1 %836  ;;  %921 = vst.msk [vmem:[#allocation3 + $0x70] sm:$0xff] %vm906_vm6, %v839_v20 }
 0x14d   :  { %920 = vst.msk [vmem:[#allocation3 + $0x68] sm:$0xff] %vm906_vm6, %v837_v47  ;;  %1095 = vrot.lane.b32.xlu0 %v4117_v1, %s3316_s26 }
 0x14e   :  { %1093 = vrot.lane.b32.xlu1 %v6549_v17, %s3316_s26 }
 0x14f   :  { %v843_v21 = vpop.permute.xlu0 %842 }
 0x150   :  { %v841_v40 = vpop.permute.xlu1 %840  ;;  %923 = vst.msk [vmem:[#allocation3 + $0x80] sm:$0xff] %vm906_vm6, %v843_v21 }
 0x151   :  { %922 = vst.msk [vmem:[#allocation3 + $0x78] sm:$0xff] %vm906_vm6, %v841_v40  ;;  %1099 = vrot.lane.b32.xlu0 %v4130_v16, %s3316_s26  ;;  %v6552_v40 = vld [vmem:[#allocation32_spill] sm:$0xff] }
 0x152   :  { %1097 = vrot.lane.b32.xlu1 %v6550_v42, %s3316_s26 }
 0x153   :  { %v847_v47 = vpop.permute.xlu0 %846 }
 0x154   :  { %v845_v27 = vpop.permute.xlu1 %844  ;;  %925 = vst.msk [vmem:[#allocation3 + $0x90] sm:$0xff] %vm906_vm6, %v847_v47  ;;  %v6553_v47 = vld [vmem:[#allocation33_spill] sm:$0xff] }
 0x155   :  { %924 = vst.msk [vmem:[#allocation3 + $0x88] sm:$0xff] %vm906_vm6, %v845_v27  ;;  %1103 = vrot.lane.b32.xlu0 %v4143_v32, %s3316_s26 }
 0x156   :  { %1101 = vrot.lane.b32.xlu1 %v6551_v24, %s3316_s26 }
 0x157   :  { %v851_v21 = vpop.permute.xlu0 %850 }
 0x158   :  { %v849_v20 = vpop.permute.xlu1 %848  ;;  %927 = vst.msk [vmem:[#allocation3 + $0xa0] sm:$0xff] %vm906_vm6, %v851_v21  ;;  %v6554_v21 = vld [vmem:[#allocation34_spill] sm:$0xff] }
 0x159   :  { %926 = vst.msk [vmem:[#allocation3 + $0x98] sm:$0xff] %vm906_vm6, %v849_v20  ;;  %1107 = vrot.lane.b32.xlu0 %v4156_v7, %s3316_s26 }
 0x15a   :  { %1105 = vrot.lane.b32.xlu1 %v6552_v40, %s3316_s26 }
 0x15b   :  { %v855_v24 = vpop.permute.xlu0 %854 }
 0x15c   :  { %v853_v27 = vpop.permute.xlu1 %852  ;;  %929 = vst.msk [vmem:[#allocation3 + $0xb0] sm:$0xff] %vm906_vm6, %v855_v24  ;;  %v6555_v24 = vld [vmem:[#allocation35_spill] sm:$0xff] }
 0x15d   :  { %928 = vst.msk [vmem:[#allocation3 + $0xa8] sm:$0xff] %vm906_vm6, %v853_v27  ;;  %1111 = vrot.lane.b32.xlu0 %v4169_v18, %s3316_s26 }
 0x15e   :  { %1109 = vrot.lane.b32.xlu1 %v6553_v47, %s3316_s26 }
 0x15f   :  { %v859_v40 = vpop.permute.xlu0 %858 }
 0x160   :  { %v857_v20 = vpop.permute.xlu1 %856  ;;  %931 = vst.msk [vmem:[#allocation3 + $0xc0] sm:$0xff] %vm906_vm6, %v859_v40  ;;  %v6556_v40 = vld [vmem:[#allocation36_spill] sm:$0xff] }
 0x161   :  { %930 = vst.msk [vmem:[#allocation3 + $0xb8] sm:$0xff] %vm906_vm6, %v857_v20  ;;  %1115 = vrot.lane.b32.xlu0 %v4182_v43, %s3316_s26 }
 0x162   :  { %1113 = vrot.lane.b32.xlu1 %v6554_v21, %s3316_s26 }
 0x163   :  { %v863_v47 = vpop.permute.xlu0 %862 }
 0x164   :  { %v861_v27 = vpop.permute.xlu1 %860  ;;  %933 = vst.msk [vmem:[#allocation3 + $0xd0] sm:$0xff] %vm906_vm6, %v863_v47  ;;  %v6557_v47 = vld [vmem:[#allocation38_spill] sm:$0xff] }
 0x165   :  { %932 = vst.msk [vmem:[#allocation3 + $0xc8] sm:$0xff] %vm906_vm6, %v861_v27  ;;  %1119 = vrot.lane.b32.xlu0 %v4195_v15, %s3316_s26 }
 0x166   :  { %1117 = vrot.lane.b32.xlu1 %v6555_v24, %s3316_s26 }
 0x167   :  { %v867_v21 = vpop.permute.xlu0 %866 }
 0x168   :  { %v865_v20 = vpop.permute.xlu1 %864  ;;  %935 = vst.msk [vmem:[#allocation3 + $0xe0] sm:$0xff] %vm906_vm6, %v867_v21  ;;  %v6558_v21 = vld [vmem:[#allocation40_spill] sm:$0xff] }
 0x169   :  { %934 = vst.msk [vmem:[#allocation3 + $0xd8] sm:$0xff] %vm906_vm6, %v865_v20  ;;  %1123 = vrot.lane.b32.xlu0 %v4208_v12, %s3316_s26 }
 0x16a   :  { %1121 = vrot.lane.b32.xlu1 %v6556_v40, %s3316_s26 }
 0x16b   :  { %v871_v24 = vpop.permute.xlu0 %870 }
 0x16c   :  { %v869_v27 = vpop.permute.xlu1 %868  ;;  %937 = vst.msk [vmem:[#allocation3 + $0xf0] sm:$0xff] %vm906_vm6, %v871_v24  ;;  %v1074_v24 = vrot.slane %v4352_v36, 2 }
 0x16d   :  { %936 = vst.msk [vmem:[#allocation3 + $0xe8] sm:$0xff] %vm906_vm6, %v869_v27  ;;  %1127 = vrot.lane.b32.xlu0 %v4221_v56, %s3316_s26 }
 0x16e   :  { %1125 = vrot.lane.b32.xlu1 %v6557_v47, %s3316_s26  ;;  %v1077_v47 = vrot.slane %v4441_v28, 2 }
 0x16f   :  { %v946_v27 = vpop.permute.xlu0 %945 }
 0x170   :  { %v873_v20 = vpop.permute.xlu1 %872  ;;  %1042 = vst.msk [vmem:[#allocation3] sm:$0xff] %vm1041_vm7, %v946_v27 }
 0x171   :  { %938 = vst.msk [vmem:[#allocation3 + $0xf8] sm:$0xff] %vm906_vm6, %v873_v20  ;;  %1131 = vrot.lane.b32.xlu0 %v4236_v26, %s3316_s26  ;;  %v1075_v20 = vrot.slane %v4354_v23, 2 }
 0x172   :  { %1129 = vrot.lane.b32.xlu1 %v6558_v21, %s3316_s26 }
 0x173   :  { %v950_v56 = vpop.permute.xlu0 %949 }
 0x174   :  { %v948_v12 = vpop.permute.xlu1 %947  ;;  %1044 = vst.msk [vmem:[#allocation3 + $0x10] sm:$0xff] %vm1041_vm7, %v950_v56 }
 0x175   :  { %1043 = vst.msk [vmem:[#allocation3 + $0x8] sm:$0xff] %vm1041_vm7, %v948_v12  ;;  %1135 = vrot.lane.b32.xlu0 %v4251_v57, %s3316_s26  ;;  %v4563_v12 = vsel %vm598_vm3, %v1074_v24, %v1075_v20 }
 0x176   :  { %1133 = vrot.lane.b32.xlu1 %v4241_v29, %s3316_s26  ;;  %v4566_v29 = vsel %vm598_vm3, %v1075_v20, %v1077_v47 }
 0x177   :  { %v954_v27 = vpop.permute.xlu0 %953 }
 0x178   :  { %v952_v21 = vpop.permute.xlu1 %951  ;;  %1046 = vst.msk [vmem:[#allocation3 + $0x20] sm:$0xff] %vm1041_vm7, %v954_v27 }
 0x179   :  { %1045 = vst.msk [vmem:[#allocation3 + $0x18] sm:$0xff] %vm1041_vm7, %v952_v21  ;;  %1139 = vrot.lane.b32.xlu0 %v4563_v12, %s3316_s26 }
 0x17a   :  { %1137 = vrot.lane.b32.xlu1 %v4254_v14, %s3316_s26 }
 0x17b   :  { %v958_v56 = vpop.permute.xlu0 %957 }
 0x17c   :  { %v956_v28 = vpop.permute.xlu1 %955  ;;  %1048 = vst.msk [vmem:[#allocation3 + $0x30] sm:$0xff] %vm1041_vm7, %v958_v56  ;;  %v4680_v56 = vld [vmem:[#allocation2 + $0x1b0] sm:$0xff] }
 0x17d   :  { %1047 = vst.msk [vmem:[#allocation3 + $0x28] sm:$0xff] %vm1041_vm7, %v956_v28  ;;  %1210 = vrot.lane.b32.xlu0 %v3658_v30, %s3317_s28  ;;  %v4674_v28 = vld [vmem:[#allocation2 + $0x1a0] sm:$0xff] }
 0x17e   :  { %1141 = vrot.lane.b32.xlu1 %v4566_v29, %s3316_s26  ;;  %1663 = vst.msk [vmem:[#allocation3 + $0x100] sm:$0xff] %vm15_vm0, %v4680_v56 }
 0x17f   :  { %v962_v47 = vpop.permute.xlu0 %961 }
 0x180   :  { %v960_v21 = vpop.permute.xlu1 %959  ;;  %1050 = vst.msk [vmem:[#allocation3 + $0x40] sm:$0xff] %vm1041_vm7, %v962_v47  ;;  %v1743_v47 = vrot.slane %v4680_v56, 1 }
 0x181   :  { %1049 = vst.msk [vmem:[#allocation3 + $0x38] sm:$0xff] %vm1041_vm7, %v960_v21  ;;  %1214 = vrot.lane.b32.xlu0 %v3678_v38, %s3317_s28  ;;  %v159_v21 = vld [vmem:[%s6327_s0 + $0x110] sm:$0xff] }
 0x182   :  { %1212 = vrot.lane.b32.xlu1 %v3668_v34, %s3317_s28  ;;  %224 = vst.msk [vmem:[#allocation2 + $0x1e1] sm:$0xff] %vm15_vm0, %v159_v21  ;;  %v6564_v21 = vld [vmem:[#allocation9_spill] sm:$0xff] }
 0x183   :  { %v966_v20 = vpop.permute.xlu0 %965 }
 0x184   :  { %v964_v24 = vpop.permute.xlu1 %963  ;;  %1052 = vst.msk [vmem:[#allocation3 + $0x50] sm:$0xff] %vm1041_vm7, %v966_v20  ;;  %v160_v20 = vld [vmem:[%s6327_s0 + $0x118] sm:$0xff] }
 0x185   :  { %1051 = vst.msk [vmem:[#allocation3 + $0x48] sm:$0xff] %vm1041_vm7, %v964_v24  ;;  %1218 = vrot.lane.b32.xlu0 %v3690_v41, %s3317_s28 }
 0x186   :  { %1216 = vrot.lane.b32.xlu1 %v3680_v39, %s3317_s28  ;;  %225 = vst.msk [vmem:[#allocation2 + $0x1e9] sm:$0xff] %vm15_vm0, %v160_v20 }
 0x187   :  { %v970_v30 = vpop.permute.xlu0 %969 }
 0x188   :  { %v968_v27 = vpop.permute.xlu1 %967  ;;  %1054 = vst.msk [vmem:[#allocation3 + $0x60] sm:$0xff] %vm1041_vm7, %v970_v30 }
 0x189   :  { %1053 = vst.msk [vmem:[#allocation3 + $0x58] sm:$0xff] %vm1041_vm7, %v968_v27  ;;  %1222 = vrot.lane.b32.xlu0 %v3701_v46, %s3317_s28 }
 0x18a   :  { %1220 = vrot.lane.b32.xlu1 %v3697_v45, %s3317_s28 }
 0x18b   :  { %v974_v38 = vpop.permute.xlu0 %973 }
 0x18c   :  { %v972_v34 = vpop.permute.xlu1 %971  ;;  %1056 = vst.msk [vmem:[#allocation3 + $0x70] sm:$0xff] %vm1041_vm7, %v974_v38 }
 0x18d   :  { %1055 = vst.msk [vmem:[#allocation3 + $0x68] sm:$0xff] %vm1041_vm7, %v972_v34  ;;  %1226 = vrot.lane.b32.xlu0 %v3713_v50, %s3317_s28 }
 0x18e   :  { %1224 = vrot.lane.b32.xlu1 %v3709_v49, %s3317_s28 }
 0x18f   :  { %v978_v41 = vpop.permute.xlu0 %977 }
 0x190   :  { %v976_v39 = vpop.permute.xlu1 %975  ;;  %1058 = vst.msk [vmem:[#allocation3 + $0x80] sm:$0xff] %vm1041_vm7, %v978_v41  ;;  %v161_v41 = vld [vmem:[%s6327_s0 + $0x120] sm:$0xff] }
 0x191   :  { %1057 = vst.msk [vmem:[#allocation3 + $0x78] sm:$0xff] %vm1041_vm7, %v976_v39  ;;  %1230 = vrot.lane.b32.xlu0 %v3726_v53, %s3317_s28 }
 0x192   :  { %1228 = vrot.lane.b32.xlu1 %v3719_v52, %s3317_s28  ;;  %226 = vst.msk [vmem:[#allocation2 + $0x1f9] sm:$0xff] %vm15_vm0, %v161_v41  ;;  %v170_v41 = vld [vmem:[%s6327_s0 + $0x168] sm:$0xff] }
 0x193   :  { %v982_v46 = vpop.permute.xlu0 %981  ;;  %235 = vst.msk [vmem:[#allocation2 + $0x261] sm:$0xff] %vm15_vm0, %v170_v41  ;;  %v176_v41 = vld [vmem:[%s6327_s0 + $0x198] sm:$0xff] }
 0x194   :  { %v980_v45 = vpop.permute.xlu1 %979  ;;  %1060 = vst.msk [vmem:[#allocation3 + $0x90] sm:$0xff] %vm1041_vm7, %v982_v46 }
 0x195   :  { %1059 = vst.msk [vmem:[#allocation3 + $0x88] sm:$0xff] %vm1041_vm7, %v980_v45  ;;  %1234 = vrot.lane.b32.xlu0 %v3741_v58, %s3317_s28 }
 0x196   :  { %1232 = vrot.lane.b32.xlu1 %v3728_v54, %s3317_s28  ;;  %241 = vst.msk [vmem:[#allocation2 + $0x2a9] sm:$0xff] %vm15_vm0, %v176_v41 }
 0x197   :  { %v986_v50 = vpop.permute.xlu0 %985 }
 0x198   :  { %v984_v49 = vpop.permute.xlu1 %983  ;;  %1062 = vst.msk [vmem:[#allocation3 + $0xa0] sm:$0xff] %vm1041_vm7, %v986_v50  ;;  %v164_v50 = vld [vmem:[%s6327_s0 + $0x138] sm:$0xff] }
 0x199   :  { %1061 = vst.msk [vmem:[#allocation3 + $0x98] sm:$0xff] %vm1041_vm7, %v984_v49  ;;  %1238 = vrot.lane.b32.xlu0 %v3753_v62, %s3317_s28  ;;  %v163_v49 = vld [vmem:[%s6327_s0 + $0x130] sm:$0xff] }
 0x19a   :  { %1236 = vrot.lane.b32.xlu1 %v3743_v59, %s3317_s28  ;;  %228 = vst.msk [vmem:[#allocation2 + $0x211] sm:$0xff] %vm15_vm0, %v163_v49  ;;  %229 = vst.msk [vmem:[#allocation2 + $0x219] sm:$0xff] %vm15_vm0, %v164_v50  ;;  %v171_v50 = vld [vmem:[%s6327_s0 + $0x170] sm:$0xff] }
 0x19b   :  { %v990_v53 = vpop.permute.xlu0 %989  ;;  %236 = vst.msk [vmem:[#allocation2 + $0x271] sm:$0xff] %vm15_vm0, %v171_v50 }
 0x19c   :  { %v988_v52 = vpop.permute.xlu1 %987  ;;  %1064 = vst.msk [vmem:[#allocation3 + $0xb0] sm:$0xff] %vm1041_vm7, %v990_v53  ;;  %v4741_v53 = vld [vmem:[#allocation2 + $0x1e8] sm:$0xff] }
 0x19d   :  { %1063 = vst.msk [vmem:[#allocation3 + $0xa8] sm:$0xff] %vm1041_vm7, %v988_v52  ;;  %1242 = vrot.lane.b32.xlu0 %v3757_v0, %s3317_s28  ;;  %v6559_v52 = vld [vmem:[#allocation4_spill] sm:$0xff] }
 0x19e   :  { %1240 = vrot.lane.b32.xlu1 %v3755_v63, %s3317_s28  ;;  %1668 = vst.msk [vmem:[#allocation3 + $0x128] sm:$0xff] %vm15_vm0, %v4741_v53 }
 0x19f   :  { %v994_v58 = vpop.permute.xlu0 %993 }
 0x1a0   :  { %v992_v54 = vpop.permute.xlu1 %991  ;;  %1066 = vst.msk [vmem:[#allocation3 + $0xc0] sm:$0xff] %vm1041_vm7, %v994_v58  ;;  %v6560_v58 = vld [vmem:[#allocation5_spill] sm:$0xff] }
 0x1a1   :  { %1065 = vst.msk [vmem:[#allocation3 + $0xb8] sm:$0xff] %vm1041_vm7, %v992_v54  ;;  %1246 = vrot.lane.b32.xlu0 %v3776_v4, %s3317_s28 }
 0x1a2   :  { %1244 = vrot.lane.b32.xlu1 %v3765_v2, %s3317_s28 }
 0x1a3   :  { %v998_v62 = vpop.permute.xlu0 %997 }
 0x1a4   :  { %v996_v59 = vpop.permute.xlu1 %995  ;;  %1068 = vst.msk [vmem:[#allocation3 + $0xd0] sm:$0xff] %vm1041_vm7, %v998_v62  ;;  %v165_v62 = vld [vmem:[%s6327_s0 + $0x140] sm:$0xff] }
 0x1a5   :  { %1067 = vst.msk [vmem:[#allocation3 + $0xc8] sm:$0xff] %vm1041_vm7, %v996_v59  ;;  %1250 = vrot.lane.b32.xlu0 %v3861_v44, %s3317_s28  ;;  %v4753_v59 = vld [vmem:[#allocation2 + $0x1f8] sm:$0xff] }
 0x1a6   :  { %1248 = vrot.lane.b32.xlu1 %v3850_v35, %s3317_s28  ;;  %1669 = vst.msk [vmem:[#allocation3 + $0x130] sm:$0xff] %vm15_vm0, %v4753_v59  ;;  %230 = vst.msk [vmem:[#allocation2 + $0x229] sm:$0xff] %vm15_vm0, %v165_v62 }
 0x1a7   :  { %v1002_v0 = vpop.permute.xlu0 %1001 }
 0x1a8   :  { %v1000_v63 = vpop.permute.xlu1 %999  ;;  %1070 = vst.msk [vmem:[#allocation3 + $0xe0] sm:$0xff] %vm1041_vm7, %v1002_v0  ;;  %v6561_v0 = vld [vmem:[#allocation6_spill] sm:$0xff] }
 0x1a9   :  { %1069 = vst.msk [vmem:[#allocation3 + $0xd8] sm:$0xff] %vm1041_vm7, %v1000_v63  ;;  %1254 = vrot.lane.b32.xlu0 %v3873_v61, %s3317_s28  ;;  %v166_v63 = vld [vmem:[%s6327_s0 + $0x148] sm:$0xff] }
 0x1aa   :  { %1252 = vrot.lane.b32.xlu1 %v3863_v48, %s3317_s28  ;;  %231 = vst.msk [vmem:[#allocation2 + $0x231] sm:$0xff] %vm15_vm0, %v166_v63  ;;  %v6568_v63 = vld [vmem:[#allocation13_spill] sm:$0xff] }
 0x1ab   :  { %v1006_v4 = vpop.permute.xlu0 %1005 }
 0x1ac   :  { %v1004_v2 = vpop.permute.xlu1 %1003  ;;  %1072 = vst.msk [vmem:[#allocation3 + $0xf0] sm:$0xff] %vm1041_vm7, %v1006_v4 }
 0x1ad   :  { %1071 = vst.msk [vmem:[#allocation3 + $0xe8] sm:$0xff] %vm1041_vm7, %v1004_v2  ;;  %1258 = vrot.lane.b32.xlu0 %v3877_v6, %s3317_s28  ;;  %v157_v6 = vld [vmem:[%s6327_s0 + $0x100] sm:$0xff] }
 0x1ae   :  { %1256 = vrot.lane.b32.xlu1 %v3875_v3, %s3317_s28  ;;  %222 = vst.msk [vmem:[#allocation2 + $0x1c9] sm:$0xff] %vm15_vm0, %v157_v6  ;;  %v6563_v6 = vld [vmem:[#allocation8_spill] sm:$0xff] }
 0x1af   :  { %v1080_v44 = vpop.permute.xlu0 %1079 }
 0x1b0   :  { %v1008_v35 = vpop.permute.xlu1 %1007  ;;  %1176 = vst.msk [vmem:[#allocation3] sm:$0xff] %vm1175_vm8, %v1080_v44  ;;  %v6562_v44 = vld [vmem:[#allocation7_spill] sm:$0xff] }
 0x1b1   :  { %1073 = vst.msk [vmem:[#allocation3 + $0xf8] sm:$0xff] %vm1041_vm7, %v1008_v35  ;;  %1262 = vrot.lane.b32.xlu0 %v3889_v9, %s3317_s28  ;;  %v4670_v9 = vld [vmem:[#allocation2 + $0x198] sm:$0xff]  ;;  %v4799_v20 = vld [vmem:[#allocation2 + $0x230] sm:$0xff] }
 0x1b2   :  { %1260 = vrot.lane.b32.xlu1 %v3885_v8, %s3317_s28  ;;  %v158_v8 = vld [vmem:[%s6327_s0 + $0x108] sm:$0xff]  ;;  %1674 = vst.msk [vmem:[#allocation3 + $0x158] sm:$0xff] %vm15_vm0, %v4799_v20 }
 0x1b3   :  { %v1084_v61 = vpop.permute.xlu0 %1083  ;;  %223 = vst.msk [vmem:[#allocation2 + $0x1d1] sm:$0xff] %vm15_vm0, %v158_v8  ;;  %v168_v8 = vld [vmem:[%s6327_s0 + $0x158] sm:$0xff] }
 0x1b4   :  { %v1082_v48 = vpop.permute.xlu1 %1081  ;;  %1178 = vst.msk [vmem:[#allocation3 + $0x10] sm:$0xff] %vm1175_vm8, %v1084_v61  ;;  %v4777_v61 = vld [vmem:[#allocation2 + $0x218] sm:$0xff] }
 0x1b5   :  { %1177 = vst.msk [vmem:[#allocation3 + $0x8] sm:$0xff] %vm1175_vm8, %v1082_v48  ;;  %1266 = vrot.lane.b32.xlu0 %v4352_v36, %s3317_s28  ;;  %v4709_v38 = vld [vmem:[#allocation2 + $0x1c8] sm:$0xff]  ;;  %v4775_v48 = vld [vmem:[#allocation2 + $0x210] sm:$0xff] }
 0x1b6   :  { %1264 = vrot.lane.b32.xlu1 %v3895_v10, %s3317_s28  ;;  %1665 = vst.msk [vmem:[#allocation3 + $0x110] sm:$0xff] %vm15_vm0, %v4709_v38  ;;  %1671 = vst.msk [vmem:[#allocation3 + $0x140] sm:$0xff] %vm15_vm0, %v4775_v48 }
 0x1b7   :  { %v1088_v10 = vpop.permute.xlu0 %1087  ;;  %1672 = vst.msk [vmem:[#allocation3 + $0x148] sm:$0xff] %vm15_vm0, %v4777_v61  ;;  %233 = vst.msk [vmem:[#allocation2 + $0x249] sm:$0xff] %vm15_vm0, %v168_v8 }
 0x1b8   :  { %v1086_v3 = vpop.permute.xlu1 %1085  ;;  %1180 = vst.msk [vmem:[#allocation3 + $0x20] sm:$0xff] %vm1175_vm8, %v1088_v10 }
 0x1b9   :  { %1179 = vst.msk [vmem:[#allocation3 + $0x18] sm:$0xff] %vm1175_vm8, %v1086_v3  ;;  %1270 = vrot.lane.b32.xlu0 %v4670_v9, %s3317_s28  ;;  %v167_v3 = vld [vmem:[%s6327_s0 + $0x150] sm:$0xff] }
 0x1ba   :  { %1268 = vrot.lane.b32.xlu1 %v4354_v23, %s3317_s28  ;;  %v4682_v23 = vld [vmem:[#allocation2 + $0x1b8] sm:$0xff]  ;;  %v4711_v39 = vld [vmem:[#allocation2 + $0x1d0] sm:$0xff]  ;;  %232 = vst.msk [vmem:[#allocation2 + $0x241] sm:$0xff] %vm15_vm0, %v167_v3 }
 0x1bb   :  { %v6404_v24 = vrot.slane %v4682_v23, 1  ;;  %1664 = vst.msk [vmem:[#allocation3 + $0x108] sm:$0xff] %vm15_vm0, %v4682_v23  ;;  %v1092_v27 = vpop.permute.xlu0 %1091  ;;  %1666 = vst.msk [vmem:[#allocation3 + $0x118] sm:$0xff] %vm15_vm0, %v4711_v39 }
 0x1bc   :  { %v1090_v36 = vpop.permute.xlu1 %1089  ;;  %1182 = vst.msk [vmem:[#allocation3 + $0x30] sm:$0xff] %vm1175_vm8, %v1092_v27  ;;  %v169_v27 = vld [vmem:[%s6327_s0 + $0x160] sm:$0xff] }
 0x1bd   :  { %1181 = vst.msk [vmem:[#allocation3 + $0x28] sm:$0xff] %vm1175_vm8, %v1090_v36  ;;  %v4704_v34 = vsel %vm388_vm2, %v1743_v47, %v6404_v24  ;;  %1345 = vrot.lane.b32.xlu0 %v3733_v55, %s3318_s10  ;;  %v162_v55 = vld [vmem:[%s6327_s0 + $0x128] sm:$0xff] }
 0x1be   :  { %1272 = vrot.lane.b32.xlu1 %v4674_v28, %s3317_s28  ;;  %227 = vst.msk [vmem:[#allocation2 + $0x201] sm:$0xff] %vm15_vm0, %v162_v55  ;;  %v4797_v47 = vld [vmem:[#allocation2 + $0x228] sm:$0xff]  ;;  %234 = vst.msk [vmem:[#allocation2 + $0x259] sm:$0xff] %vm15_vm0, %v169_v27  ;;  %v175_v27 = vld [vmem:[%s6327_s0 + $0x190] sm:$0xff] }
 0x1bf   :  { %v1096_v45 = vpop.permute.xlu0 %1095  ;;  %1673 = vst.msk [vmem:[#allocation3 + $0x150] sm:$0xff] %vm15_vm0, %v4797_v47  ;;  %240 = vst.msk [vmem:[#allocation2 + $0x2a1] sm:$0xff] %vm15_vm0, %v175_v27 }
 0x1c0   :  { %v1094_v30 = vpop.permute.xlu1 %1093  ;;  %1184 = vst.msk [vmem:[#allocation3 + $0x40] sm:$0xff] %vm1175_vm8, %v1096_v45 }
 0x1c1   :  { %1183 = vst.msk [vmem:[#allocation3 + $0x38] sm:$0xff] %vm1175_vm8, %v1094_v30  ;;  %1349 = vrot.lane.b32.xlu0 %v3781_v5, %s3318_s10  ;;  %v6565_v30 = vld [vmem:[#allocation10_spill] sm:$0xff]  ;;  %v4819_v49 = vld [vmem:[#allocation2 + $0x240] sm:$0xff] }
 0x1c2   :  { %1347 = vrot.lane.b32.xlu1 %v3746_v60, %s3318_s10  ;;  %v4731_v60 = vld [vmem:[#allocation2 + $0x1e0] sm:$0xff]  ;;  %1675 = vst.msk [vmem:[#allocation3 + $0x160] sm:$0xff] %vm15_vm0, %v4819_v49 }
 0x1c3   :  { %1667 = vst.msk [vmem:[#allocation3 + $0x120] sm:$0xff] %vm15_vm0, %v4731_v60  ;;  %v1100_v5 = vpop.permute.xlu0 %1099 }
 0x1c4   :  { %v1098_v46 = vpop.permute.xlu1 %1097  ;;  %1186 = vst.msk [vmem:[#allocation3 + $0x50] sm:$0xff] %vm1175_vm8, %v1100_v5  ;;  %v6567_v5 = vld [vmem:[#allocation12_spill] sm:$0xff] }
 0x1c5   :  { %1185 = vst.msk [vmem:[#allocation3 + $0x48] sm:$0xff] %vm1175_vm8, %v1098_v46  ;;  %1353 = vrot.lane.b32.xlu0 %v6560_v58, %s3318_s10  ;;  %v4763_v2 = vld [vmem:[#allocation2 + $0x200] sm:$0xff]  ;;  %v6566_v46 = vld [vmem:[#allocation11_spill] sm:$0xff] }
 0x1c6   :  { %1351 = vrot.lane.b32.xlu1 %v6559_v52, %s3318_s10  ;;  %1670 = vst.msk [vmem:[#allocation3 + $0x138] sm:$0xff] %vm15_vm0, %v4763_v2  ;;  %v172_v52 = vld [vmem:[%s6327_s0 + $0x178] sm:$0xff]  ;;  %v4851_v3 = vld [vmem:[#allocation2 + $0x260] sm:$0xff]  ;;  %v4917_v27 = vld [vmem:[#allocation2 + $0x2a8] sm:$0xff] }
 0x1c7   :  { %v1104_v4 = vpop.permute.xlu0 %1103  ;;  %237 = vst.msk [vmem:[#allocation2 + $0x279] sm:$0xff] %vm15_vm0, %v172_v52  ;;  %1678 = vst.msk [vmem:[#allocation3 + $0x178] sm:$0xff] %vm15_vm0, %v4851_v3 }
 0x1c8   :  { %v1102_v54 = vpop.permute.xlu1 %1101  ;;  %1188 = vst.msk [vmem:[#allocation3 + $0x60] sm:$0xff] %vm1175_vm8, %v1104_v4  ;;  %v173_v4 = vld [vmem:[%s6327_s0 + $0x180] sm:$0xff] }
 0x1c9   :  { %1187 = vst.msk [vmem:[#allocation3 + $0x58] sm:$0xff] %vm1175_vm8, %v1102_v54  ;;  %1357 = vrot.lane.b32.xlu0 %v6562_v44, %s3318_s10  ;;  %v4829_v54 = vld [vmem:[#allocation2 + $0x248] sm:$0xff]  ;;  %v6569_v44 = vld [vmem:[#allocation14_spill] sm:$0xff] }
 0x1ca   :  { %1355 = vrot.lane.b32.xlu1 %v6561_v0, %s3318_s10  ;;  %1676 = vst.msk [vmem:[#allocation3 + $0x168] sm:$0xff] %vm15_vm0, %v4829_v54  ;;  %v4841_v0 = vld [vmem:[#allocation2 + $0x258] sm:$0xff]  ;;  %238 = vst.msk [vmem:[#allocation2 + $0x289] sm:$0xff] %vm15_vm0, %v173_v4 }
 0x1cb   :  { %v1108_v10 = vpop.permute.xlu0 %1107  ;;  %1677 = vst.msk [vmem:[#allocation3 + $0x170] sm:$0xff] %vm15_vm0, %v4841_v0  ;;  %1684 = vst.msk [vmem:[#allocation3 + $0x1a8] sm:$0xff] %vm15_vm0, %v4917_v27 }
 0x1cc   :  { %v1106_v35 = vpop.permute.xlu1 %1105  ;;  %1190 = vst.msk [vmem:[#allocation3 + $0x70] sm:$0xff] %vm1175_vm8, %v1108_v10  ;;  %v6570_v10 = vld [vmem:[#allocation15_spill] sm:$0xff] }
 0x1cd   :  { %1189 = vst.msk [vmem:[#allocation3 + $0x68] sm:$0xff] %vm1175_vm8, %v1106_v35  ;;  %1361 = vrot.lane.b32.xlu0 %v6564_v21, %s3318_s10  ;;  %v174_v35 = vld [vmem:[%s6327_s0 + $0x188] sm:$0xff] }
 0x1ce   :  { %1359 = vrot.lane.b32.xlu1 %v6563_v6, %s3318_s10  ;;  %239 = vst.msk [vmem:[#allocation2 + $0x291] sm:$0xff] %vm15_vm0, %v174_v35  ;;  %v4865_v21 = vld [vmem:[#allocation2 + $0x278] sm:$0xff] }
 0x1cf   :  { %v1112_v55 = vpop.permute.xlu0 %1111  ;;  %1680 = vst.msk [vmem:[#allocation3 + $0x188] sm:$0xff] %vm15_vm0, %v4865_v21  ;;  %v6574_v35 = vld [vmem:[#allocation19_spill] sm:$0xff] }
 0x1d0   :  { %v1110_v36 = vpop.permute.xlu1 %1109  ;;  %1192 = vst.msk [vmem:[#allocation3 + $0x80] sm:$0xff] %vm1175_vm8, %v1112_v55 }
 0x1d1   :  { %1191 = vst.msk [vmem:[#allocation3 + $0x78] sm:$0xff] %vm1175_vm8, %v1110_v36  ;;  %1365 = vrot.lane.b32.xlu0 %v6566_v46, %s3318_s10  ;;  %v4863_v36 = vld [vmem:[#allocation2 + $0x270] sm:$0xff]  ;;  %v6572_v46 = vld [vmem:[#allocation17_spill] sm:$0xff] }
 0x1d2   :  { %1363 = vrot.lane.b32.xlu1 %v6565_v30, %s3318_s10  ;;  %v6571_v30 = vld [vmem:[#allocation16_spill] sm:$0xff]  ;;  %1679 = vst.msk [vmem:[#allocation3 + $0x180] sm:$0xff] %vm15_vm0, %v4863_v36  ;;  %v4885_v50 = vld [vmem:[#allocation2 + $0x288] sm:$0xff] }
 0x1d3   :  { %v1116_v58 = vpop.permute.xlu0 %1115  ;;  %1681 = vst.msk [vmem:[#allocation3 + $0x190] sm:$0xff] %vm15_vm0, %v4885_v50 }
 0x1d4   :  { %v1114_v45 = vpop.permute.xlu1 %1113  ;;  %1194 = vst.msk [vmem:[#allocation3 + $0x90] sm:$0xff] %vm1175_vm8, %v1116_v58  ;;  %v6573_v58 = vld [vmem:[#allocation18_spill] sm:$0xff] }
 0x1d5   :  { %1193 = vst.msk [vmem:[#allocation3 + $0x88] sm:$0xff] %vm1175_vm8, %v1114_v45  ;;  %1369 = vrot.lane.b32.xlu0 %v6568_v63, %s3318_s10  ;;  %v4887_v52 = vld [vmem:[#allocation2 + $0x290] sm:$0xff] }
 0x1d6   :  { %1367 = vrot.lane.b32.xlu1 %v6567_v5, %s3318_s10  ;;  %v177_v5 = vld [vmem:[%s6327_s0 + $0x1a0] sm:$0xff]  ;;  %1682 = vst.msk [vmem:[#allocation3 + $0x198] sm:$0xff] %vm15_vm0, %v4887_v52 }
 0x1d7   :  { %v1120_v6 = vpop.permute.xlu0 %1119  ;;  %242 = vst.msk [vmem:[#allocation2 + $0x2b9] sm:$0xff] %vm15_vm0, %v177_v5  ;;  %v182_v5 = vld [vmem:[%s6327_s0 + $0x1c8] sm:$0xff] }
 0x1d8   :  { %v1118_v62 = vpop.permute.xlu1 %1117  ;;  %1196 = vst.msk [vmem:[#allocation3 + $0xa0] sm:$0xff] %vm1175_vm8, %v1120_v6  ;;  %v179_v6 = vld [vmem:[%s6327_s0 + $0x1b0] sm:$0xff] }
 0x1d9   :  { %1195 = vst.msk [vmem:[#allocation3 + $0x98] sm:$0xff] %vm1175_vm8, %v1118_v62  ;;  %1373 = vrot.lane.b32.xlu0 %v6570_v10, %s3318_s10  ;;  %v178_v62 = vld [vmem:[%s6327_s0 + $0x1a8] sm:$0xff]  ;;  %v6575_v10 = vld [vmem:[#allocation20_spill] sm:$0xff] }
 0x1da   :  { %1371 = vrot.lane.b32.xlu1 %v6569_v44, %s3318_s10  ;;  %243 = vst.msk [vmem:[#allocation2 + $0x2c1] sm:$0xff] %vm15_vm0, %v178_v62  ;;  %v4907_v44 = vld [vmem:[#allocation2 + $0x2a0] sm:$0xff]  ;;  %244 = vst.msk [vmem:[#allocation2 + $0x2d1] sm:$0xff] %vm15_vm0, %v179_v6 }
 0x1db   :  { %v1124_v55 = vpop.permute.xlu0 %1123  ;;  %1683 = vst.msk [vmem:[#allocation3 + $0x1a0] sm:$0xff] %vm15_vm0, %v4907_v44  ;;  %247 = vst.msk [vmem:[#allocation2 + $0x2f1] sm:$0xff] %vm15_vm0, %v182_v5  ;;  %v6581_v5 = vld [vmem:[#allocation25_spill] sm:$0xff] }
 0x1dc   :  { %v1122_v8 = vpop.permute.xlu1 %1121  ;;  %1198 = vst.msk [vmem:[#allocation3 + $0xb0] sm:$0xff] %vm1175_vm8, %v1124_v55  ;;  %v6576_v55 = vld [vmem:[#allocation21_spill] sm:$0xff] }
 0x1dd   :  { %1197 = vst.msk [vmem:[#allocation3 + $0xa8] sm:$0xff] %vm1175_vm8, %v1122_v8  ;;  %1377 = vrot.lane.b32.xlu0 %v6572_v46, %s3318_s10  ;;  %v180_v8 = vld [vmem:[%s6327_s0 + $0x1b8] sm:$0xff]  ;;  %v181_v46 = vld [vmem:[%s6327_s0 + $0x1c0] sm:$0xff] }
 0x1de   :  { %1375 = vrot.lane.b32.xlu1 %v6571_v30, %s3318_s10  ;;  %245 = vst.msk [vmem:[#allocation2 + $0x2d9] sm:$0xff] %vm15_vm0, %v180_v8  ;;  %246 = vst.msk [vmem:[#allocation2 + $0x2e9] sm:$0xff] %vm15_vm0, %v181_v46 }
 0x1df   :  { %v1128_v63 = vpop.permute.xlu0 %1127 }
 0x1e0   :  { %v1126_v45 = vpop.permute.xlu1 %1125  ;;  %1200 = vst.msk [vmem:[#allocation3 + $0xc0] sm:$0xff] %vm1175_vm8, %v1128_v63 }
 0x1e1   :  { %1199 = vst.msk [vmem:[#allocation3 + $0xb8] sm:$0xff] %vm1175_vm8, %v1126_v45  ;;  %1381 = vrot.lane.b32.xlu0 %v6574_v35, %s3318_s10  ;;  %v4929_v45 = vld [vmem:[#allocation2 + $0x2b8] sm:$0xff]  ;;  %v4939_v62 = vld [vmem:[#allocation2 + $0x2c0] sm:$0xff]  ;;  %v4951_v6 = vld [vmem:[#allocation2 + $0x2d0] sm:$0xff] }
 0x1e2   :  { %1379 = vrot.lane.b32.xlu1 %v6573_v58, %s3318_s10  ;;  %v6577_v58 = vld [vmem:[#allocation22_spill] sm:$0xff]  ;;  %1685 = vst.msk [vmem:[#allocation3 + $0x1b0] sm:$0xff] %vm15_vm0, %v4929_v45  ;;  %1686 = vst.msk [vmem:[#allocation3 + $0x1b8] sm:$0xff] %vm15_vm0, %v4939_v62  ;;  %v6578_v35 = vld [vmem:[#allocation23_spill] sm:$0xff] }
 0x1e3   :  { %v1132_v30 = vpop.permute.xlu0 %1131  ;;  %1687 = vst.msk [vmem:[#allocation3 + $0x1c0] sm:$0xff] %vm15_vm0, %v4951_v6 }
 0x1e4   :  { %v1130_v4 = vpop.permute.xlu1 %1129  ;;  %1202 = vst.msk [vmem:[#allocation3 + $0xd0] sm:$0xff] %vm1175_vm8, %v1132_v30  ;;  %v6580_v30 = vld [vmem:[#allocation24_spill] sm:$0xff] }
 0x1e5   :  { %1201 = vst.msk [vmem:[#allocation3 + $0xc8] sm:$0xff] %vm1175_vm8, %v1130_v4  ;;  %1385 = vrot.lane.b32.xlu0 %v6576_v55, %s3318_s10  ;;  %v4953_v8 = vld [vmem:[#allocation2 + $0x2d8] sm:$0xff] }
 0x1e6   :  { %1383 = vrot.lane.b32.xlu1 %v6575_v10, %s3318_s10  ;;  %6579 = vst [vmem:[#allocation27_spill] sm:$0xff] %v4953_v8  ;;  %v183_v10 = vld [vmem:[%s6327_s0 + $0x1d0] sm:$0xff]  ;;  %1688 = vst.msk [vmem:[#allocation3 + $0x1c8] sm:$0xff] %vm15_vm0, %v4953_v8 }
 0x1e7   :  { %v1136_v63 = vpop.permute.xlu0 %1135  ;;  %248 = vst.msk [vmem:[#allocation2 + $0x301] sm:$0xff] %vm15_vm0, %v183_v10  ;;  %v186_v10 = vld [vmem:[%s6327_s0 + $0x1e8] sm:$0xff] }
 0x1e8   :  { %v1134_v41 = vpop.permute.xlu1 %1133  ;;  %1204 = vst.msk [vmem:[#allocation3 + $0xe0] sm:$0xff] %vm1175_vm8, %v1136_v63  ;;  %v4975_v63 = vld [vmem:[#allocation2 + $0x2f0] sm:$0xff] }
 0x1e9   :  { %1203 = vst.msk [vmem:[#allocation3 + $0xd8] sm:$0xff] %vm1175_vm8, %v1134_v41  ;;  %1389 = vrot.lane.b32.xlu0 %v6578_v35, %s3318_s10  ;;  %v184_v41 = vld [vmem:[%s6327_s0 + $0x1d8] sm:$0xff]  ;;  %v6582_v35 = vld [vmem:[#allocation26_spill] sm:$0xff] }
 0x1ea   :  { %1387 = vrot.lane.b32.xlu1 %v6577_v58, %s3318_s10  ;;  %249 = vst.msk [vmem:[#allocation2 + $0x309] sm:$0xff] %vm15_vm0, %v184_v41  ;;  %v4973_v58 = vld [vmem:[#allocation2 + $0x2e8] sm:$0xff]  ;;  %1690 = vst.msk [vmem:[#allocation3 + $0x1d8] sm:$0xff] %vm15_vm0, %v4975_v63 }
 0x1eb   :  { %v1140_v55 = vpop.permute.xlu0 %1139  ;;  %1689 = vst.msk [vmem:[#allocation3 + $0x1d0] sm:$0xff] %vm15_vm0, %v4973_v58  ;;  %251 = vst.msk [vmem:[#allocation2 + $0x321] sm:$0xff] %vm15_vm0, %v186_v10 }
 0x1ec   :  { %v1138_v4 = vpop.permute.xlu1 %1137  ;;  %1206 = vst.msk [vmem:[#allocation3 + $0xf0] sm:$0xff] %vm1175_vm8, %v1140_v55  ;;  %v4992_v55 = vld [vmem:[#allocation2 + $0x1a8] sm:$0x3] }
 0x1ed   :  { %1205 = vst.msk [vmem:[#allocation3 + $0xe8] sm:$0xff] %vm1175_vm8, %v1138_v4  ;;  %1393 = vrot.lane.b32.xlu0 %v6581_v5, %s3318_s10  ;;  %v185_v4 = vld [vmem:[%s6327_s0 + $0x1e0] sm:$0xff]  ;;  %v1340_v5 = vrot.slane %v4670_v9, 1 }
 0x1ee   :  { %1391 = vrot.lane.b32.xlu1 %v6580_v30, %s3318_s10  ;;  %250 = vst.msk [vmem:[#allocation2 + $0x319] sm:$0xff] %vm15_vm0, %v185_v4 }
 0x1ef   :  { %v1211_v30 = vpop.permute.xlu0 %1210 }
 0x1f0   :  { %v1142_v46 = vpop.permute.xlu1 %1141  ;;  %1307 = vst.msk [vmem:[#allocation3] sm:$0xff] %vm1306_vm9, %v1211_v30  ;;  %v1343_v30 = vrot.slane %v4992_v55, 1 }
 0x1f1   :  { %1207 = vst.msk [vmem:[#allocation3 + $0xf8] sm:$0xff] %vm1175_vm8, %v1142_v46  ;;  %1397 = vrot.lane.b32.xlu0 %v4045_v19, %s3318_s10  ;;  %v4997_v46 = vld [vmem:[#allocation2 + $0x300] sm:$0xff]  ;;  %v5003_v4 = vld [vmem:[#allocation2 + $0x308] sm:$0xff] }
 0x1f2   :  { %1395 = vrot.lane.b32.xlu1 %v6582_v35, %s3318_s10  ;;  %6583 = vst [vmem:[#allocation28_spill] sm:$0xff] %v4997_v46  ;;  %v1341_v35 = vrot.slane %v4674_v28, 1  ;;  %6584 = vst [vmem:[#allocation29_spill] sm:$0xff] %v5003_v4 }
 0x1f3   :  { %1691 = vst.msk [vmem:[#allocation3 + $0x1e0] sm:$0xff] %vm15_vm0, %v4997_v46  ;;  %v1215_v10 = vpop.permute.xlu0 %1214  ;;  %1692 = vst.msk [vmem:[#allocation3 + $0x1e8] sm:$0xff] %vm15_vm0, %v5003_v4 }
 0x1f4   :  { %v1213_v41 = vpop.permute.xlu1 %1212  ;;  %1309 = vst.msk [vmem:[#allocation3 + $0x10] sm:$0xff] %vm1306_vm9, %v1215_v10  ;;  %v1344_v10 = vsel %vm388_vm2, %v1341_v35, %v1343_v30 }
 0x1f5   :  { %1308 = vst.msk [vmem:[#allocation3 + $0x8] sm:$0xff] %vm1306_vm9, %v1213_v41  ;;  %1401 = vrot.lane.b32.xlu0 %v4458_v13, %s3318_s10  ;;  %v1342_v41 = vsel %vm388_vm2, %v1340_v5, %v1341_v35  ;;  %v5019_v24 = vld [vmem:[#allocation2 + $0x320] sm:$0xff]  ;;  %v1951_v5 = vrot.slane %v4680_v56, 2 }
 0x1f6   :  { %1399 = vrot.lane.b32.xlu1 %v6547_v11, %s3318_s10  ;;  %v5014_v11 = vld [vmem:[#allocation2 + $0x318] sm:$0xff]  ;;  %1694 = vst.msk [vmem:[#allocation3 + $0x1f8] sm:$0xff] %vm15_vm0, %v5019_v24 }
 0x1f7   :  { %6585 = vst [vmem:[#allocation30_spill] sm:$0xff] %v5014_v11  ;;  %1693 = vst.msk [vmem:[#allocation3 + $0x1f0] sm:$0xff] %vm15_vm0, %v5014_v11  ;;  %v1219_v4 = vpop.permute.xlu0 %1218 }
 0x1f8   :  { %v1217_v19 = vpop.permute.xlu1 %1216  ;;  %1311 = vst.msk [vmem:[#allocation3 + $0x20] sm:$0xff] %vm1306_vm9, %v1219_v4 }
 0x1f9   :  { %1310 = vst.msk [vmem:[#allocation3 + $0x18] sm:$0xff] %vm1306_vm9, %v1217_v19  ;;  %1405 = vrot.lane.b32.xlu0 %v1342_v41, %s3318_s10  ;;  %v1952_v19 = vrot.slane %v4682_v23, 2 }
 0x1fa   :  { %1403 = vrot.lane.b32.xlu1 %v4461_v22, %s3318_s10  ;;  %v5030_v22 = vld [vmem:[#allocation2 + $0x1c0] sm:$0x3] }
 0x1fb   :  { %v1223_v11 = vpop.permute.xlu0 %1222  ;;  %v1954_v35 = vrot.slane %v5030_v22, 2  ;;  %v5037_v4 = vsel %vm598_vm3, %v1951_v5, %v1952_v19 }
 0x1fc   :  { %v1221_v13 = vpop.permute.xlu1 %1220  ;;  %1313 = vst.msk [vmem:[#allocation3 + $0x30] sm:$0xff] %vm1306_vm9, %v1223_v11 }
 0x1fd   :  { %1312 = vst.msk [vmem:[#allocation3 + $0x28] sm:$0xff] %vm1306_vm9, %v1221_v13  ;;  %1479 = vrot.lane.b32.xlu0 %v4078_v33, %s3319_s29  ;;  %v5043_v41 = vsel %vm598_vm3, %v1952_v19, %v1954_v35 }
 0x1fe   :  { %1407 = vrot.lane.b32.xlu1 %v1344_v10, %s3318_s10 }
 0x1ff   :  { %v1227_v56 = vpop.permute.xlu0 %1226 }
 0x200   :  { %v1225_v30 = vpop.permute.xlu1 %1224  ;;  %1315 = vst.msk [vmem:[#allocation3 + $0x40] sm:$0xff] %vm1306_vm9, %v1227_v56 }
 0x201   :  { %1314 = vst.msk [vmem:[#allocation3 + $0x38] sm:$0xff] %vm1306_vm9, %v1225_v30  ;;  %1483 = vrot.lane.b32.xlu0 %v4091_v37, %s3319_s29 }
 0x202   :  { %1481 = vrot.lane.b32.xlu1 %v4083_v31, %s3319_s29 }
 0x203   :  { %v1231_v10 = vpop.permute.xlu0 %1230 }
 0x204   :  { %v1229_v11 = vpop.permute.xlu1 %1228  ;;  %1317 = vst.msk [vmem:[#allocation3 + $0x50] sm:$0xff] %vm1306_vm9, %v1231_v10 }
 0x205   :  { %1316 = vst.msk [vmem:[#allocation3 + $0x48] sm:$0xff] %vm1306_vm9, %v1229_v11  ;;  %1487 = vrot.lane.b32.xlu0 %v4104_v51, %s3319_s29  ;;  %v6586_v51 = vld [vmem:[#allocation31_spill] sm:$0xff] }
 0x206   :  { %1485 = vrot.lane.b32.xlu1 %v6548_v25, %s3319_s29 }
 0x207   :  { %v1235_v31 = vpop.permute.xlu0 %1234 }
 0x208   :  { %v1233_v33 = vpop.permute.xlu1 %1232  ;;  %1319 = vst.msk [vmem:[#allocation3 + $0x60] sm:$0xff] %vm1306_vm9, %v1235_v31 }
 0x209   :  { %1318 = vst.msk [vmem:[#allocation3 + $0x58] sm:$0xff] %vm1306_vm9, %v1233_v33  ;;  %1491 = vrot.lane.b32.xlu0 %v4117_v1, %s3319_s29  ;;  %v6587_v1 = vld [vmem:[#allocation32_spill] sm:$0xff] }
 0x20a   :  { %1489 = vrot.lane.b32.xlu1 %v6549_v17, %s3319_s29 }
 0x20b   :  { %v1239_v37 = vpop.permute.xlu0 %1238 }
 0x20c   :  { %v1237_v13 = vpop.permute.xlu1 %1236  ;;  %1321 = vst.msk [vmem:[#allocation3 + $0x70] sm:$0xff] %vm1306_vm9, %v1239_v37 }
 0x20d   :  { %1320 = vst.msk [vmem:[#allocation3 + $0x68] sm:$0xff] %vm1306_vm9, %v1237_v13  ;;  %1495 = vrot.lane.b32.xlu0 %v4130_v16, %s3319_s29  ;;  %v6588_v16 = vld [vmem:[#allocation33_spill] sm:$0xff]  ;;  %v6592_v13 = vld [vmem:[#allocation38_spill] sm:$0xff] }
 0x20e   :  { %1493 = vrot.lane.b32.xlu1 %v6550_v42, %s3319_s29 }
 0x20f   :  { %v1243_v17 = vpop.permute.xlu0 %1242 }
 0x210   :  { %v1241_v25 = vpop.permute.xlu1 %1240  ;;  %1323 = vst.msk [vmem:[#allocation3 + $0x80] sm:$0xff] %vm1306_vm9, %v1243_v17 }
 0x211   :  { %1322 = vst.msk [vmem:[#allocation3 + $0x78] sm:$0xff] %vm1306_vm9, %v1241_v25  ;;  %1499 = vrot.lane.b32.xlu0 %v4143_v32, %s3319_s29  ;;  %v6589_v32 = vld [vmem:[#allocation34_spill] sm:$0xff] }
 0x212   :  { %1497 = vrot.lane.b32.xlu1 %v6586_v51, %s3319_s29 }
 0x213   :  { %v1247_v42 = vpop.permute.xlu0 %1246 }
 0x214   :  { %v1245_v5 = vpop.permute.xlu1 %1244  ;;  %1325 = vst.msk [vmem:[#allocation3 + $0x90] sm:$0xff] %vm1306_vm9, %v1247_v42 }
 0x215   :  { %1324 = vst.msk [vmem:[#allocation3 + $0x88] sm:$0xff] %vm1306_vm9, %v1245_v5  ;;  %1503 = vrot.lane.b32.xlu0 %v4156_v7, %s3319_s29  ;;  %v6590_v7 = vld [vmem:[#allocation35_spill] sm:$0xff]  ;;  %v6595_v5 = vld [vmem:[#allocation41_spill] sm:$0xff] }
 0x216   :  { %1501 = vrot.lane.b32.xlu1 %v6587_v1, %s3319_s29 }
 0x217   :  { %v1251_v35 = vpop.permute.xlu0 %1250 }
 0x218   :  { %v1249_v19 = vpop.permute.xlu1 %1248  ;;  %1327 = vst.msk [vmem:[#allocation3 + $0xa0] sm:$0xff] %vm1306_vm9, %v1251_v35  ;;  %v1477_v35 = vrot.slane %v4992_v55, 2 }
 0x219   :  { %1326 = vst.msk [vmem:[#allocation3 + $0x98] sm:$0xff] %vm1306_vm9, %v1249_v19  ;;  %1507 = vrot.lane.b32.xlu0 %v4169_v18, %s3319_s29  ;;  %v1474_v19 = vrot.slane %v4670_v9, 2 }
 0x21a   :  { %1505 = vrot.lane.b32.xlu1 %v6588_v16, %s3319_s29  ;;  %v1475_v16 = vrot.slane %v4674_v28, 2 }
 0x21b   :  { %v1255_v56 = vpop.permute.xlu0 %1254 }
 0x21c   :  { %v1253_v30 = vpop.permute.xlu1 %1252  ;;  %1329 = vst.msk [vmem:[#allocation3 + $0xb0] sm:$0xff] %vm1306_vm9, %v1255_v56  ;;  %v1478_v28 = vsel %vm598_vm3, %v1475_v16, %v1477_v35  ;;  %v1764_v35 = vrot.slane %v4777_v61, 1 }
 0x21d   :  { %1328 = vst.msk [vmem:[#allocation3 + $0xa8] sm:$0xff] %vm1306_vm9, %v1253_v30  ;;  %1511 = vrot.lane.b32.xlu0 %v4182_v43, %s3319_s29  ;;  %v6591_v43 = vld [vmem:[#allocation37_spill] sm:$0xff] }
 0x21e   :  { %1509 = vrot.lane.b32.xlu1 %v6589_v32, %s3319_s29  ;;  %v5138_v32 = vld [vmem:[#allocation2 + $0x1d8] sm:$0x3] }
 0x21f   :  { %v1259_v10 = vpop.permute.xlu0 %1258 }
 0x220   :  { %v1257_v11 = vpop.permute.xlu1 %1256  ;;  %1331 = vst.msk [vmem:[#allocation3 + $0xc0] sm:$0xff] %vm1306_vm9, %v1259_v10 }
 0x221   :  { %1330 = vst.msk [vmem:[#allocation3 + $0xb8] sm:$0xff] %vm1306_vm9, %v1257_v11  ;;  %1515 = vrot.lane.b32.xlu0 %v4195_v15, %s3319_s29  ;;  %v6593_v15 = vld [vmem:[#allocation39_spill] sm:$0xff]  ;;  %v6596_v11 = vrot.slane %v4682_v23, 1  ;;  %v1753_v23 = vrot.slane %v4731_v60, 1 }
 0x222   :  { %1513 = vrot.lane.b32.xlu1 %v6590_v7, %s3319_s29  ;;  %v1751_v7 = vrot.slane %v5138_v32, 1 }
 0x223   :  { %v1263_v18 = vpop.permute.xlu0 %1262 }
 0x224   :  { %v1261_v33 = vpop.permute.xlu1 %1260  ;;  %1333 = vst.msk [vmem:[#allocation3 + $0xd0] sm:$0xff] %vm1306_vm9, %v1263_v18 }
 0x225   :  { %1332 = vst.msk [vmem:[#allocation3 + $0xc8] sm:$0xff] %vm1306_vm9, %v1261_v33  ;;  %1519 = vrot.lane.b32.xlu0 %v6591_v43, %s3319_s29  ;;  %v5150_v33 = vld [vmem:[#allocation2 + $0x1f0] sm:$0x3] }
 0x226   :  { %1517 = vrot.lane.b32.xlu1 %v6556_v40, %s3319_s29  ;;  %v6594_v40 = vld [vmem:[#allocation40_spill] sm:$0xff] }
 0x227   :  { %v1267_v37 = vpop.permute.xlu0 %1266 }
 0x228   :  { %v1265_v31 = vpop.permute.xlu1 %1264  ;;  %1335 = vst.msk [vmem:[#allocation3 + $0xe0] sm:$0xff] %vm1306_vm9, %v1267_v37  ;;  %v1756_v37 = vrot.slane %v5150_v33, 1 }
 0x229   :  { %1334 = vst.msk [vmem:[#allocation3 + $0xd8] sm:$0xff] %vm1306_vm9, %v1265_v31  ;;  %1523 = vrot.lane.b32.xlu0 %v6593_v15, %s3319_s29  ;;  %v1754_v31 = vrot.slane %v4741_v53, 1  ;;  %v5166_v15 = vld [vmem:[#allocation2 + $0x208] sm:$0x3] }
 0x22a   :  { %1521 = vrot.lane.b32.xlu1 %v6592_v13, %s3319_s29 }
 0x22b   :  { %v1271_v51 = vpop.permute.xlu0 %1270 }
 0x22c   :  { %v1269_v25 = vpop.permute.xlu1 %1268  ;;  %1337 = vst.msk [vmem:[#allocation3 + $0xf0] sm:$0xff] %vm1306_vm9, %v1271_v51  ;;  %v1759_v51 = vrot.slane %v4763_v2, 1 }
 0x22d   :  { %1336 = vst.msk [vmem:[#allocation3 + $0xe8] sm:$0xff] %vm1306_vm9, %v1269_v25  ;;  %1527 = vrot.lane.b32.xlu0 %v4236_v26, %s3319_s29 }
 0x22e   :  { %1525 = vrot.lane.b32.xlu1 %v6594_v40, %s3319_s29  ;;  %v1758_v40 = vrot.slane %v4753_v59, 1 }
 0x22f   :  { %v1346_v1 = vpop.permute.xlu0 %1345 }
 0x230   :  { %v1273_v17 = vpop.permute.xlu1 %1272  ;;  %1442 = vst.msk [vmem:[#allocation3] sm:$0xff] %vm1441_vm10, %v1346_v1  ;;  %v1761_v1 = vrot.slane %v5166_v15, 1 }
 0x231   :  { %1338 = vst.msk [vmem:[#allocation3 + $0xf8] sm:$0xff] %vm1306_vm9, %v1273_v17  ;;  %1531 = vrot.lane.b32.xlu0 %v4251_v57, %s3319_s29  ;;  %v1476_v57 = vsel %vm598_vm3, %v1474_v19, %v1475_v16  ;;  %v5183_v19 = vld [vmem:[#allocation2 + $0x220] sm:$0x3]  ;;  %v5191_v16 = vsel %vm388_vm2, %v1758_v40, %v1759_v51 }
 0x232   :  { %1529 = vrot.lane.b32.xlu1 %v6595_v5, %s3319_s29  ;;  %v5179_v5 = vsel %vm388_vm2, %v1754_v31, %v1756_v37  ;;  %6598 = vst [vmem:[#allocation4_spill] sm:$0xff] %v5191_v16 }
 0x233   :  { %v1350_v26 = vpop.permute.xlu0 %1349  ;;  %6597 = vst [vmem:[#allocation36_spill] sm:$0xff] %v5179_v5 }
 0x234   :  { %v1348_v42 = vpop.permute.xlu1 %1347  ;;  %1444 = vst.msk [vmem:[#allocation3 + $0x10] sm:$0xff] %vm1441_vm10, %v1350_v26  ;;  %v1763_v26 = vrot.slane %v4775_v48, 1 }
 0x235   :  { %1443 = vst.msk [vmem:[#allocation3 + $0x8] sm:$0xff] %vm1441_vm10, %v1348_v42  ;;  %1535 = vrot.lane.b32.xlu0 %v4563_v12, %s3319_s29  ;;  %v1749_v12 = vrot.slane %v4711_v39, 1 }
 0x236   :  { %1533 = vrot.lane.b32.xlu1 %v4254_v14, %s3319_s29  ;;  %v1746_v14 = vrot.slane %v5030_v22, 1 }
 0x237   :  { %v1354_v9 = vpop.permute.xlu0 %1353  ;;  %v5162_v13 = vsel %vm388_vm2, %v1749_v12, %v1751_v7 }
 0x238   :  { %v1352_v30 = vpop.permute.xlu1 %1351  ;;  %1446 = vst.msk [vmem:[#allocation3 + $0x20] sm:$0xff] %vm1441_vm10, %v1354_v9  ;;  %v1747_v22 = vsel %vm388_vm2, %v6596_v11, %v1746_v14  ;;  %v1766_v9 = vrot.slane %v5183_v19, 1  ;;  %v5200_v14 = vld [vmem:[#allocation2 + $0x238] sm:$0x3] }
 0x239   :  { %1445 = vst.msk [vmem:[#allocation3 + $0x18] sm:$0xff] %vm1441_vm10, %v1352_v30  ;;  %1539 = vrot.lane.b32.xlu0 %v1476_v57, %s3319_s29  ;;  %v5196_v57 = vsel %vm388_vm2, %v1759_v51, %v1761_v1 }
 0x23a   :  { %1537 = vrot.lane.b32.xlu1 %v4566_v29, %s3319_s29  ;;  %v1748_v29 = vrot.slane %v4709_v38, 1  ;;  %6599 = vst [vmem:[#allocation5_spill] sm:$0xff] %v5196_v57  ;;  %v5213_v11 = vsel %vm388_vm2, %v1764_v35, %v1766_v9 }
 0x23b   :  { %v1358_v56 = vpop.permute.xlu0 %1357  ;;  %6601 = vst [vmem:[#allocation7_spill] sm:$0xff] %v5213_v11 }
 0x23c   :  { %v1356_v55 = vpop.permute.xlu1 %1355  ;;  %1448 = vst.msk [vmem:[#allocation3 + $0x30] sm:$0xff] %vm1441_vm10, %v1358_v56  ;;  %v5157_v18 = vsel %vm388_vm2, %v1748_v29, %v1749_v12  ;;  %v1768_v29 = vrot.slane %v4797_v47, 1  ;;  %v1769_v12 = vrot.slane %v4799_v20, 1 }
 0x23d   :  { %1447 = vst.msk [vmem:[#allocation3 + $0x28] sm:$0xff] %vm1441_vm10, %v1356_v55  ;;  %1823 = vrot.lane.b32.xlu0 %v4704_v34, %s3312_s27  ;;  %v5174_v34 = vsel %vm388_vm2, %v1753_v23, %v1754_v31  ;;  %v5208_v55 = vsel %vm388_vm2, %v1763_v26, %v1764_v35  ;;  %v1773_v31 = vrot.slane %v4819_v49, 1  ;;  %v1779_v26 = vrot.slane %v4851_v3, 1 }
 0x23e   :  { %1541 = vrot.lane.b32.xlu1 %v1478_v28, %s3319_s29  ;;  %6600 = vst [vmem:[#allocation6_spill] sm:$0xff] %v5208_v55  ;;  %v5225_v23 = vsel %vm388_vm2, %v1768_v29, %v1769_v12  ;;  %v5251_v29 = vld [vmem:[#allocation2 + $0x280] sm:$0x3] }
 0x23f   :  { %v1362_v43 = vpop.permute.xlu0 %1361  ;;  %6602 = vst [vmem:[#allocation8_spill] sm:$0xff] %v5225_v23 }
 0x240   :  { %v1360_v10 = vpop.permute.xlu1 %1359  ;;  %1450 = vst.msk [vmem:[#allocation3 + $0x40] sm:$0xff] %vm1441_vm10, %v1362_v43  ;;  %v1774_v43 = vrot.slane %v4829_v54, 1 }
 0x241   :  { %1449 = vst.msk [vmem:[#allocation3 + $0x38] sm:$0xff] %vm1441_vm10, %v1360_v10  ;;  %1827 = vrot.lane.b32.xlu0 %v5157_v18, %s3312_s27  ;;  %v5217_v10 = vld [vmem:[#allocation2 + $0x250] sm:$0x3] }
 0x242   :  { %1825 = vrot.lane.b32.xlu1 %v1747_v22, %s3312_s27  ;;  %v1771_v22 = vrot.slane %v5200_v14, 1  ;;  %v1776_v40 = vrot.slane %v5217_v10, 1  ;;  %v5242_v1 = vsel %vm388_vm2, %v1773_v31, %v1774_v43 }
 0x243   :  { %v1366_v17 = vpop.permute.xlu0 %1365  ;;  %6604 = vst [vmem:[#allocation10_spill] sm:$0xff] %v5242_v1 }
 0x244   :  { %v1364_v25 = vpop.permute.xlu1 %1363  ;;  %1452 = vst.msk [vmem:[#allocation3 + $0x50] sm:$0xff] %vm1441_vm10, %v1366_v17  ;;  %v5234_v17 = vld [vmem:[#allocation2 + $0x268] sm:$0x3] }
 0x245   :  { %1451 = vst.msk [vmem:[#allocation3 + $0x48] sm:$0xff] %vm1441_vm10, %v1364_v25  ;;  %1831 = vrot.lane.b32.xlu0 %v5174_v34, %s3312_s27  ;;  %v5230_v25 = vsel %vm388_vm2, %v1769_v12, %v1771_v22  ;;  %v1781_v9 = vrot.slane %v5234_v17, 1  ;;  %v1784_v22 = vrot.slane %v4865_v21, 1 }
 0x246   :  { %1829 = vrot.lane.b32.xlu1 %v5162_v13, %s3312_s27  ;;  %6603 = vst [vmem:[#allocation9_spill] sm:$0xff] %v5230_v25 }
 0x247   :  { %v1370_v30 = vpop.permute.xlu0 %1369  ;;  %v5264_v31 = vsel %vm388_vm2, %v1779_v26, %v1781_v9 }
 0x248   :  { %v1368_v42 = vpop.permute.xlu1 %1367  ;;  %1454 = vst.msk [vmem:[#allocation3 + $0x60] sm:$0xff] %vm1441_vm10, %v1370_v30  ;;  %v5247_v30 = vsel %vm388_vm2, %v1774_v43, %v1776_v40  ;;  %6607 = vst [vmem:[#allocation13_spill] sm:$0xff] %v5264_v31  ;;  %v1786_v43 = vrot.slane %v5251_v29, 1  ;;  %v5268_v40 = vld [vmem:[#allocation2 + $0x298] sm:$0x3] }
 0x249   :  { %1453 = vst.msk [vmem:[#allocation3 + $0x58] sm:$0xff] %vm1441_vm10, %v1368_v42  ;;  %1835 = vrot.lane.b32.xlu0 %v5191_v16, %s3312_s27  ;;  %v1778_v42 = vrot.slane %v4841_v0, 1  ;;  %6605 = vst [vmem:[#allocation11_spill] sm:$0xff] %v5247_v30 }
 0x24a   :  { %1833 = vrot.lane.b32.xlu1 %v5179_v5, %s3312_s27  ;;  %v5281_v9 = vsel %vm388_vm2, %v1784_v22, %v1786_v43  ;;  %v1794_v43 = vrot.slane %v4917_v27, 1 }
 0x24b   :  { %v1374_v56 = vpop.permute.xlu0 %1373  ;;  %v5259_v12 = vsel %vm388_vm2, %v1778_v42, %v1779_v26  ;;  %v1788_v42 = vrot.slane %v4885_v50, 1  ;;  %v1789_v26 = vrot.slane %v4887_v52, 1  ;;  %6609 = vst [vmem:[#allocation15_spill] sm:$0xff] %v5281_v9 }
 0x24c   :  { %v1372_v28 = vpop.permute.xlu1 %1371  ;;  %1456 = vst.msk [vmem:[#allocation3 + $0x70] sm:$0xff] %vm1441_vm10, %v1374_v56  ;;  %6606 = vst [vmem:[#allocation12_spill] sm:$0xff] %v5259_v12  ;;  %v1783_v56 = vrot.slane %v4863_v36, 1 }
 0x24d   :  { %1455 = vst.msk [vmem:[#allocation3 + $0x68] sm:$0xff] %vm1441_vm10, %v1372_v28  ;;  %1839 = vrot.lane.b32.xlu0 %v5208_v55, %s3312_s27 }
 0x24e   :  { %1837 = vrot.lane.b32.xlu1 %v5196_v57, %s3312_s27 }
 0x24f   :  { %v1378_v37 = vpop.permute.xlu0 %1377 }
 0x250   :  { %v1376_v7 = vpop.permute.xlu1 %1375  ;;  %1458 = vst.msk [vmem:[#allocation3 + $0x80] sm:$0xff] %vm1441_vm10, %v1378_v37 }
 0x251   :  { %1457 = vst.msk [vmem:[#allocation3 + $0x78] sm:$0xff] %vm1441_vm10, %v1376_v7  ;;  %1843 = vrot.lane.b32.xlu0 %v5225_v23, %s3312_s27 }
 0x252   :  { %1841 = vrot.lane.b32.xlu1 %v5213_v11, %s3312_s27  ;;  %v5336_v11 = vld [vmem:[#allocation2 + $0x2f8] sm:$0x3] }
 0x253   :  { %v1382_v35 = vpop.permute.xlu0 %1381  ;;  %v1811_v57 = vrot.slane %v5336_v11, 1 }
 0x254   :  { %v1380_v51 = vpop.permute.xlu1 %1379  ;;  %1460 = vst.msk [vmem:[#allocation3 + $0x90] sm:$0xff] %vm1441_vm10, %v1382_v35 }
 0x255   :  { %1459 = vst.msk [vmem:[#allocation3 + $0x88] sm:$0xff] %vm1441_vm10, %v1380_v51  ;;  %1847 = vrot.lane.b32.xlu0 %v5242_v1, %s3312_s27  ;;  %v5276_v51 = vsel %vm388_vm2, %v1783_v56, %v1784_v22  ;;  %v5293_v56 = vsel %vm388_vm2, %v1788_v42, %v1789_v26  ;;  %v1793_v22 = vrot.slane %v4907_v44, 1  ;;  %v5319_v1 = vld [vmem:[#allocation2 + $0x2e0] sm:$0x3] }
 0x256   :  { %1845 = vrot.lane.b32.xlu1 %v5230_v25, %s3312_s27  ;;  %6608 = vst [vmem:[#allocation14_spill] sm:$0xff] %v5276_v51  ;;  %v1806_v23 = vrot.slane %v5319_v1, 1 }
 0x257   :  { %v1386_v7 = vpop.permute.xlu0 %1385  ;;  %v5310_v42 = vsel %vm388_vm2, %v1793_v22, %v1794_v43 }
 0x258   :  { %v1384_v28 = vpop.permute.xlu1 %1383  ;;  %1462 = vst.msk [vmem:[#allocation3 + $0xa0] sm:$0xff] %vm1441_vm10, %v1386_v7  ;;  %6610 = vst [vmem:[#allocation16_spill] sm:$0xff] %v5310_v42 }
 0x259   :  { %1461 = vst.msk [vmem:[#allocation3 + $0x98] sm:$0xff] %vm1441_vm10, %v1384_v28  ;;  %1851 = vrot.lane.b32.xlu0 %v5259_v12, %s3312_s27  ;;  %v1791_v28 = vrot.slane %v5268_v40, 1 }
 0x25a   :  { %1849 = vrot.lane.b32.xlu1 %v5247_v30, %s3312_s27 }
 0x25b   :  { %v1390_v35 = vpop.permute.xlu0 %1389 }
 0x25c   :  { %v1388_v37 = vpop.permute.xlu1 %1387  ;;  %1464 = vst.msk [vmem:[#allocation3 + $0xb0] sm:$0xff] %vm1441_vm10, %v1390_v35  ;;  %v5298_v35 = vsel %vm388_vm2, %v1789_v26, %v1791_v28  ;;  %v1798_v26 = vrot.slane %v4929_v45, 1  ;;  %v1799_v28 = vrot.slane %v4939_v62, 1 }
 0x25d   :  { %1463 = vst.msk [vmem:[#allocation3 + $0xa8] sm:$0xff] %vm1441_vm10, %v1388_v37  ;;  %v5285_v37 = vld [vmem:[#allocation2 + $0x2b0] sm:$0x3]  ;;  %1855 = vrot.lane.b32.xlu0 %v5276_v51, %s3312_s27  ;;  %v5302_v51 = vld [vmem:[#allocation2 + $0x2c8] sm:$0x3] }
 0x25e   :  { %1853 = vrot.lane.b32.xlu1 %v5264_v31, %s3312_s27  ;;  %v1796_v12 = vrot.slane %v5285_v37, 1  ;;  %v1801_v30 = vrot.slane %v5302_v51, 1  ;;  %v5327_v22 = vsel %vm388_vm2, %v1798_v26, %v1799_v28 }
 0x25f   :  { %v1394_v31 = vpop.permute.xlu0 %1393  ;;  %6612 = vst [vmem:[#allocation18_spill] sm:$0xff] %v5327_v22 }
 0x260   :  { %v1392_v7 = vpop.permute.xlu1 %1391  ;;  %1466 = vst.msk [vmem:[#allocation3 + $0xc0] sm:$0xff] %vm1441_vm10, %v1394_v31  ;;  %v5315_v31 = vsel %vm388_vm2, %v1794_v43, %v1796_v12  ;;  %v1803_v12 = vrot.slane %v4951_v6, 1  ;;  %v1804_v43 = vrot.slane %v4953_v8, 1 }
 0x261   :  { %1465 = vst.msk [vmem:[#allocation3 + $0xb8] sm:$0xff] %vm1441_vm10, %v1392_v7  ;;  %1859 = vrot.lane.b32.xlu0 %v5293_v56, %s3312_s27  ;;  %6611 = vst [vmem:[#allocation17_spill] sm:$0xff] %v5315_v31 }
 0x262   :  { %1857 = vrot.lane.b32.xlu1 %v5281_v9, %s3312_s27  ;;  %v5344_v26 = vsel %vm388_vm2, %v1803_v12, %v1804_v43 }
 0x263   :  { %v1398_v9 = vpop.permute.xlu0 %1397  ;;  %6614 = vst [vmem:[#allocation20_spill] sm:$0xff] %v5344_v26 }
 0x264   :  { %v1396_v7 = vpop.permute.xlu1 %1395  ;;  %1468 = vst.msk [vmem:[#allocation3 + $0xd0] sm:$0xff] %vm1441_vm10, %v1398_v9  ;;  %v5332_v9 = vsel %vm388_vm2, %v1799_v28, %v1801_v30  ;;  %v1808_v30 = vrot.slane %v4973_v58, 1  ;;  %v1809_v28 = vrot.slane %v4975_v63, 1 }
 0x265   :  { %1467 = vst.msk [vmem:[#allocation3 + $0xc8] sm:$0xff] %vm1441_vm10, %v1396_v7  ;;  %1863 = vrot.lane.b32.xlu0 %v5310_v42, %s3312_s27  ;;  %6613 = vst [vmem:[#allocation19_spill] sm:$0xff] %v5332_v9 }
 0x266   :  { %1861 = vrot.lane.b32.xlu1 %v5298_v35, %s3312_s27  ;;  %v5361_v12 = vsel %vm388_vm2, %v1808_v30, %v1809_v28  ;;  %v5366_v16 = vsel %vm388_vm2, %v1809_v28, %v1811_v57  ;;  %v6620_v57 = vld [vmem:[#allocation30_spill] sm:$0xff] }
 0x267   :  { %v1402_v25 = vpop.permute.xlu0 %1401  ;;  %6616 = vst [vmem:[#allocation22_spill] sm:$0xff] %v5361_v12  ;;  %6618 = vst [vmem:[#allocation23_spill] sm:$0xff] %v5366_v16  ;;  %v1818_v28 = vrot.slane %v6620_v57, 1 }
 0x268   :  { %v1400_v7 = vpop.permute.xlu1 %1399  ;;  %1470 = vst.msk [vmem:[#allocation3 + $0xe0] sm:$0xff] %vm1441_vm10, %v1402_v25  ;;  %v5349_v25 = vsel %vm388_vm2, %v1804_v43, %v1806_v23  ;;  %v1813_v23 = vrot.slane %v4997_v46, 1  ;;  %v6617_v43 = vld [vmem:[#allocation29_spill] sm:$0xff] }
 0x269   :  { %1469 = vst.msk [vmem:[#allocation3 + $0xd8] sm:$0xff] %vm1441_vm10, %v1400_v7  ;;  %1867 = vrot.lane.b32.xlu0 %v5327_v22, %s3312_s27  ;;  %6615 = vst [vmem:[#allocation21_spill] sm:$0xff] %v5349_v25  ;;  %v5353_v22 = vld [vmem:[#allocation2 + $0x310] sm:$0x3] }
 0x26a   :  { %1865 = vrot.lane.b32.xlu1 %v5315_v31, %s3312_s27  ;;  %v5370_v31 = vld [vmem:[#allocation2 + $0x328] sm:$0x3] }
 0x26b   :  { %v1406_v55 = vpop.permute.xlu0 %1405  ;;  %v1821_v5 = vrot.slane %v5370_v31, 1 }
 0x26c   :  { %v1404_v7 = vpop.permute.xlu1 %1403  ;;  %1472 = vst.msk [vmem:[#allocation3 + $0xf0] sm:$0xff] %vm1441_vm10, %v1406_v55 }
 0x26d   :  { %1471 = vst.msk [vmem:[#allocation3 + $0xe8] sm:$0xff] %vm1441_vm10, %v1404_v7  ;;  %1871 = vrot.lane.b32.xlu0 %v5344_v26, %s3312_s27 }
 0x26e   :  { %1869 = vrot.lane.b32.xlu1 %v5332_v9, %s3312_s27  ;;  %v1814_v9 = vrot.slane %v6617_v43, 1 }
 0x26f   :  { %v1480_v55 = vpop.permute.xlu0 %1479 }
 0x270   :  { %v1408_v7 = vpop.permute.xlu1 %1407  ;;  %1576 = vst.msk [vmem:[#allocation3] sm:$0xff] %vm1575_vm11, %v1480_v55  ;;  %v5378_v30 = vsel %vm388_vm2, %v1813_v23, %v1814_v9 }
 0x271   :  { %1473 = vst.msk [vmem:[#allocation3 + $0xf8] sm:$0xff] %vm1441_vm10, %v1408_v7  ;;  %v1816_v7 = vrot.slane %v5353_v22, 1  ;;  %1875 = vrot.lane.b32.xlu0 %v5361_v12, %s3312_s27  ;;  %6619 = vst [vmem:[#allocation24_spill] sm:$0xff] %v5378_v30  ;;  %v1986_v12 = vrot.slane %v4841_v0, 2 }
 0x272   :  { %1873 = vrot.lane.b32.xlu1 %v5349_v25, %s3312_s27  ;;  %v1819_v25 = vrot.slane %v5019_v24, 1 }
 0x273   :  { %v1484_v42 = vpop.permute.xlu0 %1483  ;;  %v5383_v55 = vsel %vm388_vm2, %v1814_v9, %v1816_v7 }
 0x274   :  { %v1482_v26 = vpop.permute.xlu1 %1481  ;;  %6621 = vst [vmem:[#allocation25_spill] sm:$0xff] %v5383_v55  ;;  %1578 = vst.msk [vmem:[#allocation3 + $0x10] sm:$0xff] %vm1575_vm11, %v1484_v42  ;;  %v5393_v23 = vsel %vm388_vm2, %v1818_v28, %v1819_v25  ;;  %v5396_v9 = vsel %vm388_vm2, %v1819_v25, %v1821_v5  ;;  %v1956_v42 = vrot.slane %v4709_v38, 2  ;;  %v1957_v28 = vrot.slane %v4711_v39, 2 }
 0x275   :  { %1577 = vst.msk [vmem:[#allocation3 + $0x8] sm:$0xff] %vm1575_vm11, %v1482_v26  ;;  %1879 = vrot.lane.b32.xlu0 %v5378_v30, %s3312_s27  ;;  %6622 = vst [vmem:[#allocation26_spill] sm:$0xff] %v5393_v23  ;;  %v1961_v25 = vrot.slane %v4731_v60, 2  ;;  %v1981_v30 = vrot.slane %v4819_v49, 2 }
 0x276   :  { %1877 = vrot.lane.b32.xlu1 %v5366_v16, %s3312_s27  ;;  %6623 = vst [vmem:[#allocation31_spill] sm:$0xff] %v5396_v9 }
 0x277   :  { %v1488_v16 = vpop.permute.xlu0 %1487 }
 0x278   :  { %v1486_v26 = vpop.permute.xlu1 %1485  ;;  %1580 = vst.msk [vmem:[#allocation3 + $0x20] sm:$0xff] %vm1575_vm11, %v1488_v16  ;;  %v5414_v16 = vsel %vm598_vm3, %v1956_v42, %v1957_v28 }
 0x279   :  { %1579 = vst.msk [vmem:[#allocation3 + $0x18] sm:$0xff] %vm1575_vm11, %v1486_v26  ;;  %1883 = vrot.lane.b32.xlu0 %v5393_v23, %s3312_s27  ;;  %v1976_v23 = vrot.slane %v4797_v47, 2 }
 0x27a   :  { %1881 = vrot.lane.b32.xlu1 %v5383_v55, %s3312_s27  ;;  %v1959_v55 = vrot.slane %v5138_v32, 2 }
 0x27b   :  { %v1492_v26 = vpop.permute.xlu0 %1491 }
 0x27c   :  { %v1490_v7 = vpop.permute.xlu1 %1489  ;;  %1582 = vst.msk [vmem:[#allocation3 + $0x30] sm:$0xff] %vm1575_vm11, %v1492_v26  ;;  %v5419_v32 = vsel %vm598_vm3, %v1957_v28, %v1959_v55  ;;  %v1964_v26 = vrot.slane %v5150_v33, 2  ;;  %v1967_v55 = vrot.slane %v4763_v2, 2 }
 0x27d   :  { %1581 = vst.msk [vmem:[#allocation3 + $0x28] sm:$0xff] %vm1575_vm11, %v1490_v7  ;;  %2031 = vrot.lane.b32.xlu0 %v5037_v4, %s3313_s23  ;;  %v1962_v7 = vrot.slane %v4741_v53, 2 }
 0x27e   :  { %1885 = vrot.lane.b32.xlu1 %v5396_v9, %s3312_s27 }
 0x27f   :  { %v1496_v9 = vpop.permute.xlu0 %1495  ;;  %v5429_v4 = vsel %vm598_vm3, %v1961_v25, %v1962_v7  ;;  %v5434_v33 = vsel %vm598_vm3, %v1962_v7, %v1964_v26  ;;  %v1972_v7 = vrot.slane %v4777_v61, 2 }
 0x280   :  { %v1494_v5 = vpop.permute.xlu1 %1493  ;;  %1584 = vst.msk [vmem:[#allocation3 + $0x40] sm:$0xff] %vm1575_vm11, %v1496_v9  ;;  %v1969_v9 = vrot.slane %v5166_v15, 2 }
 0x281   :  { %1583 = vst.msk [vmem:[#allocation3 + $0x38] sm:$0xff] %vm1575_vm11, %v1494_v5  ;;  %2035 = vrot.lane.b32.xlu0 %v5414_v16, %s3313_s23 }
 0x282   :  { %2033 = vrot.lane.b32.xlu1 %v5043_v41, %s3313_s23  ;;  %v1966_v41 = vrot.slane %v4753_v59, 2  ;;  %v5449_v15 = vsel %vm598_vm3, %v1967_v55, %v1969_v9 }
 0x283   :  { %v1500_v42 = vpop.permute.xlu0 %1499  ;;  %6624 = vst [vmem:[#allocation32_spill] sm:$0xff] %v5449_v15 }
 0x284   :  { %v1498_v5 = vpop.permute.xlu1 %1497  ;;  %1586 = vst.msk [vmem:[#allocation3 + $0x50] sm:$0xff] %vm1575_vm11, %v1500_v42  ;;  %v5444_v25 = vsel %vm598_vm3, %v1966_v41, %v1967_v55  ;;  %v1974_v42 = vrot.slane %v5183_v19, 2  ;;  %v1977_v55 = vrot.slane %v4799_v20, 2 }
 0x285   :  { %1585 = vst.msk [vmem:[#allocation3 + $0x48] sm:$0xff] %vm1575_vm11, %v1498_v5  ;;  %2039 = vrot.lane.b32.xlu0 %v5429_v4, %s3313_s23  ;;  %v1971_v5 = vrot.slane %v4775_v48, 2 }
 0x286   :  { %2037 = vrot.lane.b32.xlu1 %v5419_v32, %s3313_s23  ;;  %v5464_v19 = vsel %vm598_vm3, %v1972_v7, %v1974_v42 }
 0x287   :  { %v1504_v26 = vpop.permute.xlu0 %1503  ;;  %v5459_v41 = vsel %vm598_vm3, %v1971_v5, %v1972_v7  ;;  %6626 = vst [vmem:[#allocation34_spill] sm:$0xff] %v5464_v19  ;;  %v5474_v5 = vsel %vm598_vm3, %v1976_v23, %v1977_v55  ;;  %v1982_v7 = vrot.slane %v4829_v54, 2 }
 0x288   :  { %v1502_v28 = vpop.permute.xlu1 %1501  ;;  %1588 = vst.msk [vmem:[#allocation3 + $0x60] sm:$0xff] %vm1575_vm11, %v1504_v26  ;;  %6625 = vst [vmem:[#allocation33_spill] sm:$0xff] %v5459_v41  ;;  %v1979_v26 = vrot.slane %v5200_v14, 2 }
 0x289   :  { %1587 = vst.msk [vmem:[#allocation3 + $0x58] sm:$0xff] %vm1575_vm11, %v1502_v28  ;;  %2043 = vrot.lane.b32.xlu0 %v5444_v25, %s3313_s23  ;;  %6627 = vst [vmem:[#allocation35_spill] sm:$0xff] %v5474_v5  ;;  %v5489_v23 = vsel %vm598_vm3, %v1981_v30, %v1982_v7 }
 0x28a   :  { %2041 = vrot.lane.b32.xlu1 %v5434_v33, %s3313_s23  ;;  %v5479_v14 = vsel %vm598_vm3, %v1977_v55, %v1979_v26  ;;  %6629 = vst [vmem:[#allocation38_spill] sm:$0xff] %v5489_v23  ;;  %v1987_v55 = vrot.slane %v4851_v3, 2 }
 0x28b   :  { %v1508_v9 = vpop.permute.xlu0 %1507  ;;  %6628 = vst [vmem:[#allocation37_spill] sm:$0xff] %v5479_v14 }
 0x28c   :  { %v1506_v28 = vpop.permute.xlu1 %1505  ;;  %1590 = vst.msk [vmem:[#allocation3 + $0x70] sm:$0xff] %vm1575_vm11, %v1508_v9  ;;  %v1984_v9 = vrot.slane %v5217_v10, 2  ;;  %v5504_v30 = vsel %vm598_vm3, %v1986_v12, %v1987_v55 }
 0x28d   :  { %1589 = vst.msk [vmem:[#allocation3 + $0x68] sm:$0xff] %vm1575_vm11, %v1506_v28  ;;  %2047 = vrot.lane.b32.xlu0 %v5459_v41, %s3313_s23  ;;  %6631 = vst [vmem:[#allocation40_spill] sm:$0xff] %v5504_v30 }
 0x28e   :  { %2045 = vrot.lane.b32.xlu1 %v5449_v15, %s3313_s23  ;;  %v5494_v10 = vsel %vm598_vm3, %v1982_v7, %v1984_v9  ;;  %v1991_v7 = vrot.slane %v4863_v36, 2 }
 0x28f   :  { %v1512_v42 = vpop.permute.xlu0 %1511  ;;  %6630 = vst [vmem:[#allocation39_spill] sm:$0xff] %v5494_v10 }
 0x290   :  { %v1510_v28 = vpop.permute.xlu1 %1509  ;;  %1592 = vst.msk [vmem:[#allocation3 + $0x80] sm:$0xff] %vm1575_vm11, %v1512_v42  ;;  %v1989_v42 = vrot.slane %v5234_v17, 2  ;;  %v1992_v17 = vrot.slane %v4865_v21, 2 }
 0x291   :  { %1591 = vst.msk [vmem:[#allocation3 + $0x78] sm:$0xff] %vm1575_vm11, %v1510_v28  ;;  %2051 = vrot.lane.b32.xlu0 %v5474_v5, %s3313_s23  ;;  %v2953_v5 = vld [vmem:[#allocation3] sm:$0xff] }
 0x292   :  { %2049 = vrot.lane.b32.xlu1 %v5464_v19, %s3313_s23  ;;  %v2954_v19 = vld [vmem:[#allocation3 + $0x8] sm:$0xff] }
 0x293   :  { %v1516_v26 = vpop.permute.xlu0 %1515  ;;  %v3017_v41 = vpack.c.bf16 %v2954_v19, %v2953_v5  ;;  %v1996_v19 = vrot.slane %v4885_v50, 2 }
 0x294   :  { %v1514_v28 = vpop.permute.xlu1 %1513  ;;  %1594 = vst.msk [vmem:[#allocation3 + $0x90] sm:$0xff] %vm1575_vm11, %v1516_v26  ;;  %v5509_v26 = vsel %vm598_vm3, %v1987_v55, %v1989_v42  ;;  %v5519_v55 = vsel %vm598_vm3, %v1991_v7, %v1992_v17 }
 0x295   :  { %1593 = vst.msk [vmem:[#allocation3 + $0x88] sm:$0xff] %vm1575_vm11, %v1514_v28  ;;  %2055 = vrot.lane.b32.xlu0 %v5489_v23, %s3313_s23  ;;  %6632 = vst [vmem:[#allocation41_spill] sm:$0xff] %v5509_v26  ;;  %v3061_v42 = vsel %vm3056_vm12, %v3017_v41, 0 }
 0x296   :  { %2053 = vrot.lane.b32.xlu1 %v5479_v14, %s3313_s23  ;;  %6633 = vst [vmem:[#allocation30_spill] sm:$0xff] %v5519_v55 }
 0x297   :  { %v1520_v9 = vpop.permute.xlu0 %1519  ;;  %v2969_v14 = vld [vmem:[#allocation3 + $0x80] sm:$0xff] }
 0x298   :  { %v1518_v28 = vpop.permute.xlu1 %1517  ;;  %1596 = vst.msk [vmem:[#allocation3 + $0xa0] sm:$0xff] %vm1575_vm11, %v1520_v9 }
 0x299   :  { %1595 = vst.msk [vmem:[#allocation3 + $0x98] sm:$0xff] %vm1575_vm11, %v1518_v28  ;;  %v1994_v28 = vrot.slane %v5251_v29, 2  ;;  %2059 = vrot.lane.b32.xlu0 %v5504_v30, %s3313_s23  ;;  %v1997_v29 = vrot.slane %v4887_v52, 2  ;;  %v2956_v30 = vld [vmem:[#allocation3 + $0x18] sm:$0xff] }
 0x29a   :  { %2057 = vrot.lane.b32.xlu1 %v5494_v10, %s3313_s23 }
 0x29b   :  { %v1524_v5 = vpop.permute.xlu0 %1523  ;;  %v2971_v9 = vld [vmem:[#allocation3 + $0x90] sm:$0xff]  ;;  %v5536_v41 = vsel %vm598_vm3, %v1996_v19, %v1997_v29 }
 0x29c   :  { %v1522_v23 = vpop.permute.xlu1 %1521  ;;  %v2970_v15 = vld [vmem:[#allocation3 + $0x88] sm:$0xff]  ;;  %1598 = vst.msk [vmem:[#allocation3 + $0xb0] sm:$0xff] %vm1575_vm11, %v1524_v5 }
 0x29d   :  { %1597 = vst.msk [vmem:[#allocation3 + $0xa8] sm:$0xff] %vm1575_vm11, %v1522_v23  ;;  %v3025_v12 = vpack.c.bf16 %v2970_v15, %v2969_v14  ;;  %v5526_v23 = vsel %vm598_vm3, %v1992_v17, %v1994_v28  ;;  %v1999_v15 = vrot.slane %v5268_v40, 2  ;;  %2063 = vrot.lane.b32.xlu0 %v5519_v55, %s3313_s23  ;;  %v2001_v40 = vrot.slane %v4907_v44, 2  ;;  %v2957_v55 = vld [vmem:[#allocation3 + $0x20] sm:$0xff] }
 0x29e   :  { %2061 = vrot.lane.b32.xlu1 %v5509_v26, %s3313_s23  ;;  %6634 = vst [vmem:[#allocation42_spill] sm:$0xff] %v5526_v23  ;;  %v2955_v26 = vld [vmem:[#allocation3 + $0x10] sm:$0xff]  ;;  %v2002_v17 = vrot.slane %v4917_v27, 2 }
 0x29f   :  { %3284 = vmatprep.subr.msk.bf16.mxu0 %vm3056_vm12, %v3025_v12  ;;  %v1528_v28 = vpop.permute.xlu0 %1527  ;;  %v5542_v5 = vsel %vm598_vm3, %v1997_v29, %v1999_v15 }
 0x2a0   :  { %3249 = vmatpush3.bf16.xpose.msra.mxu0 %v3061_v42  ;;  %v1526_v14 = vpop.permute.xlu1 %1525  ;;  %v2972_v7 = vld [vmem:[#allocation3 + $0x98] sm:$0xff]  ;;  %v3018_v42 = vpack.c.bf16 %v2956_v30, %v2955_v26  ;;  %1600 = vst.msk [vmem:[#allocation3 + $0xc0] sm:$0xff] %vm1575_vm11, %v1528_v28  ;;  %v5552_v19 = vsel %vm598_vm3, %v2001_v40, %v2002_v17  ;;  %v2006_v30 = vrot.slane %v4929_v45, 2  ;;  %v2009_v28 = vrot.slane %v5302_v51, 2  ;;  %v2958_v40 = vld [vmem:[#allocation3 + $0x28] sm:$0xff] }
 0x2a1   :  { %1599 = vst.msk [vmem:[#allocation3 + $0xb8] sm:$0xff] %vm1575_vm11, %v1526_v14  ;;  %v3026_v12 = vpack.c.bf16 %v2972_v7, %v2971_v9  ;;  %v2004_v14 = vrot.slane %v5285_v37, 2  ;;  %v2973_v7 = vld [vmem:[#allocation3 + $0xa0] sm:$0xff]  ;;  %2067 = vrot.lane.b32.xlu0 %v5536_v41, %s3313_s23  ;;  %v2007_v37 = vrot.slane %v4939_v62, 2  ;;  %v2011_v51 = vrot.slane %v4951_v6, 2 }
 0x2a2   :  { %2065 = vrot.lane.b32.xlu1 %v5526_v23, %s3313_s23  ;;  %v3064_v29 = vsel %vm3056_vm12, %v3018_v42, 0 }
 0x2a3   :  { %3285 = vmatprep.subr.msk.bf16.mxu0 %vm3056_vm12, %v3026_v12  ;;  %v1532_v26 = vpop.permute.xlu0 %1531  ;;  %v5558_v12 = vsel %vm598_vm3, %v2002_v17, %v2004_v14  ;;  %v2012_v17 = vrot.slane %v4953_v8, 2  ;;  %v5574_v14 = vsel %vm598_vm3, %v2007_v37, %v2009_v28  ;;  %v2959_v8 = vld [vmem:[#allocation3 + $0x30] sm:$0xff] }
 0x2a4   :  { %v1530_v9 = vpop.permute.xlu1 %1529  ;;  %v2974_v23 = vld [vmem:[#allocation3 + $0xa8] sm:$0xff]  ;;  %1602 = vst.msk [vmem:[#allocation3 + $0xd0] sm:$0xff] %vm1575_vm11, %v1532_v26  ;;  %v2014_v26 = vrot.slane %v5319_v1, 2  ;;  %v2017_v1 = vrot.slane %v4975_v63, 2 }
 0x2a5   :  { %1601 = vst.msk [vmem:[#allocation3 + $0xc8] sm:$0xff] %vm1575_vm11, %v1530_v9  ;;  %v3027_v15 = vpack.c.bf16 %v2974_v23, %v2973_v7  ;;  %2071 = vrot.lane.b32.xlu0 %v5552_v19, %s3313_s23  ;;  %v5569_v23 = vsel %vm598_vm3, %v2006_v30, %v2007_v37  ;;  %v3019_v7 = vpack.c.bf16 %v2958_v40, %v2957_v55  ;;  %v2016_v55 = vrot.slane %v4973_v58, 2 }
 0x2a6   :  { %2069 = vrot.lane.b32.xlu1 %v5542_v5, %s3313_s23  ;;  %v5584_v30 = vsel %vm598_vm3, %v2011_v51, %v2012_v17  ;;  %v2960_v51 = vld [vmem:[#allocation3 + $0x38] sm:$0xff] }
 0x2a7   :  { %v1536_v42 = vpop.permute.xlu0 %1535  ;;  %v3067_v28 = vsel %vm3056_vm12, %v3019_v7, 0  ;;  %v2022_v7 = vrot.slane %v6617_v43, 2 }
 0x2a8   :  { %v1534_v9 = vpop.permute.xlu1 %1533  ;;  %3251 = vmatpush3.bf16.xpose.msra.mxu0 %v3064_v29  ;;  %1604 = vst.msk [vmem:[#allocation3 + $0xe0] sm:$0xff] %vm1575_vm11, %v1536_v42  ;;  %v5590_v42 = vsel %vm598_vm3, %v2012_v17, %v2014_v26  ;;  %v5601_v17 = vsel %vm598_vm3, %v2016_v55, %v2017_v1 }
 0x2a9   :  { %1603 = vst.msk [vmem:[#allocation3 + $0xd8] sm:$0xff] %vm1575_vm11, %v1534_v9  ;;  %3286 = vmatprep.subr.msk.bf16.mxu0 %vm3056_vm12, %v3027_v15  ;;  %v2975_v15 = vld [vmem:[#allocation3 + $0xb0] sm:$0xff]  ;;  %v2976_v9 = vld [vmem:[#allocation3 + $0xb8] sm:$0xff]  ;;  %2075 = vrot.lane.b32.xlu0 %v5569_v23, %s3313_s23 }
 0x2aa   :  { %2073 = vrot.lane.b32.xlu1 %v5558_v12, %s3313_s23  ;;  %v3028_v40 = vpack.c.bf16 %v2976_v9, %v2975_v15  ;;  %v2024_v9 = vrot.slane %v5353_v22, 2  ;;  %v2027_v22 = vrot.slane %v5019_v24, 2 }
 0x2ab   :  { %v1540_v37 = vpop.permute.xlu0 %1539 }
 0x2ac   :  { %v1538_v29 = vpop.permute.xlu1 %1537  ;;  %1606 = vst.msk [vmem:[#allocation3 + $0xf0] sm:$0xff] %vm1575_vm11, %v1540_v37 }
 0x2ad   :  { %1605 = vst.msk [vmem:[#allocation3 + $0xe8] sm:$0xff] %vm1575_vm11, %v1538_v29  ;;  %v2019_v29 = vrot.slane %v5336_v11, 2  ;;  %2079 = vrot.lane.b32.xlu0 %v5584_v30, %s3313_s23  ;;  %v2021_v11 = vrot.slane %v4997_v46, 2  ;;  %v2961_v46 = vld [vmem:[#allocation3 + $0x40] sm:$0xff] }
 0x2ae   :  { %2077 = vrot.lane.b32.xlu1 %v5574_v14, %s3313_s23 }
 0x2af   :  { %v1824_v26 = vpop.permute.xlu0 %1823  ;;  %v5606_v15 = vsel %vm598_vm3, %v2017_v1, %v2019_v29  ;;  %v5616_v55 = vsel %vm598_vm3, %v2021_v11, %v2022_v7  ;;  %v2962_v11 = vld [vmem:[#allocation3 + $0x48] sm:$0xff] }
 0x2b0   :  { %v1542_v10 = vpop.permute.xlu1 %1541  ;;  %3253 = vmatpush3.bf16.xpose.msra.mxu0 %v3067_v28  ;;  %1919 = vst.msk [vmem:[#allocation3 + $0x100] sm:$0xff] %vm565_vm4, %v1824_v26  ;;  %v2977_v28 = vld [vmem:[#allocation3 + $0xc0] sm:$0xff]  ;;  %v5622_v26 = vsel %vm598_vm3, %v2022_v7, %v2024_v9  ;;  %v3021_v9 = vpack.c.bf16 %v2962_v11, %v2961_v46 }
 0x2b1   :  { %1607 = vst.msk [vmem:[#allocation3 + $0xf8] sm:$0xff] %vm1575_vm11, %v1542_v10  ;;  %3287 = vmatprep.subr.msk.bf16.mxu0 %vm3056_vm12, %v3028_v40  ;;  %v3020_v10 = vpack.c.bf16 %v2960_v51, %v2959_v8  ;;  %v2978_v40 = vld [vmem:[#allocation3 + $0xc8] sm:$0xff]  ;;  %2083 = vrot.lane.b32.xlu0 %v5601_v17, %s3313_s23  ;;  %v2026_v8 = vrot.slane %v6620_v57, 2 }
 0x2b2   :  { %2081 = vrot.lane.b32.xlu1 %v5590_v42, %s3313_s23  ;;  %v3029_v51 = vpack.c.bf16 %v2978_v40, %v2977_v28  ;;  %v2980_v40 = vld [vmem:[#allocation3 + $0xd8] sm:$0xff] }
 0x2b3   :  { %v1828_v1 = vpop.permute.xlu0 %1827  ;;  %v3070_v29 = vsel %vm3056_vm12, %v3020_v10, 0  ;;  %v5633_v7 = vsel %vm598_vm3, %v2026_v8, %v2027_v22 }
 0x2b4   :  { %v1826_v37 = vpop.permute.xlu1 %1825  ;;  %1921 = vst.msk [vmem:[#allocation3 + $0x110] sm:$0xff] %vm565_vm4, %v1828_v1  ;;  %v3073_v1 = vsel %vm3056_vm12, %v3021_v9, 0  ;;  %v2981_v9 = vld [vmem:[#allocation3 + $0xe0] sm:$0xff] }
 0x2b5   :  { %1920 = vst.msk [vmem:[#allocation3 + $0x108] sm:$0xff] %vm565_vm4, %v1826_v37  ;;  %v2029_v37 = vrot.slane %v5370_v31, 2  ;;  %2087 = vrot.lane.b32.xlu0 %v5616_v55, %s3313_s23 }
 0x2b6   :  { %2085 = vrot.lane.b32.xlu1 %v5606_v15, %s3313_s23 }
 0x2b7   :  { %v1832_v31 = vpop.permute.xlu0 %1831  ;;  %v5636_v10 = vsel %vm598_vm3, %v2027_v22, %v2029_v37  ;;  %v2963_v22 = vld [vmem:[#allocation3 + $0x50] sm:$0xff] }
 0x2b8   :  { %v1830_v43 = vpop.permute.xlu1 %1829  ;;  %3255 = vmatpush3.bf16.xpose.msra.mxu0 %v3070_v29  ;;  %1923 = vst.msk [vmem:[#allocation3 + $0x120] sm:$0xff] %vm565_vm4, %v1832_v31 }
 0x2b9   :  { %1922 = vst.msk [vmem:[#allocation3 + $0x118] sm:$0xff] %vm565_vm4, %v1830_v43  ;;  %3288 = vmatprep.subr.msk.bf16.mxu0 %vm3056_vm12, %v3029_v51  ;;  %v2979_v43 = vld [vmem:[#allocation3 + $0xd0] sm:$0xff]  ;;  %2091 = vrot.lane.b32.xlu0 %v5633_v7, %s3313_s23  ;;  %v2964_v51 = vld [vmem:[#allocation3 + $0x58] sm:$0xff] }
 0x2ba   :  { %2089 = vrot.lane.b32.xlu1 %v5622_v26, %s3313_s23  ;;  %v3030_v29 = vpack.c.bf16 %v2980_v40, %v2979_v43  ;;  %v3022_v11 = vpack.c.bf16 %v2964_v51, %v2963_v22  ;;  %v2983_v51 = vld [vmem:[#allocation3 + $0xf0] sm:$0xff] }
 0x2bb   :  { %v1836_v8 = vpop.permute.xlu0 %1835 }
 0x2bc   :  { %v1834_v28 = vpop.permute.xlu1 %1833  ;;  %1925 = vst.msk [vmem:[#allocation3 + $0x130] sm:$0xff] %vm565_vm4, %v1836_v8  ;;  %v3076_v43 = vsel %vm3056_vm12, %v3022_v11, 0  ;;  %v2965_v8 = vld [vmem:[#allocation3 + $0x60] sm:$0xff] }
 0x2bd   :  { %1924 = vst.msk [vmem:[#allocation3 + $0x128] sm:$0xff] %vm565_vm4, %v1834_v28  ;;  %2161 = vrot.lane.b32.xlu0 %v4709_v38, %s3314_s24  ;;  %v2982_v28 = vld [vmem:[#allocation3 + $0xe8] sm:$0xff] }
 0x2be   :  { %2093 = vrot.lane.b32.xlu1 %v5636_v10, %s3313_s23  ;;  %v3031_v40 = vpack.c.bf16 %v2982_v28, %v2981_v9 }
 0x2bf   :  { %v1840_v37 = vpop.permute.xlu0 %1839 }
 0x2c0   :  { %v1838_v46 = vpop.permute.xlu1 %1837  ;;  %3257 = vmatpush3.bf16.xpose.msra.mxu0 %v3073_v1  ;;  %1927 = vst.msk [vmem:[#allocation3 + $0x140] sm:$0xff] %vm565_vm4, %v1840_v37  ;;  %v2966_v1 = vld [vmem:[#allocation3 + $0x68] sm:$0xff]  ;;  %v2984_v37 = vld [vmem:[#allocation3 + $0xf8] sm:$0xff] }
 0x2c1   :  { %1926 = vst.msk [vmem:[#allocation3 + $0x138] sm:$0xff] %vm565_vm4, %v1838_v46  ;;  %3289 = vmatprep.subr.msk.bf16.mxu0 %vm3056_vm12, %v3030_v29  ;;  %2165 = vrot.lane.b32.xlu0 %v4731_v60, %s3314_s24  ;;  %v3023_v46 = vpack.c.bf16 %v2966_v1, %v2965_v8  ;;  %v3032_v9 = vpack.c.bf16 %v2984_v37, %v2983_v51 }
 0x2c2   :  { %2163 = vrot.lane.b32.xlu1 %v4711_v39, %s3314_s24 }
 0x2c3   :  { %v1844_v38 = vpop.permute.xlu0 %1843 }
 0x2c4   :  { %v1842_v31 = vpop.permute.xlu1 %1841  ;;  %1929 = vst.msk [vmem:[#allocation3 + $0x150] sm:$0xff] %vm565_vm4, %v1844_v38  ;;  %v2967_v38 = vld [vmem:[#allocation3 + $0x70] sm:$0xff] }
 0x2c5   :  { %1928 = vst.msk [vmem:[#allocation3 + $0x148] sm:$0xff] %vm565_vm4, %v1842_v31  ;;  %2169 = vrot.lane.b32.xlu0 %v4753_v59, %s3314_s24  ;;  %v3079_v31 = vsel %vm3056_vm12, %v3023_v46, 0 }
 0x2c6   :  { %2167 = vrot.lane.b32.xlu1 %v4741_v53, %s3314_s24 }
 0x2c7   :  { %v1848_v29 = vpop.permute.xlu0 %1847 }
 0x2c8   :  { %v1846_v39 = vpop.permute.xlu1 %1845  ;;  %3259 = vmatpush3.bf16.xpose.msra.mxu0 %v3076_v43  ;;  %1931 = vst.msk [vmem:[#allocation3 + $0x160] sm:$0xff] %vm565_vm4, %v1848_v29  ;;  %v2968_v43 = vld [vmem:[#allocation3 + $0x78] sm:$0xff] }
 0x2c9   :  { %1930 = vst.msk [vmem:[#allocation3 + $0x158] sm:$0xff] %vm565_vm4, %v1846_v39  ;;  %3290 = vmatprep.subr.msk.bf16.mxu0 %vm3056_vm12, %v3031_v40  ;;  %2173 = vrot.lane.b32.xlu0 %v4775_v48, %s3314_s24  ;;  %v3024_v39 = vpack.c.bf16 %v2968_v43, %v2967_v38 }
 0x2ca   :  { %2171 = vrot.lane.b32.xlu1 %v4763_v2, %s3314_s24 }
 0x2cb   :  { %v1852_v11 = vpop.permute.xlu0 %1851  ;;  %v3082_v29 = vsel %vm3056_vm12, %v3024_v39, 0 }
 0x2cc   :  { %v1850_v22 = vpop.permute.xlu1 %1849  ;;  %1933 = vst.msk [vmem:[#allocation3 + $0x170] sm:$0xff] %vm565_vm4, %v1852_v11 }
 0x2cd   :  { %1932 = vst.msk [vmem:[#allocation3 + $0x168] sm:$0xff] %vm565_vm4, %v1850_v22  ;;  %2177 = vrot.lane.b32.xlu0 %v4797_v47, %s3314_s24 }
 0x2ce   :  { %2175 = vrot.lane.b32.xlu1 %v4777_v61, %s3314_s24 }
 0x2cf   :  { %v1856_v40 = vpop.permute.xlu0 %1855 }
 0x2d0   :  { %v1854_v28 = vpop.permute.xlu1 %1853  ;;  %3261 = vmatpush3.bf16.xpose.msra.mxu0 %v3079_v31  ;;  %1935 = vst.msk [vmem:[#allocation3 + $0x180] sm:$0xff] %vm565_vm4, %v1856_v40 }
 0x2d1   :  { %1934 = vst.msk [vmem:[#allocation3 + $0x178] sm:$0xff] %vm565_vm4, %v1854_v28  ;;  %3291 = vmatprep.subr.msk.bf16.mxu0 %vm3056_vm12, %v3032_v9  ;;  %2181 = vrot.lane.b32.xlu0 %v4819_v49, %s3314_s24 }
 0x2d2   :  { %2179 = vrot.lane.b32.xlu1 %v4799_v20, %s3314_s24 }
 0x2d3   :  { %v1860_v1 = vpop.permute.xlu0 %1859 }
 0x2d4   :  { %v1858_v8 = vpop.permute.xlu1 %1857  ;;  %1937 = vst.msk [vmem:[#allocation3 + $0x190] sm:$0xff] %vm565_vm4, %v1860_v1 }
 0x2d5   :  { %1936 = vst.msk [vmem:[#allocation3 + $0x188] sm:$0xff] %vm565_vm4, %v1858_v8  ;;  %2185 = vrot.lane.b32.xlu0 %v4841_v0, %s3314_s24 }
 0x2d6   :  { %2183 = vrot.lane.b32.xlu1 %v4829_v54, %s3314_s24 }
 0x2d7   :  { %v1864_v22 = vpop.permute.xlu0 %1863 }
 0x2d8   :  { %v1862_v46 = vpop.permute.xlu1 %1861  ;;  %3263 = vmatpush3.bf16.xpose.msra.mxu0 %v3082_v29  ;;  %1939 = vst.msk [vmem:[#allocation3 + $0x1a0] sm:$0xff] %vm565_vm4, %v1864_v22 }
 0x2d9   :  { %1938 = vst.msk [vmem:[#allocation3 + $0x198] sm:$0xff] %vm565_vm4, %v1862_v46  ;;  %2189 = vrot.lane.b32.xlu0 %v4863_v36, %s3314_s24 }
 0x2da   :  { %2187 = vrot.lane.b32.xlu1 %v4851_v3, %s3314_s24 }
 0x2db   :  { %v1868_v37 = vpop.permute.xlu0 %1867 }
 0x2dc   :  { %v1866_v51 = vpop.permute.xlu1 %1865  ;;  %1941 = vst.msk [vmem:[#allocation3 + $0x1b0] sm:$0xff] %vm565_vm4, %v1868_v37  ;;  %v6637_v37 = vld [vmem:[#allocation17_spill] sm:$0xff] }
 0x2dd   :  { %1940 = vst.msk [vmem:[#allocation3 + $0x1a8] sm:$0xff] %vm565_vm4, %v1866_v51  ;;  %2193 = vrot.lane.b32.xlu0 %v4885_v50, %s3314_s24 }
 0x2de   :  { %2191 = vrot.lane.b32.xlu1 %v4865_v21, %s3314_s24 }
 0x2df   :  { %v1872_v31 = vpop.permute.xlu0 %1871 }
 0x2e0   :  { %v1870_v11 = vpop.permute.xlu1 %1869  ;;  %1943 = vst.msk [vmem:[#allocation3 + $0x1c0] sm:$0xff] %vm565_vm4, %v1872_v31 }
 0x2e1   :  { %1942 = vst.msk [vmem:[#allocation3 + $0x1b8] sm:$0xff] %vm565_vm4, %v1870_v11  ;;  %2197 = vrot.lane.b32.xlu0 %v4907_v44, %s3314_s24 }
 0x2e2   :  { %2195 = vrot.lane.b32.xlu1 %v4887_v52, %s3314_s24 }
 0x2e3   :  { %v1876_v28 = vpop.permute.xlu0 %1875 }
 0x2e4   :  { %v1874_v9 = vpop.permute.xlu1 %1873  ;;  %1945 = vst.msk [vmem:[#allocation3 + $0x1d0] sm:$0xff] %vm565_vm4, %v1876_v28 }
 0x2e5   :  { %1944 = vst.msk [vmem:[#allocation3 + $0x1c8] sm:$0xff] %vm565_vm4, %v1874_v9  ;;  %2297 = vrot.lane.b32.xlu0 %v5162_v13, %s3315_s25 }
 0x2e6   :  { %2295 = vrot.lane.b32.xlu1 %v5157_v18, %s3315_s25 }
 0x2e7   :  { %v1880_v43 = vpop.permute.xlu0 %1879 }
 0x2e8   :  { %v1878_v38 = vpop.permute.xlu1 %1877  ;;  %1947 = vst.msk [vmem:[#allocation3 + $0x1e0] sm:$0xff] %vm565_vm4, %v1880_v43 }
 0x2e9   :  { %1946 = vst.msk [vmem:[#allocation3 + $0x1d8] sm:$0xff] %vm565_vm4, %v1878_v38  ;;  %2329 = vrot.lane.b32.xlu0 %v5298_v35, %s3315_s25 }
 0x2ea   :  { %2327 = vrot.lane.b32.xlu1 %v5293_v56, %s3315_s25 }
 0x2eb   :  { %v1884_v18 = vpop.permute.xlu0 %1883 }
 0x2ec   :  { %v1882_v40 = vpop.permute.xlu1 %1881  ;;  %1949 = vst.msk [vmem:[#allocation3 + $0x1f0] sm:$0xff] %vm565_vm4, %v1884_v18 }
 0x2ed   :  { %1948 = vst.msk [vmem:[#allocation3 + $0x1e8] sm:$0xff] %vm565_vm4, %v1882_v40  ;;  %2430 = vrot.lane.b32.xlu0 %v5419_v32, %s3316_s26 }
 0x2ee   :  { %2428 = vrot.lane.b32.xlu1 %v5414_v16, %s3316_s26 }
 0x2ef   :  { %v2032_v13 = vpop.permute.xlu0 %2031 }
 0x2f0   :  { %v1886_v39 = vpop.permute.xlu1 %1885  ;;  %2127 = vst.msk [vmem:[#allocation3 + $0x100] sm:$0xff] %vm775_vm5, %v2032_v13 }
 0x2f1   :  { %1950 = vst.msk [vmem:[#allocation3 + $0x1f8] sm:$0xff] %vm565_vm4, %v1886_v39  ;;  %2462 = vrot.lane.b32.xlu0 %v5542_v5, %s3316_s26 }
 0x2f2   :  { %2460 = vrot.lane.b32.xlu1 %v5536_v41, %s3316_s26 }
 0x2f3   :  { %v2036_v16 = vpop.permute.xlu0 %2035 }
 0x2f4   :  { %v2034_v8 = vpop.permute.xlu1 %2033  ;;  %2129 = vst.msk [vmem:[#allocation3 + $0x110] sm:$0xff] %vm775_vm5, %v2036_v16 }
 0x2f5   :  { %2128 = vst.msk [vmem:[#allocation3 + $0x108] sm:$0xff] %vm775_vm5, %v2034_v8  ;;  %2560 = vrot.lane.b32.xlu0 %v4741_v53, %s3317_s28  ;;  %v6635_v53 = vld [vmem:[#allocation36_spill] sm:$0xff] }
 0x2f6   :  { %2558 = vrot.lane.b32.xlu1 %v4731_v60, %s3317_s28 }
 0x2f7   :  { %v2040_v32 = vpop.permute.xlu0 %2039 }
 0x2f8   :  { %v2038_v1 = vpop.permute.xlu1 %2037  ;;  %2131 = vst.msk [vmem:[#allocation3 + $0x120] sm:$0xff] %vm775_vm5, %v2040_v32 }
 0x2f9   :  { %2130 = vst.msk [vmem:[#allocation3 + $0x118] sm:$0xff] %vm775_vm5, %v2038_v1  ;;  %2592 = vrot.lane.b32.xlu0 %v4917_v27, %s3317_s28 }
 0x2fa   :  { %2590 = vrot.lane.b32.xlu1 %v4907_v44, %s3317_s28  ;;  %v6636_v44 = vld [vmem:[#allocation16_spill] sm:$0xff] }
 0x2fb   :  { %v2044_v60 = vpop.permute.xlu0 %2043 }
 0x2fc   :  { %v2042_v29 = vpop.permute.xlu1 %2041  ;;  %2133 = vst.msk [vmem:[#allocation3 + $0x130] sm:$0xff] %vm775_vm5, %v2044_v60  ;;  %v6641_v60 = vld [vmem:[#allocation19_spill] sm:$0xff] }
 0x2fd   :  { %2132 = vst.msk [vmem:[#allocation3 + $0x128] sm:$0xff] %vm775_vm5, %v2042_v29  ;;  %2694 = vrot.lane.b32.xlu0 %v6635_v53, %s3318_s10  ;;  %v6640_v29 = vld [vmem:[#allocation18_spill] sm:$0xff] }
 0x2fe   :  { %2692 = vrot.lane.b32.xlu1 %v5174_v34, %s3318_s10 }
 0x2ff   :  { %v2048_v22 = vpop.permute.xlu0 %2047 }
 0x300   :  { %v2046_v46 = vpop.permute.xlu1 %2045  ;;  %2135 = vst.msk [vmem:[#allocation3 + $0x140] sm:$0xff] %vm775_vm5, %v2048_v22 }
 0x301   :  { %2134 = vst.msk [vmem:[#allocation3 + $0x138] sm:$0xff] %vm775_vm5, %v2046_v46  ;;  %2726 = vrot.lane.b32.xlu0 %v6637_v37, %s3318_s10 }
 0x302   :  { %2724 = vrot.lane.b32.xlu1 %v6636_v44, %s3318_s10 }
 0x303   :  { %v2052_v11 = vpop.permute.xlu0 %2051 }
 0x304   :  { %v2050_v51 = vpop.permute.xlu1 %2049  ;;  %2137 = vst.msk [vmem:[#allocation3 + $0x150] sm:$0xff] %vm775_vm5, %v2052_v11 }
 0x305   :  { %2136 = vst.msk [vmem:[#allocation3 + $0x148] sm:$0xff] %vm775_vm5, %v2050_v51  ;;  %2827 = vrot.lane.b32.xlu0 %v5434_v33, %s3319_s29 }
 0x306   :  { %2825 = vrot.lane.b32.xlu1 %v5429_v4, %s3319_s29 }
 0x307   :  { %v2056_v9 = vpop.permute.xlu0 %2055 }
 0x308   :  { %v2054_v31 = vpop.permute.xlu1 %2053  ;;  %2139 = vst.msk [vmem:[#allocation3 + $0x160] sm:$0xff] %vm775_vm5, %v2056_v9 }
 0x309   :  { %2138 = vst.msk [vmem:[#allocation3 + $0x158] sm:$0xff] %vm775_vm5, %v2054_v31  ;;  %2859 = vrot.lane.b32.xlu0 %v5558_v12, %s3319_s29 }
 0x30a   :  { %2857 = vrot.lane.b32.xlu1 %v5552_v19, %s3319_s29 }
 0x30b   :  { %v2060_v38 = vpop.permute.xlu0 %2059 }
 0x30c   :  { %v2058_v28 = vpop.permute.xlu1 %2057  ;;  %2141 = vst.msk [vmem:[#allocation3 + $0x170] sm:$0xff] %vm775_vm5, %v2060_v38 }
 0x30d   :  { %2140 = vst.msk [vmem:[#allocation3 + $0x168] sm:$0xff] %vm775_vm5, %v2058_v28  ;;  %2299 = vrot.lane.b32.xlu0 %v5174_v34, %s3315_s25 }
 0x30e   :  { %2199 = vrot.lane.b32.xlu1 %v4917_v27, %s3314_s24 }
 0x30f   :  { %v2064_v40 = vpop.permute.xlu0 %2063 }
 0x310   :  { %v2062_v43 = vpop.permute.xlu1 %2061  ;;  %2143 = vst.msk [vmem:[#allocation3 + $0x180] sm:$0xff] %vm775_vm5, %v2064_v40 }
 0x311   :  { %2142 = vst.msk [vmem:[#allocation3 + $0x178] sm:$0xff] %vm775_vm5, %v2062_v43  ;;  %2331 = vrot.lane.b32.xlu0 %v6636_v44, %s3315_s25  ;;  %v6642_v44 = vld [vmem:[#allocation32_spill] sm:$0xff] }
 0x312   :  { %2301 = vrot.lane.b32.xlu1 %v6635_v53, %s3315_s25 }
 0x313   :  { %v2068_v27 = vpop.permute.xlu0 %2067 }
 0x314   :  { %v2066_v18 = vpop.permute.xlu1 %2065  ;;  %2145 = vst.msk [vmem:[#allocation3 + $0x190] sm:$0xff] %vm775_vm5, %v2068_v27 }
 0x315   :  { %2144 = vst.msk [vmem:[#allocation3 + $0x188] sm:$0xff] %vm775_vm5, %v2066_v18  ;;  %2432 = vrot.lane.b32.xlu0 %v5429_v4, %s3316_s26 }
 0x316   :  { %2333 = vrot.lane.b32.xlu1 %v6637_v37, %s3315_s25 }
 0x317   :  { %v2072_v34 = vpop.permute.xlu0 %2071 }
 0x318   :  { %v2070_v39 = vpop.permute.xlu1 %2069  ;;  %2147 = vst.msk [vmem:[#allocation3 + $0x1a0] sm:$0xff] %vm775_vm5, %v2072_v34 }
 0x319   :  { %2146 = vst.msk [vmem:[#allocation3 + $0x198] sm:$0xff] %vm775_vm5, %v2070_v39  ;;  %2464 = vrot.lane.b32.xlu0 %v5552_v19, %s3316_s26 }
 0x31a   :  { %2434 = vrot.lane.b32.xlu1 %v5434_v33, %s3316_s26 }
 0x31b   :  { %v2076_v8 = vpop.permute.xlu0 %2075 }
 0x31c   :  { %v2074_v13 = vpop.permute.xlu1 %2073  ;;  %2149 = vst.msk [vmem:[#allocation3 + $0x1b0] sm:$0xff] %vm775_vm5, %v2076_v8 }
 0x31d   :  { %2148 = vst.msk [vmem:[#allocation3 + $0x1a8] sm:$0xff] %vm775_vm5, %v2074_v13  ;;  %2562 = vrot.lane.b32.xlu0 %v4753_v59, %s3317_s28  ;;  %v6638_v59 = vld [vmem:[#allocation4_spill] sm:$0xff] }
 0x31e   :  { %2466 = vrot.lane.b32.xlu1 %v5558_v12, %s3316_s26 }
 0x31f   :  { %v2080_v4 = vpop.permute.xlu0 %2079 }
 0x320   :  { %v2078_v16 = vpop.permute.xlu1 %2077  ;;  %2151 = vst.msk [vmem:[#allocation3 + $0x1c0] sm:$0xff] %vm775_vm5, %v2080_v4  ;;  %v6647_v4 = vld [vmem:[#allocation21_spill] sm:$0xff] }
 0x321   :  { %2150 = vst.msk [vmem:[#allocation3 + $0x1b8] sm:$0xff] %vm775_vm5, %v2078_v16  ;;  %2594 = vrot.lane.b32.xlu0 %v4929_v45, %s3317_s28  ;;  %v6646_v16 = vld [vmem:[#allocation20_spill] sm:$0xff] }
 0x322   :  { %2564 = vrot.lane.b32.xlu1 %v4763_v2, %s3317_s28  ;;  %v6639_v2 = vld [vmem:[#allocation5_spill] sm:$0xff] }
 0x323   :  { %v2084_v19 = vpop.permute.xlu0 %2083 }
 0x324   :  { %v2082_v33 = vpop.permute.xlu1 %2081  ;;  %2153 = vst.msk [vmem:[#allocation3 + $0x1d0] sm:$0xff] %vm775_vm5, %v2084_v19 }
 0x325   :  { %2152 = vst.msk [vmem:[#allocation3 + $0x1c8] sm:$0xff] %vm775_vm5, %v2082_v33  ;;  %2696 = vrot.lane.b32.xlu0 %v6638_v59, %s3318_s10 }
 0x326   :  { %2596 = vrot.lane.b32.xlu1 %v4939_v62, %s3317_s28 }
 0x327   :  { %v2088_v1 = vpop.permute.xlu0 %2087 }
 0x328   :  { %v2086_v12 = vpop.permute.xlu1 %2085  ;;  %2155 = vst.msk [vmem:[#allocation3 + $0x1e0] sm:$0xff] %vm775_vm5, %v2088_v1 }
 0x329   :  { %2154 = vst.msk [vmem:[#allocation3 + $0x1d8] sm:$0xff] %vm775_vm5, %v2086_v12  ;;  %2728 = vrot.lane.b32.xlu0 %v6640_v29, %s3318_s10  ;;  %v6648_v12 = vld [vmem:[#allocation33_spill] sm:$0xff] }
 0x32a   :  { %2698 = vrot.lane.b32.xlu1 %v6639_v2, %s3318_s10 }
 0x32b   :  { %v2092_v46 = vpop.permute.xlu0 %2091 }
 0x32c   :  { %v2090_v32 = vpop.permute.xlu1 %2089  ;;  %2157 = vst.msk [vmem:[#allocation3 + $0x1f0] sm:$0xff] %vm775_vm5, %v2092_v46 }
 0x32d   :  { %2156 = vst.msk [vmem:[#allocation3 + $0x1e8] sm:$0xff] %vm775_vm5, %v2090_v32  ;;  %2829 = vrot.lane.b32.xlu0 %v5444_v25, %s3319_s29 }
 0x32e   :  { %2730 = vrot.lane.b32.xlu1 %v6641_v60, %s3318_s10 }
 0x32f   :  { %v2162_v22 = vpop.permute.xlu0 %2161 }
 0x330   :  { %v2094_v53 = vpop.permute.xlu1 %2093  ;;  %2257 = vst.msk [vmem:[#allocation3 + $0x100] sm:$0xff] %vm906_vm6, %v2162_v22 }
 0x331   :  { %2158 = vst.msk [vmem:[#allocation3 + $0x1f8] sm:$0xff] %vm775_vm5, %v2094_v53  ;;  %2861 = vrot.lane.b32.xlu0 %v5569_v23, %s3319_s29 }
 0x332   :  { %2831 = vrot.lane.b32.xlu1 %v6642_v44, %s3319_s29 }
 0x333   :  { %v2166_v37 = vpop.permute.xlu0 %2165 }
 0x334   :  { %v2164_v51 = vpop.permute.xlu1 %2163  ;;  %2259 = vst.msk [vmem:[#allocation3 + $0x110] sm:$0xff] %vm906_vm6, %v2166_v37 }
 0x335   :  { %2258 = vst.msk [vmem:[#allocation3 + $0x108] sm:$0xff] %vm906_vm6, %v2164_v51  ;;  %2201 = vrot.lane.b32.xlu0 %v4929_v45, %s3314_s24 }
 0x336   :  { %2863 = vrot.lane.b32.xlu1 %v5574_v14, %s3319_s29 }
 0x337   :  { %v2170_v31 = vpop.permute.xlu0 %2169 }
 0x338   :  { %v2168_v11 = vpop.permute.xlu1 %2167  ;;  %2261 = vst.msk [vmem:[#allocation3 + $0x120] sm:$0xff] %vm906_vm6, %v2170_v31 }
 0x339   :  { %2260 = vst.msk [vmem:[#allocation3 + $0x118] sm:$0xff] %vm906_vm6, %v2168_v11  ;;  %2303 = vrot.lane.b32.xlu0 %v6638_v59, %s3315_s25  ;;  %v6649_v59 = vld [vmem:[#allocation34_spill] sm:$0xff] }
 0x33a   :  { %2203 = vrot.lane.b32.xlu1 %v4939_v62, %s3314_s24 }
 0x33b   :  { %v2174_v28 = vpop.permute.xlu0 %2173 }
 0x33c   :  { %v2172_v9 = vpop.permute.xlu1 %2171  ;;  %2263 = vst.msk [vmem:[#allocation3 + $0x130] sm:$0xff] %vm906_vm6, %v2174_v28 }
 0x33d   :  { %2262 = vst.msk [vmem:[#allocation3 + $0x128] sm:$0xff] %vm906_vm6, %v2172_v9  ;;  %2335 = vrot.lane.b32.xlu0 %v6640_v29, %s3315_s25  ;;  %v187_v9 = vld [vmem:[%s6327_s0 + $0x1f0] sm:$0xff] }
 0x33e   :  { %2305 = vrot.lane.b32.xlu1 %v6639_v2, %s3315_s25  ;;  %252 = vst.msk [vmem:[#allocation2 + $0x331] sm:$0xff] %vm15_vm0, %v187_v9 }
 0x33f   :  { %v2178_v45 = vpop.permute.xlu0 %2177 }
 0x340   :  { %v2176_v38 = vpop.permute.xlu1 %2175  ;;  %2265 = vst.msk [vmem:[#allocation3 + $0x140] sm:$0xff] %vm906_vm6, %v2178_v45  ;;  %v6651_v45 = vld [vmem:[#allocation9_spill] sm:$0xff] }
 0x341   :  { %2264 = vst.msk [vmem:[#allocation3 + $0x138] sm:$0xff] %vm906_vm6, %v2176_v38  ;;  %2436 = vrot.lane.b32.xlu0 %v5444_v25, %s3316_s26  ;;  %v6650_v38 = vld [vmem:[#allocation8_spill] sm:$0xff] }
 0x342   :  { %2337 = vrot.lane.b32.xlu1 %v6641_v60, %s3315_s25 }
 0x343   :  { %v2182_v43 = vpop.permute.xlu0 %2181 }
 0x344   :  { %v2180_v62 = vpop.permute.xlu1 %2179  ;;  %2267 = vst.msk [vmem:[#allocation3 + $0x150] sm:$0xff] %vm906_vm6, %v2182_v43 }
 0x345   :  { %2266 = vst.msk [vmem:[#allocation3 + $0x148] sm:$0xff] %vm906_vm6, %v2180_v62  ;;  %2468 = vrot.lane.b32.xlu0 %v5569_v23, %s3316_s26  ;;  %v6643_v23 = vld [vmem:[#allocation27_spill] sm:$0xff] }
 0x346   :  { %2438 = vrot.lane.b32.xlu1 %v6642_v44, %s3316_s26 }
 0x347   :  { %v2186_v18 = vpop.permute.xlu0 %2185 }
 0x348   :  { %v2184_v40 = vpop.permute.xlu1 %2183  ;;  %2269 = vst.msk [vmem:[#allocation3 + $0x160] sm:$0xff] %vm906_vm6, %v2186_v18  ;;  %v6652_v18 = vld [vmem:[#allocation22_spill] sm:$0xff] }
 0x349   :  { %2268 = vst.msk [vmem:[#allocation3 + $0x158] sm:$0xff] %vm906_vm6, %v2184_v40  ;;  %2566 = vrot.lane.b32.xlu0 %v4775_v48, %s3317_s28  ;;  %v6644_v48 = vld [vmem:[#allocation6_spill] sm:$0xff] }
 0x34a   :  { %2470 = vrot.lane.b32.xlu1 %v5574_v14, %s3316_s26 }
 0x34b   :  { %v2190_v25 = vpop.permute.xlu0 %2189 }
 0x34c   :  { %v2188_v27 = vpop.permute.xlu1 %2187  ;;  %2271 = vst.msk [vmem:[#allocation3 + $0x170] sm:$0xff] %vm906_vm6, %v2190_v25  ;;  %v6653_v25 = vld [vmem:[#allocation23_spill] sm:$0xff] }
 0x34d   :  { %2270 = vst.msk [vmem:[#allocation3 + $0x168] sm:$0xff] %vm906_vm6, %v2188_v27  ;;  %2598 = vrot.lane.b32.xlu0 %v4951_v6, %s3317_s28 }
 0x34e   :  { %2568 = vrot.lane.b32.xlu1 %v4777_v61, %s3317_s28  ;;  %v6645_v61 = vld [vmem:[#allocation7_spill] sm:$0xff] }
 0x34f   :  { %v2194_v14 = vpop.permute.xlu0 %2193 }
 0x350   :  { %v2192_v39 = vpop.permute.xlu1 %2191  ;;  %2273 = vst.msk [vmem:[#allocation3 + $0x180] sm:$0xff] %vm906_vm6, %v2194_v14 }
 0x351   :  { %2272 = vst.msk [vmem:[#allocation3 + $0x178] sm:$0xff] %vm906_vm6, %v2192_v39  ;;  %2700 = vrot.lane.b32.xlu0 %v6644_v48, %s3318_s10 }
 0x352   :  { %2600 = vrot.lane.b32.xlu1 %v6643_v23, %s3317_s28 }
 0x353   :  { %v2198_v13 = vpop.permute.xlu0 %2197 }
 0x354   :  { %v2196_v34 = vpop.permute.xlu1 %2195  ;;  %2275 = vst.msk [vmem:[#allocation3 + $0x190] sm:$0xff] %vm906_vm6, %v2198_v13  ;;  %v6654_v13 = vld [vmem:[#allocation35_spill] sm:$0xff] }
 0x355   :  { %2274 = vst.msk [vmem:[#allocation3 + $0x188] sm:$0xff] %vm906_vm6, %v2196_v34  ;;  %2732 = vrot.lane.b32.xlu0 %v6646_v16, %s3318_s10 }
 0x356   :  { %2702 = vrot.lane.b32.xlu1 %v6645_v61, %s3318_s10 }
 0x357   :  { %v2298_v33 = vpop.permute.xlu0 %2297 }
 0x358   :  { %v2296_v8 = vpop.permute.xlu1 %2295  ;;  %2392 = vst.msk [vmem:[#allocation3 + $0x108] sm:$0xff] %vm1041_vm7, %v2298_v33 }
 0x359   :  { %2391 = vst.msk [vmem:[#allocation3 + $0x100] sm:$0xff] %vm1041_vm7, %v2296_v8  ;;  %2833 = vrot.lane.b32.xlu0 %v6648_v12, %s3319_s29  ;;  %v6655_v8 = vld [vmem:[#allocation37_spill] sm:$0xff] }
 0x35a   :  { %2734 = vrot.lane.b32.xlu1 %v6647_v4, %s3318_s10 }
 0x35b   :  { %v2330_v2 = vpop.permute.xlu0 %2329 }
 0x35c   :  { %v2328_v19 = vpop.permute.xlu1 %2327  ;;  %2408 = vst.msk [vmem:[#allocation3 + $0x188] sm:$0xff] %vm1041_vm7, %v2330_v2 }
 0x35d   :  { %2407 = vst.msk [vmem:[#allocation3 + $0x180] sm:$0xff] %vm1041_vm7, %v2328_v19  ;;  %2865 = vrot.lane.b32.xlu0 %v5584_v30, %s3319_s29 }
 0x35e   :  { %2835 = vrot.lane.b32.xlu1 %v6649_v59, %s3319_s29 }
 0x35f   :  { %v2431_v32 = vpop.permute.xlu0 %2430 }
 0x360   :  { %v2429_v1 = vpop.permute.xlu1 %2428  ;;  %2525 = vst.msk [vmem:[#allocation3 + $0x108] sm:$0xff] %vm1175_vm8, %v2431_v32 }
 0x361   :  { %2524 = vst.msk [vmem:[#allocation3 + $0x100] sm:$0xff] %vm1175_vm8, %v2429_v1  ;;  %2205 = vrot.lane.b32.xlu0 %v4951_v6, %s3314_s24 }
 0x362   :  { %2867 = vrot.lane.b32.xlu1 %v5590_v42, %s3319_s29 }
 0x363   :  { %v2463_v60 = vpop.permute.xlu0 %2462 }
 0x364   :  { %v2461_v29 = vpop.permute.xlu1 %2460  ;;  %2541 = vst.msk [vmem:[#allocation3 + $0x188] sm:$0xff] %vm1175_vm8, %v2463_v60 }
 0x365   :  { %2540 = vst.msk [vmem:[#allocation3 + $0x180] sm:$0xff] %vm1175_vm8, %v2461_v29  ;;  %2307 = vrot.lane.b32.xlu0 %v6644_v48, %s3315_s25 }
 0x366   :  { %2207 = vrot.lane.b32.xlu1 %v6643_v23, %s3314_s24 }
 0x367   :  { %v2561_v53 = vpop.permute.xlu0 %2560 }
 0x368   :  { %v2559_v46 = vpop.permute.xlu1 %2558  ;;  %2655 = vst.msk [vmem:[#allocation3 + $0x108] sm:$0xff] %vm1306_vm9, %v2561_v53 }
 0x369   :  { %2654 = vst.msk [vmem:[#allocation3 + $0x100] sm:$0xff] %vm1306_vm9, %v2559_v46  ;;  %2339 = vrot.lane.b32.xlu0 %v6646_v16, %s3315_s25 }
 0x36a   :  { %2309 = vrot.lane.b32.xlu1 %v6645_v61, %s3315_s25 }
 0x36b   :  { %v2593_v6 = vpop.permute.xlu0 %2592 }
 0x36c   :  { %v2591_v44 = vpop.permute.xlu1 %2590  ;;  %2671 = vst.msk [vmem:[#allocation3 + $0x188] sm:$0xff] %vm1306_vm9, %v2593_v6 }
 0x36d   :  { %2670 = vst.msk [vmem:[#allocation3 + $0x180] sm:$0xff] %vm1306_vm9, %v2591_v44  ;;  %2440 = vrot.lane.b32.xlu0 %v6648_v12, %s3316_s26 }
 0x36e   :  { %2341 = vrot.lane.b32.xlu1 %v6647_v4, %s3315_s25 }
 0x36f   :  { %v2695_v51 = vpop.permute.xlu0 %2694 }
 0x370   :  { %v2693_v22 = vpop.permute.xlu1 %2692  ;;  %2789 = vst.msk [vmem:[#allocation3 + $0x108] sm:$0xff] %vm1441_vm10, %v2695_v51 }
 0x371   :  { %2788 = vst.msk [vmem:[#allocation3 + $0x100] sm:$0xff] %vm1441_vm10, %v2693_v22  ;;  %2472 = vrot.lane.b32.xlu0 %v5584_v30, %s3316_s26  ;;  %v188_v30 = vld [vmem:[%s6327_s0 + $0x1f8] sm:$0xff] }
 0x372   :  { %2442 = vrot.lane.b32.xlu1 %v6649_v59, %s3316_s26  ;;  %253 = vst.msk [vmem:[#allocation2 + $0x339] sm:$0xff] %vm15_vm0, %v188_v30 }
 0x373   :  { %v2727_v11 = vpop.permute.xlu0 %2726 }
 0x374   :  { %v2725_v37 = vpop.permute.xlu1 %2724  ;;  %2805 = vst.msk [vmem:[#allocation3 + $0x188] sm:$0xff] %vm1441_vm10, %v2727_v11  ;;  %v6659_v11 = vld [vmem:[#allocation11_spill] sm:$0xff] }
 0x375   :  { %2804 = vst.msk [vmem:[#allocation3 + $0x180] sm:$0xff] %vm1441_vm10, %v2725_v37  ;;  %2570 = vrot.lane.b32.xlu0 %v4797_v47, %s3317_s28 }
 0x376   :  { %2474 = vrot.lane.b32.xlu1 %v5590_v42, %s3316_s26 }
 0x377   :  { %v2828_v42 = vpop.permute.xlu0 %2827 }
 0x378   :  { %v2826_v31 = vpop.permute.xlu1 %2825  ;;  %2922 = vst.msk [vmem:[#allocation3 + $0x108] sm:$0xff] %vm1575_vm11, %v2828_v42 }
 0x379   :  { %2921 = vst.msk [vmem:[#allocation3 + $0x100] sm:$0xff] %vm1575_vm11, %v2826_v31  ;;  %2602 = vrot.lane.b32.xlu0 %v4973_v58, %s3317_s28 }
 0x37a   :  { %2572 = vrot.lane.b32.xlu1 %v4799_v20, %s3317_s28 }
 0x37b   :  { %v2860_v47 = vpop.permute.xlu0 %2859 }
 0x37c   :  { %v2858_v28 = vpop.permute.xlu1 %2857  ;;  %2938 = vst.msk [vmem:[#allocation3 + $0x188] sm:$0xff] %vm1575_vm11, %v2860_v47  ;;  %v6660_v47 = vld [vmem:[#allocation24_spill] sm:$0xff] }
 0x37d   :  { %2937 = vst.msk [vmem:[#allocation3 + $0x180] sm:$0xff] %vm1575_vm11, %v2858_v28  ;;  %2704 = vrot.lane.b32.xlu0 %v6650_v38, %s3318_s10 }
 0x37e   :  { %2604 = vrot.lane.b32.xlu1 %v4975_v63, %s3317_s28 }
 0x37f   :  { %v2300_v62 = vpop.permute.xlu0 %2299  ;;  %v2986_v43 = vld [vmem:[#allocation3 + $0x108] sm:$0xff] }
 0x380   :  { %v2200_v20 = vpop.permute.xlu1 %2199  ;;  %2393 = vst.msk [vmem:[#allocation3 + $0x110] sm:$0xff] %vm1041_vm7, %v2300_v62  ;;  %v2985_v27 = vld [vmem:[#allocation3 + $0x100] sm:$0xff] }
 0x381   :  { %2276 = vst.msk [vmem:[#allocation3 + $0x198] sm:$0xff] %vm906_vm6, %v2200_v20  ;;  %2736 = vrot.lane.b32.xlu0 %v6652_v18, %s3318_s10  ;;  %v3033_v39 = vpack.c.bf16 %v2986_v43, %v2985_v27 }
 0x382   :  { %2706 = vrot.lane.b32.xlu1 %v6651_v45, %s3318_s10 }
 0x383   :  { %v2332_v23 = vpop.permute.xlu0 %2331  ;;  %v3002_v34 = vld [vmem:[#allocation3 + $0x188] sm:$0xff]  ;;  %v3109_v16 = vsel %vm3056_vm12, %v3033_v39, 0 }
 0x384   :  { %v2302_v40 = vpop.permute.xlu1 %2301  ;;  %v3001_v14 = vld [vmem:[#allocation3 + $0x180] sm:$0xff]  ;;  %2409 = vst.msk [vmem:[#allocation3 + $0x190] sm:$0xff] %vm1041_vm7, %v2332_v23 }
 0x385   :  { %2394 = vst.msk [vmem:[#allocation3 + $0x118] sm:$0xff] %vm1041_vm7, %v2302_v40  ;;  %v3041_v61 = vpack.c.bf16 %v3002_v34, %v3001_v14  ;;  %2837 = vrot.lane.b32.xlu0 %v6654_v13, %s3319_s29  ;;  %v6662_v40 = vld [vmem:[#allocation38_spill] sm:$0xff] }
 0x386   :  { %2738 = vrot.lane.b32.xlu1 %v6653_v25, %s3318_s10 }
 0x387   :  { %3292 = vmatprep.subr.msk.bf16.mxu1 %vm3056_vm12, %v3041_v61  ;;  %v2433_v4 = vpop.permute.xlu0 %2432 }
 0x388   :  { %v2334_v48 = vpop.permute.xlu1 %2333  ;;  %3267 = vmatpush3.bf16.xpose.msra.mxu1 %v3109_v16  ;;  %2526 = vst.msk [vmem:[#allocation3 + $0x110] sm:$0xff] %vm1175_vm8, %v2433_v4 }
 0x389   :  { %2410 = vst.msk [vmem:[#allocation3 + $0x198] sm:$0xff] %vm1041_vm7, %v2334_v48  ;;  %2869 = vrot.lane.b32.xlu0 %v5601_v17, %s3319_s29 }
 0x38a   :  { %2839 = vrot.lane.b32.xlu1 %v6655_v8, %s3319_s29 }
 0x38b   :  { %v2465_v19 = vpop.permute.xlu0 %2464 }
 0x38c   :  { %v2435_v33 = vpop.permute.xlu1 %2434  ;;  %2542 = vst.msk [vmem:[#allocation3 + $0x190] sm:$0xff] %vm1175_vm8, %v2465_v19 }
 0x38d   :  { %2527 = vst.msk [vmem:[#allocation3 + $0x118] sm:$0xff] %vm1175_vm8, %v2435_v33  ;;  %2209 = vrot.lane.b32.xlu0 %v4973_v58, %s3314_s24 }
 0x38e   :  { %2871 = vrot.lane.b32.xlu1 %v5606_v15, %s3319_s29 }
 0x38f   :  { %v2563_v59 = vpop.permute.xlu0 %2562 }
 0x390   :  { %v2467_v12 = vpop.permute.xlu1 %2466  ;;  %2656 = vst.msk [vmem:[#allocation3 + $0x110] sm:$0xff] %vm1306_vm9, %v2563_v59 }
 0x391   :  { %2543 = vst.msk [vmem:[#allocation3 + $0x198] sm:$0xff] %vm1175_vm8, %v2467_v12  ;;  %2311 = vrot.lane.b32.xlu0 %v6650_v38, %s3315_s25  ;;  %v6661_v38 = vld [vmem:[#allocation25_spill] sm:$0xff] }
 0x392   :  { %2211 = vrot.lane.b32.xlu1 %v4975_v63, %s3314_s24 }
 0x393   :  { %v2595_v1 = vpop.permute.xlu0 %2594 }
 0x394   :  { %v2565_v2 = vpop.permute.xlu1 %2564  ;;  %2672 = vst.msk [vmem:[#allocation3 + $0x190] sm:$0xff] %vm1306_vm9, %v2595_v1  ;;  %v6665_v1 = vld [vmem:[#allocation13_spill] sm:$0xff] }
 0x395   :  { %2657 = vst.msk [vmem:[#allocation3 + $0x118] sm:$0xff] %vm1306_vm9, %v2565_v2  ;;  %2343 = vrot.lane.b32.xlu0 %v6652_v18, %s3315_s25  ;;  %v6663_v18 = vld [vmem:[#allocation39_spill] sm:$0xff] }
 0x396   :  { %2313 = vrot.lane.b32.xlu1 %v6651_v45, %s3315_s25 }
 0x397   :  { %v2697_v58 = vpop.permute.xlu0 %2696 }
 0x398   :  { %v2597_v32 = vpop.permute.xlu1 %2596  ;;  %2790 = vst.msk [vmem:[#allocation3 + $0x110] sm:$0xff] %vm1441_vm10, %v2697_v58 }
 0x399   :  { %2673 = vst.msk [vmem:[#allocation3 + $0x198] sm:$0xff] %vm1306_vm9, %v2597_v32  ;;  %2444 = vrot.lane.b32.xlu0 %v6654_v13, %s3316_s26 }
 0x39a   :  { %2345 = vrot.lane.b32.xlu1 %v6653_v25, %s3315_s25 }
 0x39b   :  { %v2729_v29 = vpop.permute.xlu0 %2728 }
 0x39c   :  { %v2699_v63 = vpop.permute.xlu1 %2698  ;;  %2806 = vst.msk [vmem:[#allocation3 + $0x190] sm:$0xff] %vm1441_vm10, %v2729_v29 }
 0x39d   :  { %2791 = vst.msk [vmem:[#allocation3 + $0x118] sm:$0xff] %vm1441_vm10, %v2699_v63  ;;  %2476 = vrot.lane.b32.xlu0 %v5601_v17, %s3316_s26  ;;  %v6656_v17 = vld [vmem:[#allocation28_spill] sm:$0xff] }
 0x39e   :  { %2446 = vrot.lane.b32.xlu1 %v6655_v8, %s3316_s26 }
 0x39f   :  { %v2830_v46 = vpop.permute.xlu0 %2829 }
 0x3a0   :  { %v2731_v60 = vpop.permute.xlu1 %2730  ;;  %2923 = vst.msk [vmem:[#allocation3 + $0x110] sm:$0xff] %vm1575_vm11, %v2830_v46  ;;  %v6666_v46 = vld [vmem:[#allocation26_spill] sm:$0xff] }
 0x3a1   :  { %2807 = vst.msk [vmem:[#allocation3 + $0x198] sm:$0xff] %vm1441_vm10, %v2731_v60  ;;  %2574 = vrot.lane.b32.xlu0 %v4819_v49, %s3317_s28 }
 0x3a2   :  { %2478 = vrot.lane.b32.xlu1 %v5606_v15, %s3316_s26  ;;  %v6657_v15 = vld [vmem:[#allocation29_spill] sm:$0xff] }
 0x3a3   :  { %v2862_v44 = vpop.permute.xlu0 %2861 }
 0x3a4   :  { %v2832_v53 = vpop.permute.xlu1 %2831  ;;  %2939 = vst.msk [vmem:[#allocation3 + $0x190] sm:$0xff] %vm1575_vm11, %v2862_v44  ;;  %v6667_v44 = vld [vmem:[#allocation31_spill] sm:$0xff] }
 0x3a5   :  { %2924 = vst.msk [vmem:[#allocation3 + $0x118] sm:$0xff] %vm1575_vm11, %v2832_v53  ;;  %2606 = vrot.lane.b32.xlu0 %v6656_v17, %s3317_s28 }
 0x3a6   :  { %2576 = vrot.lane.b32.xlu1 %v4829_v54, %s3317_s28  ;;  %v6658_v54 = vld [vmem:[#allocation10_spill] sm:$0xff] }
 0x3a7   :  { %v2202_v22 = vpop.permute.xlu0 %2201  ;;  %v2987_v49 = vld [vmem:[#allocation3 + $0x110] sm:$0xff] }
 0x3a8   :  { %v2864_v6 = vpop.permute.xlu1 %2863  ;;  %2277 = vst.msk [vmem:[#allocation3 + $0x1a0] sm:$0xff] %vm906_vm6, %v2202_v22  ;;  %v6668_v22 = vld [vmem:[#allocation40_spill] sm:$0xff] }
 0x3a9   :  { %2940 = vst.msk [vmem:[#allocation3 + $0x198] sm:$0xff] %vm1575_vm11, %v2864_v6  ;;  %2708 = vrot.lane.b32.xlu0 %v6658_v54, %s3318_s10 }
 0x3aa   :  { %2608 = vrot.lane.b32.xlu1 %v6657_v15, %s3317_s28 }
 0x3ab   :  { %v2304_v31 = vpop.permute.xlu0 %2303  ;;  %v3003_v9 = vld [vmem:[#allocation3 + $0x190] sm:$0xff] }
 0x3ac   :  { %v2204_v51 = vpop.permute.xlu1 %2203  ;;  %v2988_v37 = vld [vmem:[#allocation3 + $0x118] sm:$0xff]  ;;  %2395 = vst.msk [vmem:[#allocation3 + $0x120] sm:$0xff] %vm1041_vm7, %v2304_v31 }
 0x3ad   :  { %2278 = vst.msk [vmem:[#allocation3 + $0x1a8] sm:$0xff] %vm906_vm6, %v2204_v51  ;;  %v3034_v30 = vpack.c.bf16 %v2988_v37, %v2987_v49  ;;  %2740 = vrot.lane.b32.xlu0 %v6660_v47, %s3318_s10  ;;  %v6669_v51 = vld [vmem:[#allocation41_spill] sm:$0xff] }
 0x3ae   :  { %2710 = vrot.lane.b32.xlu1 %v6659_v11, %s3318_s10 }
 0x3af   :  { %v2336_v45 = vpop.permute.xlu0 %2335  ;;  %v3112_v62 = vsel %vm3056_vm12, %v3034_v30, 0 }
 0x3b0   :  { %v2306_v42 = vpop.permute.xlu1 %2305  ;;  %v3004_v28 = vld [vmem:[#allocation3 + $0x198] sm:$0xff]  ;;  %2411 = vst.msk [vmem:[#allocation3 + $0x1a0] sm:$0xff] %vm1041_vm7, %v2336_v45  ;;  %v1657_v45 = vld [vmem:[#allocation2 + $0x330] sm:$0xff] }
 0x3b1   :  { %2396 = vst.msk [vmem:[#allocation3 + $0x128] sm:$0xff] %vm1041_vm7, %v2306_v42  ;;  %v3042_v20 = vpack.c.bf16 %v3004_v28, %v3003_v9  ;;  %2841 = vrot.lane.b32.xlu0 %v6662_v40, %s3319_s29 }
 0x3b2   :  { %2742 = vrot.lane.b32.xlu1 %v6661_v38, %s3318_s10 }
 0x3b3   :  { %3293 = vmatprep.subr.msk.bf16.mxu1 %vm3056_vm12, %v3042_v20  ;;  %v2437_v27 = vpop.permute.xlu0 %2436 }
 0x3b4   :  { %3269 = vmatpush3.bf16.xpose.msra.mxu1 %v3112_v62  ;;  %v2338_v43 = vpop.permute.xlu1 %2337  ;;  %2528 = vst.msk [vmem:[#allocation3 + $0x120] sm:$0xff] %vm1175_vm8, %v2437_v27 }
 0x3b5   :  { %2412 = vst.msk [vmem:[#allocation3 + $0x1a8] sm:$0xff] %vm1041_vm7, %v2338_v43  ;;  %2873 = vrot.lane.b32.xlu0 %v5616_v55, %s3319_s29  ;;  %v1658_v43 = vld [vmem:[#allocation2 + $0x338] sm:$0xff] }
 0x3b6   :  { %2843 = vrot.lane.b32.xlu1 %v6663_v18, %s3319_s29 }
 0x3b7   :  { %v2469_v39 = vpop.permute.xlu0 %2468 }
 0x3b8   :  { %v2439_v25 = vpop.permute.xlu1 %2438  ;;  %2544 = vst.msk [vmem:[#allocation3 + $0x1a0] sm:$0xff] %vm1175_vm8, %v2469_v39 }
 0x3b9   :  { %2529 = vst.msk [vmem:[#allocation3 + $0x128] sm:$0xff] %vm1175_vm8, %v2439_v25  ;;  %2213 = vrot.lane.b32.xlu0 %v6656_v17, %s3314_s24 }
 0x3ba   :  { %2875 = vrot.lane.b32.xlu1 %v5622_v26, %s3319_s29 }
 0x3bb   :  { %v2567_v14 = vpop.permute.xlu0 %2566 }
 0x3bc   :  { %v2471_v23 = vpop.permute.xlu1 %2470  ;;  %2658 = vst.msk [vmem:[#allocation3 + $0x120] sm:$0xff] %vm1306_vm9, %v2567_v14  ;;  %v6671_v14 = vld [vmem:[#allocation15_spill] sm:$0xff] }
 0x3bd   :  { %2545 = vst.msk [vmem:[#allocation3 + $0x1a8] sm:$0xff] %vm1175_vm8, %v2471_v23  ;;  %2315 = vrot.lane.b32.xlu0 %v6658_v54, %s3315_s25  ;;  %v6670_v23 = vld [vmem:[#allocation14_spill] sm:$0xff] }
 0x3be   :  { %2215 = vrot.lane.b32.xlu1 %v6657_v15, %s3314_s24 }
 0x3bf   :  { %v2599_v48 = vpop.permute.xlu0 %2598 }
 0x3c0   :  { %v2569_v34 = vpop.permute.xlu1 %2568  ;;  %2674 = vst.msk [vmem:[#allocation3 + $0x1a0] sm:$0xff] %vm1306_vm9, %v2599_v48 }
 0x3c1   :  { %2659 = vst.msk [vmem:[#allocation3 + $0x128] sm:$0xff] %vm1306_vm9, %v2569_v34  ;;  %2347 = vrot.lane.b32.xlu0 %v6660_v47, %s3315_s25 }
 0x3c2   :  { %2317 = vrot.lane.b32.xlu1 %v6659_v11, %s3315_s25 }
 0x3c3   :  { %v2701_v13 = vpop.permute.xlu0 %2700 }
 0x3c4   :  { %v2601_v61 = vpop.permute.xlu1 %2600  ;;  %2792 = vst.msk [vmem:[#allocation3 + $0x120] sm:$0xff] %vm1441_vm10, %v2701_v13 }
 0x3c5   :  { %2675 = vst.msk [vmem:[#allocation3 + $0x1a8] sm:$0xff] %vm1306_vm9, %v2601_v61  ;;  %2448 = vrot.lane.b32.xlu0 %v6662_v40, %s3316_s26  ;;  %v1659_v40 = vld [vmem:[#allocation2 + $0x340] sm:$0x3] }
 0x3c6   :  { %2349 = vrot.lane.b32.xlu1 %v6661_v38, %s3315_s25 }
 0x3c7   :  { %v2733_v16 = vpop.permute.xlu0 %2732 }
 0x3c8   :  { %v2703_v8 = vpop.permute.xlu1 %2702  ;;  %2808 = vst.msk [vmem:[#allocation3 + $0x1a0] sm:$0xff] %vm1441_vm10, %v2733_v16 }
 0x3c9   :  { %2793 = vst.msk [vmem:[#allocation3 + $0x128] sm:$0xff] %vm1441_vm10, %v2703_v8  ;;  %2480 = vrot.lane.b32.xlu0 %v5616_v55, %s3316_s26 }
 0x3ca   :  { %2450 = vrot.lane.b32.xlu1 %v6663_v18, %s3316_s26  ;;  %v2291_v18 = vrot.slane %v1658_v43, 1 }
 0x3cb   :  { %v2834_v33 = vpop.permute.xlu0 %2833 }
 0x3cc   :  { %v2735_v4 = vpop.permute.xlu1 %2734  ;;  %2925 = vst.msk [vmem:[#allocation3 + $0x120] sm:$0xff] %vm1575_vm11, %v2834_v33 }
 0x3cd   :  { %2809 = vst.msk [vmem:[#allocation3 + $0x1a8] sm:$0xff] %vm1441_vm10, %v2735_v4  ;;  %2578 = vrot.lane.b32.xlu0 %v4841_v0, %s3317_s28 }
 0x3ce   :  { %2482 = vrot.lane.b32.xlu1 %v5622_v26, %s3316_s26 }
 0x3cf   :  { %v2866_v12 = vpop.permute.xlu0 %2865 }
 0x3d0   :  { %v2836_v19 = vpop.permute.xlu1 %2835  ;;  %2941 = vst.msk [vmem:[#allocation3 + $0x1a0] sm:$0xff] %vm1575_vm11, %v2866_v12  ;;  %v2424_v12 = vrot.slane %v1658_v43, 2 }
 0x3d1   :  { %2926 = vst.msk [vmem:[#allocation3 + $0x128] sm:$0xff] %vm1575_vm11, %v2836_v19  ;;  %2610 = vrot.lane.b32.xlu0 %v6620_v57, %s3317_s28  ;;  %v2423_v19 = vrot.slane %v1657_v45, 2 }
 0x3d2   :  { %2580 = vrot.lane.b32.xlu1 %v4851_v3, %s3317_s28  ;;  %v6664_v3 = vld [vmem:[#allocation12_spill] sm:$0xff] }
 0x3d3   :  { %v2206_v55 = vpop.permute.xlu0 %2205  ;;  %v2989_v0 = vld [vmem:[#allocation3 + $0x120] sm:$0xff] }
 0x3d4   :  { %v2868_v59 = vpop.permute.xlu1 %2867  ;;  %2279 = vst.msk [vmem:[#allocation3 + $0x1b0] sm:$0xff] %vm906_vm6, %v2206_v55 }
 0x3d5   :  { %2942 = vst.msk [vmem:[#allocation3 + $0x1a8] sm:$0xff] %vm1575_vm11, %v2868_v59  ;;  %2712 = vrot.lane.b32.xlu0 %v6664_v3, %s3318_s10 }
 0x3d6   :  { %2612 = vrot.lane.b32.xlu1 %v5019_v24, %s3317_s28 }
 0x3d7   :  { %v2308_v32 = vpop.permute.xlu0 %2307  ;;  %v3005_v58 = vld [vmem:[#allocation3 + $0x1a0] sm:$0xff] }
 0x3d8   :  { %v2208_v26 = vpop.permute.xlu1 %2207  ;;  %v2990_v2 = vld [vmem:[#allocation3 + $0x128] sm:$0xff]  ;;  %2397 = vst.msk [vmem:[#allocation3 + $0x130] sm:$0xff] %vm1041_vm7, %v2308_v32 }
 0x3d9   :  { %2280 = vst.msk [vmem:[#allocation3 + $0x1b8] sm:$0xff] %vm906_vm6, %v2208_v26  ;;  %v3035_v63 = vpack.c.bf16 %v2990_v2, %v2989_v0  ;;  %2744 = vrot.lane.b32.xlu0 %v6666_v46, %s3318_s10  ;;  %v2426_v26 = vrot.slane %v1659_v40, 2  ;;  %v6672_v2 = vld [vmem:[#allocation30_spill] sm:$0xff] }
 0x3da   :  { %2714 = vrot.lane.b32.xlu1 %v6665_v1, %s3318_s10 }
 0x3db   :  { %v2340_v6 = vpop.permute.xlu0 %2339  ;;  %v3115_v17 = vsel %vm3056_vm12, %v3035_v63, 0 }
 0x3dc   :  { %v2310_v29 = vpop.permute.xlu1 %2309  ;;  %v3006_v60 = vld [vmem:[#allocation3 + $0x1a8] sm:$0xff]  ;;  %2413 = vst.msk [vmem:[#allocation3 + $0x1b0] sm:$0xff] %vm1041_vm7, %v2340_v6 }
 0x3dd   :  { %2398 = vst.msk [vmem:[#allocation3 + $0x138] sm:$0xff] %vm1041_vm7, %v2310_v29  ;;  %v3043_v53 = vpack.c.bf16 %v3006_v60, %v3005_v58  ;;  %2845 = vrot.lane.b32.xlu0 %v6668_v22, %s3319_s29  ;;  %v2427_v58 = vsel %vm598_vm3, %v2424_v12, %v2426_v26 }
 0x3de   :  { %2746 = vrot.lane.b32.xlu1 %v6667_v44, %s3318_s10 }
 0x3df   :  { %3294 = vmatprep.subr.msk.bf16.mxu1 %vm3056_vm12, %v3043_v53  ;;  %v2441_v49 = vpop.permute.xlu0 %2440 }
 0x3e0   :  { %3271 = vmatpush3.bf16.xpose.msra.mxu1 %v3115_v17  ;;  %v2342_v15 = vpop.permute.xlu1 %2341  ;;  %2530 = vst.msk [vmem:[#allocation3 + $0x130] sm:$0xff] %vm1175_vm8, %v2441_v49 }
 0x3e1   :  { %2414 = vst.msk [vmem:[#allocation3 + $0x1b8] sm:$0xff] %vm1041_vm7, %v2342_v15  ;;  %2877 = vrot.lane.b32.xlu0 %v5633_v7, %s3319_s29 }
 0x3e2   :  { %2847 = vrot.lane.b32.xlu1 %v6669_v51, %s3319_s29 }
 0x3e3   :  { %v2473_v54 = vpop.permute.xlu0 %2472 }
 0x3e4   :  { %v2443_v37 = vpop.permute.xlu1 %2442  ;;  %2546 = vst.msk [vmem:[#allocation3 + $0x1b0] sm:$0xff] %vm1175_vm8, %v2473_v54  ;;  %v1660_v54 = vld [vmem:[#allocation2 + $0x348] sm:$0xff] }
 0x3e5   :  { %2531 = vst.msk [vmem:[#allocation3 + $0x138] sm:$0xff] %vm1175_vm8, %v2443_v37  ;;  %2217 = vrot.lane.b32.xlu0 %v6620_v57, %s3314_s24 }
 0x3e6   :  { %2879 = vrot.lane.b32.xlu1 %v5636_v10, %s3319_s29 }
 0x3e7   :  { %v2571_v31 = vpop.permute.xlu0 %2570 }
 0x3e8   :  { %v2475_v11 = vpop.permute.xlu1 %2474  ;;  %2660 = vst.msk [vmem:[#allocation3 + $0x130] sm:$0xff] %vm1306_vm9, %v2571_v31  ;;  %v1661_v31 = vld [vmem:[#allocation2 + $0x350] sm:$0xff] }
 0x3e9   :  { %2547 = vst.msk [vmem:[#allocation3 + $0x1b8] sm:$0xff] %vm1175_vm8, %v2475_v11  ;;  %2319 = vrot.lane.b32.xlu0 %v6664_v3, %s3315_s25  ;;  %v6673_v3 = vld [vmem:[#allocation42_spill] sm:$0xff] }
 0x3ea   :  { %2219 = vrot.lane.b32.xlu1 %v5019_v24, %s3314_s24 }
 0x3eb   :  { %v2603_v30 = vpop.permute.xlu0 %2602 }
 0x3ec   :  { %v2573_v9 = vpop.permute.xlu1 %2572  ;;  %2676 = vst.msk [vmem:[#allocation3 + $0x1b0] sm:$0xff] %vm1306_vm9, %v2603_v30  ;;  %v1662_v30 = vld [vmem:[#allocation2 + $0x358] sm:$0x3] }
 0x3ed   :  { %2661 = vst.msk [vmem:[#allocation3 + $0x138] sm:$0xff] %vm1306_vm9, %v2573_v9  ;;  %2351 = vrot.lane.b32.xlu0 %v6666_v46, %s3315_s25 }
 0x3ee   :  { %2321 = vrot.lane.b32.xlu1 %v6665_v1, %s3315_s25  ;;  %v2425_v1 = vsel %vm598_vm3, %v2423_v19, %v2424_v12 }
 0x3ef   :  { %v2705_v24 = vpop.permute.xlu0 %2704 }
 0x3f0   :  { %v2605_v42 = vpop.permute.xlu1 %2604  ;;  %2794 = vst.msk [vmem:[#allocation3 + $0x130] sm:$0xff] %vm1441_vm10, %v2705_v24  ;;  %v2688_v24 = vrot.slane %v1661_v31, 1 }
 0x3f1   :  { %2677 = vst.msk [vmem:[#allocation3 + $0x1b8] sm:$0xff] %vm1306_vm9, %v2605_v42  ;;  %2452 = vrot.lane.b32.xlu0 %v6668_v22, %s3316_s26  ;;  %v2687_v42 = vrot.slane %v1660_v54, 1 }
 0x3f2   :  { %2353 = vrot.lane.b32.xlu1 %v6667_v44, %s3315_s25 }
 0x3f3   :  { %v2737_v28 = vpop.permute.xlu0 %2736 }
 0x3f4   :  { %v2707_v57 = vpop.permute.xlu1 %2706  ;;  %2810 = vst.msk [vmem:[#allocation3 + $0x1b0] sm:$0xff] %vm1441_vm10, %v2737_v28 }
 0x3f5   :  { %2795 = vst.msk [vmem:[#allocation3 + $0x138] sm:$0xff] %vm1441_vm10, %v2707_v57  ;;  %2484 = vrot.lane.b32.xlu0 %v5633_v7, %s3316_s26 }
 0x3f6   :  { %2454 = vrot.lane.b32.xlu1 %v6669_v51, %s3316_s26 }
 0x3f7   :  { %v2838_v20 = vpop.permute.xlu0 %2837 }
 0x3f8   :  { %v2739_v47 = vpop.permute.xlu1 %2738  ;;  %2927 = vst.msk [vmem:[#allocation3 + $0x130] sm:$0xff] %vm1575_vm11, %v2838_v20  ;;  %v2689_v20 = vsel %vm388_vm2, %v2687_v42, %v2688_v24 }
 0x3f9   :  { %2811 = vst.msk [vmem:[#allocation3 + $0x1b8] sm:$0xff] %vm1441_vm10, %v2739_v47  ;;  %2582 = vrot.lane.b32.xlu0 %v4863_v36, %s3317_s28  ;;  %v2293_v36 = vrot.slane %v1659_v40, 1 }
 0x3fa   :  { %2486 = vrot.lane.b32.xlu1 %v5636_v10, %s3316_s26  ;;  %v2290_v10 = vrot.slane %v1657_v45, 1 }
 0x3fb   :  { %v2870_v62 = vpop.permute.xlu0 %2869  ;;  %v2294_v61 = vsel %vm388_vm2, %v2291_v18, %v2293_v36  ;;  %v2823_v36 = vrot.slane %v1662_v30, 2 }
 0x3fc   :  { %v2840_v38 = vpop.permute.xlu1 %2839  ;;  %2943 = vst.msk [vmem:[#allocation3 + $0x1b0] sm:$0xff] %vm1575_vm11, %v2870_v62  ;;  %v2292_v34 = vsel %vm388_vm2, %v2290_v10, %v2291_v18  ;;  %v2821_v18 = vrot.slane %v1661_v31, 2 }
 0x3fd   :  { %2928 = vst.msk [vmem:[#allocation3 + $0x138] sm:$0xff] %vm1575_vm11, %v2840_v38  ;;  %2614 = vrot.lane.b32.xlu0 %v1657_v45, %s3317_s28 }
 0x3fe   :  { %2584 = vrot.lane.b32.xlu1 %v4865_v21, %s3317_s28 }
 0x3ff   :  { %v2210_v27 = vpop.permute.xlu0 %2209  ;;  %v2991_v25 = vld [vmem:[#allocation3 + $0x130] sm:$0xff] }
 0x400   :  { %v2872_v7 = vpop.permute.xlu1 %2871  ;;  %2281 = vst.msk [vmem:[#allocation3 + $0x1c0] sm:$0xff] %vm906_vm6, %v2210_v27 }
 0x401   :  { %2944 = vst.msk [vmem:[#allocation3 + $0x1b8] sm:$0xff] %vm1575_vm11, %v2872_v7  ;;  %2716 = vrot.lane.b32.xlu0 %v6670_v23, %s3318_s10 }
 0x402   :  { %2616 = vrot.lane.b32.xlu1 %v1658_v43, %s3317_s28 }
 0x403   :  { %v2312_v48 = vpop.permute.xlu0 %2311  ;;  %v3007_v13 = vld [vmem:[#allocation3 + $0x1b0] sm:$0xff] }
 0x404   :  { %v2212_v21 = vpop.permute.xlu1 %2211  ;;  %v2992_v39 = vld [vmem:[#allocation3 + $0x138] sm:$0xff]  ;;  %2399 = vst.msk [vmem:[#allocation3 + $0x140] sm:$0xff] %vm1041_vm7, %v2312_v48 }
 0x405   :  { %2282 = vst.msk [vmem:[#allocation3 + $0x1c8] sm:$0xff] %vm906_vm6, %v2212_v21  ;;  %v3036_v8 = vpack.c.bf16 %v2992_v39, %v2991_v25  ;;  %2748 = vrot.lane.b32.xlu0 %v2292_v34, %s3318_s10 }
 0x406   :  { %2718 = vrot.lane.b32.xlu1 %v6671_v14, %s3318_s10 }
 0x407   :  { %v2344_v59 = vpop.permute.xlu0 %2343  ;;  %v3118_v55 = vsel %vm3056_vm12, %v3036_v8, 0  ;;  %v3050_v8 = vld [vmem:[%s6329_s2] sm:$0xff] }
 0x408   :  { %v2314_v16 = vpop.permute.xlu1 %2313  ;;  %v3008_v4 = vld [vmem:[#allocation3 + $0x1b8] sm:$0xff]  ;;  %2415 = vst.msk [vmem:[#allocation3 + $0x1c0] sm:$0xff] %vm1041_vm7, %v2344_v59 }
 0x409   :  { %2400 = vst.msk [vmem:[#allocation3 + $0x148] sm:$0xff] %vm1041_vm7, %v2314_v16  ;;  %v3044_v33 = vpack.c.bf16 %v3008_v4, %v3007_v13  ;;  %2849 = vrot.lane.b32.xlu0 %v6672_v2, %s3319_s29  ;;  %v3320_v13 = vmov 0  }
 0x40a   :  { %2750 = vrot.lane.b32.xlu1 %v2294_v61, %s3318_s10  ;;  %3310 = vset.pattern.permute.xlu0 %v3320_v13 }
 0x40b   :  { %3295 = vmatprep.subr.msk.bf16.mxu1 %vm3056_vm12, %v3044_v33  ;;  %v2445_v32 = vpop.permute.xlu0 %2444 }
 0x40c   :  { %3273 = vmatpush3.bf16.xpose.msra.mxu1 %v3118_v55  ;;  %v2346_v0 = vpop.permute.xlu1 %2345  ;;  %2532 = vst.msk [vmem:[#allocation3 + $0x140] sm:$0xff] %vm1175_vm8, %v2445_v32 }
 0x40d   :  { %2416 = vst.msk [vmem:[#allocation3 + $0x1c8] sm:$0xff] %vm1041_vm7, %v2346_v0  ;;  %2881 = vrot.lane.b32.xlu0 %v2425_v1, %s3319_s29 }
 0x40e   :  { %2851 = vrot.lane.b32.xlu1 %v6673_v3, %s3319_s29 }
 0x40f   :  { %v2477_v29 = vpop.permute.xlu0 %2476 }
 0x410   :  { %v2447_v63 = vpop.permute.xlu1 %2446  ;;  %2548 = vst.msk [vmem:[#allocation3 + $0x1c0] sm:$0xff] %vm1175_vm8, %v2477_v29 }
 0x411   :  { %2533 = vst.msk [vmem:[#allocation3 + $0x148] sm:$0xff] %vm1175_vm8, %v2447_v63  ;;  %2221 = vrot.lane.b32.xlu0 %v1657_v45, %s3314_s24 }
 0x412   :  { %2883 = vrot.lane.b32.xlu1 %v2427_v58, %s3319_s29 }
 0x413   :  { %v2575_v46 = vpop.permute.xlu0 %2574 }
 0x414   :  { %v2479_v60 = vpop.permute.xlu1 %2478  ;;  %2662 = vst.msk [vmem:[#allocation3 + $0x140] sm:$0xff] %vm1306_vm9, %v2575_v46 }
 0x415   :  { %2549 = vst.msk [vmem:[#allocation3 + $0x1c8] sm:$0xff] %vm1175_vm8, %v2479_v60  ;;  %2323 = vrot.lane.b32.xlu0 %v6670_v23, %s3315_s25  ;;  %v2824_v23 = vsel %vm598_vm3, %v2821_v18, %v2823_v36 }
 0x416   :  { %2223 = vrot.lane.b32.xlu1 %v1658_v43, %s3314_s24 }
 0x417   :  { %v2607_v44 = vpop.permute.xlu0 %2606 }
 0x418   :  { %v2577_v53 = vpop.permute.xlu1 %2576  ;;  %2678 = vst.msk [vmem:[#allocation3 + $0x1c0] sm:$0xff] %vm1306_vm9, %v2607_v44 }
 0x419   :  { %2663 = vst.msk [vmem:[#allocation3 + $0x148] sm:$0xff] %vm1306_vm9, %v2577_v53  ;;  %2355 = vrot.lane.b32.xlu0 %v2292_v34, %s3315_s25  ;;  %v6237_v34 = vld [vmem:[%s6328_s1] sm:$0xf] }
 0x41a   :  { %2325 = vrot.lane.b32.xlu1 %v6671_v14, %s3315_s25  ;;  %3264 = vmatprep.mubr.msk.bf16.mxu0 %vm3056_vm12, %v6237_v34 }
 0x41b   :  { %v2709_v17 = vpop.permute.xlu0 %2708  ;;  %3265 = vmatmul.mubr.msk.bf16.vlgmr.msra.gmra.mrb[0].mxu0 %vm3056_vm12, %v6237_v34  ;;  %3282 = vmatprep.mubr.msk.bf16.mxu1 %vm3056_vm12, %v6237_v34 }
 0x41c   :  { %v2609_v6 = vpop.permute.xlu1 %2608  ;;  %2796 = vst.msk [vmem:[#allocation3 + $0x140] sm:$0xff] %vm1441_vm10, %v2709_v17 }
 0x41d   :  { %2679 = vst.msk [vmem:[#allocation3 + $0x1c8] sm:$0xff] %vm1306_vm9, %v2609_v6  ;;  %2456 = vrot.lane.b32.xlu0 %v6672_v2, %s3316_s26 }
 0x41e   :  { %2357 = vrot.lane.b32.xlu1 %v2294_v61, %s3315_s25 }
 0x41f   :  { %v2741_v22 = vpop.permute.xlu0 %2740 }
 0x420   :  { %v2711_v15 = vpop.permute.xlu1 %2710  ;;  %2812 = vst.msk [vmem:[#allocation3 + $0x1c0] sm:$0xff] %vm1441_vm10, %v2741_v22 }
 0x421   :  { %2797 = vst.msk [vmem:[#allocation3 + $0x148] sm:$0xff] %vm1441_vm10, %v2711_v15  ;;  %2488 = vrot.lane.b32.xlu0 %v2425_v1, %s3316_s26 }
 0x422   :  { %2458 = vrot.lane.b32.xlu1 %v6673_v3, %s3316_s26 }
 0x423   :  { %v2842_v49 = vpop.permute.xlu0 %2841 }
 0x424   :  { %v2743_v51 = vpop.permute.xlu1 %2742  ;;  %2929 = vst.msk [vmem:[#allocation3 + $0x140] sm:$0xff] %vm1575_vm11, %v2842_v49 }
 0x425   :  { %2813 = vst.msk [vmem:[#allocation3 + $0x1c8] sm:$0xff] %vm1441_vm10, %v2743_v51  ;;  %2586 = vrot.lane.b32.xlu0 %v4885_v50, %s3317_s28  ;;  %v2690_v50 = vrot.slane %v1662_v30, 1 }
 0x426   :  { %2490 = vrot.lane.b32.xlu1 %v2427_v58, %s3316_s26 }
 0x427   :  { %v2874_v11 = vpop.permute.xlu0 %2873  ;;  %v2691_v45 = vsel %vm388_vm2, %v2688_v24, %v2690_v50 }
 0x428   :  { %v2844_v37 = vpop.permute.xlu1 %2843  ;;  %2945 = vst.msk [vmem:[#allocation3 + $0x1c0] sm:$0xff] %vm1575_vm11, %v2874_v11 }
 0x429   :  { %2930 = vst.msk [vmem:[#allocation3 + $0x148] sm:$0xff] %vm1575_vm11, %v2844_v37  ;;  %2618 = vrot.lane.b32.xlu0 %v1660_v54, %s3317_s28 }
 0x42a   :  { %2588 = vrot.lane.b32.xlu1 %v4887_v52, %s3317_s28 }
 0x42b   :  { %v2214_v57 = vpop.permute.xlu0 %2213  ;;  %v2993_v28 = vld [vmem:[#allocation3 + $0x140] sm:$0xff] }
 0x42c   :  { %v2876_v9 = vpop.permute.xlu1 %2875  ;;  %2283 = vst.msk [vmem:[#allocation3 + $0x1d0] sm:$0xff] %vm906_vm6, %v2214_v57 }
 0x42d   :  { %2946 = vst.msk [vmem:[#allocation3 + $0x1c8] sm:$0xff] %vm1575_vm11, %v2876_v9  ;;  %2720 = vrot.lane.b32.xlu0 %v5293_v56, %s3318_s10  ;;  %v2820_v56 = vrot.slane %v1660_v54, 2 }
 0x42e   :  { %2620 = vrot.lane.b32.xlu1 %v1661_v31, %s3317_s28 }
 0x42f   :  { %v2316_v38 = vpop.permute.xlu0 %2315  ;;  %v3009_v62 = vld [vmem:[#allocation3 + $0x1c0] sm:$0xff]  ;;  %v2822_v25 = vsel %vm598_vm3, %v2820_v56, %v2821_v18 }
 0x430   :  { %v2216_v52 = vpop.permute.xlu1 %2215  ;;  %v2994_v47 = vld [vmem:[#allocation3 + $0x148] sm:$0xff]  ;;  %2401 = vst.msk [vmem:[#allocation3 + $0x150] sm:$0xff] %vm1041_vm7, %v2316_v38 }
 0x431   :  { %2284 = vst.msk [vmem:[#allocation3 + $0x1d8] sm:$0xff] %vm906_vm6, %v2216_v52  ;;  %v3037_v43 = vpack.c.bf16 %v2994_v47, %v2993_v28  ;;  %2752 = vrot.lane.b32.xlu0 %v2689_v20, %s3318_s10 }
 0x432   :  { %2722 = vrot.lane.b32.xlu1 %v5298_v35, %s3318_s10 }
 0x433   :  { %v2348_v35 = vpop.permute.xlu0 %2347  ;;  %v3121_v27 = vsel %vm3056_vm12, %v3037_v43, 0 }
 0x434   :  { %v2318_v7 = vpop.permute.xlu1 %2317  ;;  %v3010_v40 = vld [vmem:[#allocation3 + $0x1c8] sm:$0xff]  ;;  %2417 = vst.msk [vmem:[#allocation3 + $0x1d0] sm:$0xff] %vm1041_vm7, %v2348_v35 }
 0x435   :  { %2402 = vst.msk [vmem:[#allocation3 + $0x158] sm:$0xff] %vm1041_vm7, %v2318_v7  ;;  %v3045_v10 = vpack.c.bf16 %v3010_v40, %v3009_v62  ;;  %2853 = vrot.lane.b32.xlu0 %v5536_v41, %s3319_s29 }
 0x436   :  { %2754 = vrot.lane.b32.xlu1 %v2691_v45, %s3318_s10 }
 0x437   :  { %3296 = vmatprep.subr.msk.bf16.mxu1 %vm3056_vm12, %v3045_v10  ;;  %v2449_v39 = vpop.permute.xlu0 %2448 }
 0x438   :  { %3275 = vmatpush3.bf16.xpose.msra.mxu1 %v3121_v27  ;;  %v2350_v21 = vpop.permute.xlu1 %2349  ;;  %2534 = vst.msk [vmem:[#allocation3 + $0x150] sm:$0xff] %vm1175_vm8, %v2449_v39 }
 0x439   :  { %2418 = vst.msk [vmem:[#allocation3 + $0x1d8] sm:$0xff] %vm1041_vm7, %v2350_v21  ;;  %2885 = vrot.lane.b32.xlu0 %v2822_v25, %s3319_s29 }
 0x43a   :  { %2855 = vrot.lane.b32.xlu1 %v5542_v5, %s3319_s29 }
 0x43b   :  { %v2481_v41 = vpop.permute.xlu0 %2480 }
 0x43c   :  { %v2451_v14 = vpop.permute.xlu1 %2450  ;;  %2550 = vst.msk [vmem:[#allocation3 + $0x1d0] sm:$0xff] %vm1175_vm8, %v2481_v41 }
 0x43d   :  { %2535 = vst.msk [vmem:[#allocation3 + $0x158] sm:$0xff] %vm1175_vm8, %v2451_v14  ;;  %3053 = vperm.xlu0 %3310, %v3050_v8  }
 0x43e   :  { %2887 = vrot.lane.b32.xlu1 %v2824_v23, %s3319_s29 }
 0x43f   :  { %v2579_v48 = vpop.permute.xlu0 %2578 }
 0x440   :  { %v2483_v5 = vpop.permute.xlu1 %2482  ;;  %2664 = vst.msk [vmem:[#allocation3 + $0x150] sm:$0xff] %vm1306_vm9, %v2579_v48 }
 0x441   :  { %2551 = vst.msk [vmem:[#allocation3 + $0x1d8] sm:$0xff] %vm1175_vm8, %v2483_v5 }
 0x443   :  { %v2611_v16 = vpop.permute.xlu0 %2610 }
 0x444   :  { %v2581_v61 = vpop.permute.xlu1 %2580  ;;  %2680 = vst.msk [vmem:[#allocation3 + $0x1d0] sm:$0xff] %vm1306_vm9, %v2611_v16 }
 0x445   :  { %2665 = vst.msk [vmem:[#allocation3 + $0x158] sm:$0xff] %vm1306_vm9, %v2581_v61 }
 0x447   :  { %v2713_v33 = vpop.permute.xlu0 %2712 }
 0x448   :  { %v2613_v4 = vpop.permute.xlu1 %2612  ;;  %2798 = vst.msk [vmem:[#allocation3 + $0x150] sm:$0xff] %vm1441_vm10, %v2713_v33 }
 0x449   :  { %2681 = vst.msk [vmem:[#allocation3 + $0x1d8] sm:$0xff] %vm1306_vm9, %v2613_v4 }
 0x44b   :  { %v2745_v12 = vpop.permute.xlu0 %2744 }
 0x44c   :  { %v2715_v19 = vpop.permute.xlu1 %2714  ;;  %2814 = vst.msk [vmem:[#allocation3 + $0x1d0] sm:$0xff] %vm1441_vm10, %v2745_v12 }
 0x44d   :  { %2799 = vst.msk [vmem:[#allocation3 + $0x158] sm:$0xff] %vm1441_vm10, %v2715_v19 }
 0x44f   :  { %v2846_v55 = vpop.permute.xlu0 %2845 }
 0x450   :  { %v2747_v59 = vpop.permute.xlu1 %2746  ;;  %2931 = vst.msk [vmem:[#allocation3 + $0x150] sm:$0xff] %vm1575_vm11, %v2846_v55 }
 0x451   :  { %2815 = vst.msk [vmem:[#allocation3 + $0x1d8] sm:$0xff] %vm1441_vm10, %v2747_v59 }
 0x453   :  { %v2878_v0 = vpop.permute.xlu0 %2877 }
 0x454   :  { %v2848_v26 = vpop.permute.xlu1 %2847  ;;  %2947 = vst.msk [vmem:[#allocation3 + $0x1d0] sm:$0xff] %vm1575_vm11, %v2878_v0 }
 0x455   :  { %2932 = vst.msk [vmem:[#allocation3 + $0x158] sm:$0xff] %vm1575_vm11, %v2848_v26 }
 0x457   :  { %v2218_v3 = vpop.permute.xlu0 %2217  ;;  %v2995_v32 = vld [vmem:[#allocation3 + $0x150] sm:$0xff] }
 0x458   :  { %v2880_v2 = vpop.permute.xlu1 %2879  ;;  %2285 = vst.msk [vmem:[#allocation3 + $0x1e0] sm:$0xff] %vm906_vm6, %v2218_v3 }
 0x459   :  { %2948 = vst.msk [vmem:[#allocation3 + $0x1d8] sm:$0xff] %vm1575_vm11, %v2880_v2 }
 0x45b   :  { %v2320_v63 = vpop.permute.xlu0 %2319  ;;  %v3011_v29 = vld [vmem:[#allocation3 + $0x1d0] sm:$0xff] }
 0x45c   :  { %v2220_v1 = vpop.permute.xlu1 %2219  ;;  %v2996_v58 = vld [vmem:[#allocation3 + $0x158] sm:$0xff]  ;;  %2403 = vst.msk [vmem:[#allocation3 + $0x160] sm:$0xff] %vm1041_vm7, %v2320_v63 }
 0x45d   :  { %2286 = vst.msk [vmem:[#allocation3 + $0x1e8] sm:$0xff] %vm906_vm6, %v2220_v1  ;;  %v3038_v60 = vpack.c.bf16 %v2996_v58, %v2995_v32 }
 0x45f   :  { %v2352_v6 = vpop.permute.xlu0 %2351  ;;  %v3124_v17 = vsel %vm3056_vm12, %v3038_v60, 0 }
 0x460   :  { %v2322_v46 = vpop.permute.xlu1 %2321  ;;  %v3012_v53 = vld [vmem:[#allocation3 + $0x1d8] sm:$0xff]  ;;  %2419 = vst.msk [vmem:[#allocation3 + $0x1e0] sm:$0xff] %vm1041_vm7, %v2352_v6 }
 0x461   :  { %2404 = vst.msk [vmem:[#allocation3 + $0x168] sm:$0xff] %vm1041_vm7, %v2322_v46  ;;  %v3046_v44 = vpack.c.bf16 %v3012_v53, %v3011_v29 }
 0x463   :  { %3297 = vmatprep.subr.msk.bf16.mxu1 %vm3056_vm12, %v3046_v44  ;;  %v2453_v22 = vpop.permute.xlu0 %2452 }
 0x464   :  { %3277 = vmatpush3.bf16.xpose.msra.mxu1 %v3124_v17  ;;  %v2354_v15 = vpop.permute.xlu1 %2353  ;;  %2536 = vst.msk [vmem:[#allocation3 + $0x160] sm:$0xff] %vm1175_vm8, %v2453_v22 }
 0x465   :  { %2420 = vst.msk [vmem:[#allocation3 + $0x1e8] sm:$0xff] %vm1041_vm7, %v2354_v15 }
 0x467   :  { %v2485_v49 = vpop.permute.xlu0 %2484 }
 0x468   :  { %v2455_v51 = vpop.permute.xlu1 %2454  ;;  %2552 = vst.msk [vmem:[#allocation3 + $0x1e0] sm:$0xff] %vm1175_vm8, %v2485_v49 }
 0x469   :  { %2537 = vst.msk [vmem:[#allocation3 + $0x168] sm:$0xff] %vm1175_vm8, %v2455_v51 }
 0x46b   :  { %v2583_v54 = vpop.permute.xlu0 %2582 }
 0x46c   :  { %v2487_v37 = vpop.permute.xlu1 %2486  ;;  %2666 = vst.msk [vmem:[#allocation3 + $0x160] sm:$0xff] %vm1306_vm9, %v2583_v54 }
 0x46d   :  { %2553 = vst.msk [vmem:[#allocation3 + $0x1e8] sm:$0xff] %vm1175_vm8, %v2487_v37 }
 0x46f   :  { %v2615_v31 = vpop.permute.xlu0 %2614 }
 0x470   :  { %v2585_v11 = vpop.permute.xlu1 %2584  ;;  %2682 = vst.msk [vmem:[#allocation3 + $0x1e0] sm:$0xff] %vm1306_vm9, %v2615_v31 }
 0x471   :  { %2667 = vst.msk [vmem:[#allocation3 + $0x168] sm:$0xff] %vm1306_vm9, %v2585_v11 }
 0x473   :  { %v2717_v30 = vpop.permute.xlu0 %2716 }
 0x474   :  { %v2617_v9 = vpop.permute.xlu1 %2616  ;;  %2800 = vst.msk [vmem:[#allocation3 + $0x160] sm:$0xff] %vm1441_vm10, %v2717_v30 }
 0x475   :  { %2683 = vst.msk [vmem:[#allocation3 + $0x1e8] sm:$0xff] %vm1306_vm9, %v2617_v9 }
 0x477   :  { %v2749_v24 = vpop.permute.xlu0 %2748 }
 0x478   :  { %v2719_v42 = vpop.permute.xlu1 %2718  ;;  %2816 = vst.msk [vmem:[#allocation3 + $0x1e0] sm:$0xff] %vm1441_vm10, %v2749_v24 }
 0x479   :  { %2801 = vst.msk [vmem:[#allocation3 + $0x168] sm:$0xff] %vm1441_vm10, %v2719_v42 }
 0x47b   :  { %v2850_v50 = vpop.permute.xlu0 %2849 }
 0x47c   :  { %v2751_v57 = vpop.permute.xlu1 %2750  ;;  %2933 = vst.msk [vmem:[#allocation3 + $0x160] sm:$0xff] %vm1575_vm11, %v2850_v50 }
 0x47d   :  { %2817 = vst.msk [vmem:[#allocation3 + $0x1e8] sm:$0xff] %vm1441_vm10, %v2751_v57 }
 0x47f   :  { %v2882_v28 = vpop.permute.xlu0 %2881 }
 0x480   :  { %v2852_v52 = vpop.permute.xlu1 %2851  ;;  %2949 = vst.msk [vmem:[#allocation3 + $0x1e0] sm:$0xff] %vm1575_vm11, %v2882_v28 }
 0x481   :  { %2934 = vst.msk [vmem:[#allocation3 + $0x168] sm:$0xff] %vm1575_vm11, %v2852_v52 }
 0x483   :  { %v2222_v20 = vpop.permute.xlu0 %2221  ;;  %v2997_v45 = vld [vmem:[#allocation3 + $0x160] sm:$0xff] }
 0x484   :  { %v2884_v47 = vpop.permute.xlu1 %2883  ;;  %2287 = vst.msk [vmem:[#allocation3 + $0x1f0] sm:$0xff] %vm906_vm6, %v2222_v20 }
 0x485   :  { %2950 = vst.msk [vmem:[#allocation3 + $0x1e8] sm:$0xff] %vm1575_vm11, %v2884_v47 }
 0x487   :  { %v2324_v43 = vpop.permute.xlu0 %2323  ;;  %v3013_v7 = vld [vmem:[#allocation3 + $0x1e0] sm:$0xff] }
 0x488   :  { %v2224_v38 = vpop.permute.xlu1 %2223  ;;  %v2998_v62 = vld [vmem:[#allocation3 + $0x168] sm:$0xff]  ;;  %2405 = vst.msk [vmem:[#allocation3 + $0x170] sm:$0xff] %vm1041_vm7, %v2324_v43 }
 0x489   :  { %2288 = vst.msk [vmem:[#allocation3 + $0x1f8] sm:$0xff] %vm906_vm6, %v2224_v38  ;;  %v3039_v40 = vpack.c.bf16 %v2998_v62, %v2997_v45 }
 0x48b   :  { %v2356_v35 = vpop.permute.xlu0 %2355  ;;  %v3127_v27 = vsel %vm3056_vm12, %v3039_v40, 0 }
 0x48c   :  { %v2326_v10 = vpop.permute.xlu1 %2325  ;;  %v3014_v56 = vld [vmem:[#allocation3 + $0x1e8] sm:$0xff]  ;;  %2421 = vst.msk [vmem:[#allocation3 + $0x1f0] sm:$0xff] %vm1041_vm7, %v2356_v35 }
 0x48d   :  { %2406 = vst.msk [vmem:[#allocation3 + $0x178] sm:$0xff] %vm1041_vm7, %v2326_v10  ;;  %v3047_v18 = vpack.c.bf16 %v3014_v56, %v3013_v7 }
 0x48f   :  { %3298 = vmatprep.subr.msk.bf16.mxu1 %vm3056_vm12, %v3047_v18  ;;  %v2457_v21 = vpop.permute.xlu0 %2456 }
 0x490   :  { %3279 = vmatpush3.bf16.xpose.msra.mxu1 %v3127_v27  ;;  %v2358_v36 = vpop.permute.xlu1 %2357  ;;  %2538 = vst.msk [vmem:[#allocation3 + $0x170] sm:$0xff] %vm1175_vm8, %v2457_v21 }
 0x491   :  { %2422 = vst.msk [vmem:[#allocation3 + $0x1f8] sm:$0xff] %vm1041_vm7, %v2358_v36 }
 0x493   :  { %v2489_v39 = vpop.permute.xlu0 %2488 }
 0x494   :  { %v2459_v25 = vpop.permute.xlu1 %2458  ;;  %2554 = vst.msk [vmem:[#allocation3 + $0x1f0] sm:$0xff] %vm1175_vm8, %v2489_v39 }
 0x495   :  { %2539 = vst.msk [vmem:[#allocation3 + $0x178] sm:$0xff] %vm1175_vm8, %v2459_v25 }
 0x497   :  { %v2587_v14 = vpop.permute.xlu0 %2586 }
 0x498   :  { %v2491_v23 = vpop.permute.xlu1 %2490  ;;  %2668 = vst.msk [vmem:[#allocation3 + $0x170] sm:$0xff] %vm1306_vm9, %v2587_v14 }
 0x499   :  { %2555 = vst.msk [vmem:[#allocation3 + $0x1f8] sm:$0xff] %vm1175_vm8, %v2491_v23 }
 0x49b   :  { %v2619_v5 = vpop.permute.xlu0 %2618 }
 0x49c   :  { %v2589_v41 = vpop.permute.xlu1 %2588  ;;  %2684 = vst.msk [vmem:[#allocation3 + $0x1f0] sm:$0xff] %vm1306_vm9, %v2619_v5 }
 0x49d   :  { %2669 = vst.msk [vmem:[#allocation3 + $0x178] sm:$0xff] %vm1306_vm9, %v2589_v41 }
 0x49f   :  { %v2721_v61 = vpop.permute.xlu0 %2720 }
 0x4a0   :  { %v2621_v48 = vpop.permute.xlu1 %2620  ;;  %2802 = vst.msk [vmem:[#allocation3 + $0x170] sm:$0xff] %vm1441_vm10, %v2721_v61 }
 0x4a1   :  { %2685 = vst.msk [vmem:[#allocation3 + $0x1f8] sm:$0xff] %vm1306_vm9, %v2621_v48 }
 0x4a3   :  { %v2753_v8 = vpop.permute.xlu0 %2752 }
 0x4a4   :  { %v2723_v13 = vpop.permute.xlu1 %2722  ;;  %2818 = vst.msk [vmem:[#allocation3 + $0x1f0] sm:$0xff] %vm1441_vm10, %v2753_v8 }
 0x4a5   :  { %2803 = vst.msk [vmem:[#allocation3 + $0x178] sm:$0xff] %vm1441_vm10, %v2723_v13 }
 0x4a7   :  { %v2854_v4 = vpop.permute.xlu0 %2853 }
 0x4a8   :  { %v2755_v16 = vpop.permute.xlu1 %2754  ;;  %2935 = vst.msk [vmem:[#allocation3 + $0x170] sm:$0xff] %vm1575_vm11, %v2854_v4 }
 0x4a9   :  { %2819 = vst.msk [vmem:[#allocation3 + $0x1f8] sm:$0xff] %vm1441_vm10, %v2755_v16 }
 0x4ab   :  { %v2886_v19 = vpop.permute.xlu0 %2885 }
 0x4ac   :  { %v2856_v33 = vpop.permute.xlu1 %2855  ;;  %2951 = vst.msk [vmem:[#allocation3 + $0x1f0] sm:$0xff] %vm1575_vm11, %v2886_v19 }
 0x4ad   :  { %2936 = vst.msk [vmem:[#allocation3 + $0x178] sm:$0xff] %vm1575_vm11, %v2856_v33 }
 0x4af   :  { %v2999_v59 = vld [vmem:[#allocation3 + $0x170] sm:$0xff] }
 0x4b0   :  { %v2888_v12 = vpop.permute.xlu1 %2887 }
 0x4b1   :  { %2952 = vst.msk [vmem:[#allocation3 + $0x1f8] sm:$0xff] %vm1575_vm11, %v2888_v12 }
 0x4b3   :  { %v3015_v26 = vld [vmem:[#allocation3 + $0x1f0] sm:$0xff] }
 0x4b4   :  { %v3000_v55 = vld [vmem:[#allocation3 + $0x178] sm:$0xff] }
 0x4b5   :  { %v3040_v0 = vpack.c.bf16 %v3000_v55, %v2999_v59 }
 0x4b7   :  { %v3130_v1 = vsel %vm3056_vm12, %v3040_v0, 0 }
 0x4b8   :  { %v3016_v2 = vld [vmem:[#allocation3 + $0x1f8] sm:$0xff] }
 0x4b9   :  { %v3048_v3 = vpack.c.bf16 %v3016_v2, %v3015_v26 }
 0x4bb   :  { %3299 = vmatprep.subr.msk.bf16.mxu1 %vm3056_vm12, %v3048_v3 }
 0x4bc   :  { %3281 = vmatpush3.bf16.xpose.msra.mxu1 %v3130_v1  ;;  %v3054_v32 = vpop.permute.xlu0 %3053 }
 0x4c3   :  { %3283 = vmatmul.mubr.msk.bf16.vlgmr.msra.gmra.mrb[0].mxu1 %vm3056_vm12, %v6237_v34 }
 0x4ee   :  { %v3190_v58 = vpop.f32.mrb[0].mxu0 }
 0x4ef   :  { %v3192_v63 = vpop.f32.mrb[1].mxu0  ;;  %v3191_v29 = vadd.f32 %v3190_v58, %v3054_v32 }
 0x4f0   :  { %v3194_v60 = vpop.f32.mrb[2].mxu0  ;;  %v3193_v46 = vadd.f32 %v3192_v63, %v3054_v32 }
 0x4f1   :  { %3238 = vst [vmem:[%s6330_s3] sm:$0xff] %v3191_v29  ;;  %v3195_v53 = vpop.f32.mrb[3].mxu0 }
 0x4f2   :  { %3239 = vst [vmem:[%s6330_s3 + $0x8] sm:$0xff] %v3193_v46 }
 0x596   :  { %v3231_v44 = vpop.f32.mrb[0].mxu1 }
 0x597   :  { %v3232_v6 = vadd.f32 %v3231_v44, %v3054_v32  ;;  %v3233_v17 = vpop.f32.mrb[1].mxu1 }
 0x598   :  { %v3234_v15 = vadd.f32 %v3233_v17, %v3054_v32  ;;  %v3235_v34 = vpop.f32.mrb[2].mxu1 }
 0x599   :  { %3240 = vst [vmem:[%s6330_s3 + $0x10] sm:$0xff] %v3232_v6  ;;  %v3236_v22 = vpop.f32.mrb[3].mxu1 }
 0x59a   :  { %3241 = vst [vmem:[%s6330_s3 + $0x18] sm:$0xff] %v3234_v15 }

</bundles_post_ra>
